<compile_context>
chip_gen: v5e
topology: v5e:2x2
jax: 0.10.0
libtpu: 0.0.40
codegen_flags: <defaults>
</compile_context>

<pallas_src>
import jax
import jax.numpy as jnp
from jax import lax
from jax.experimental import pallas as pl
from jax.experimental.pallas import tpu as pltpu

F_IN = 4            # n_features
SEQ = 16            # seq_length
C1, C2 = 32, 64     # conv channels
K = 3               # conv kernel size
HID = 64            # GRU hidden size per direction
H2 = 2 * HID        # fwd|bwd lane-concatenated width
EPS = 1e-5          # BatchNorm eps


# ---------------------------------------------------------------------------
# The single fused kernel
# ---------------------------------------------------------------------------
def _stock_forward_kernel(
        # inputs
        x_ref,
        w1_ref, s1_ref, t1_ref, w2_ref, s2_ref, t2_ref,
        wf0_ref, bf0_ref, wb0_ref, bb0_ref, whh0_ref, bhhn0_ref,
        wf1_ref, bf1_ref, wb1_ref, bb1_ref, whh1_ref, bhhn1_ref,
        aw_ref, ab_ref,
        fc1_ref, s3_ref, t3_ref, fc2_ref, s4_ref, t4_ref, fc3_ref, b3_ref,
        # output
        out_ref,
        # VMEM scratch
        h1_ref, h2_ref, cnn_ref, gif_ref, gib_ref, steps_ref, seq1_ref, seq2_ref):
    B, L, _ = x_ref.shape
    L1, L2 = L - 2, L - 4
    T = L2 // 2                 # pooled sequence length
    NTB = T * B                 # rows of the flattened (time, batch) axis

    # ---------- CNN: conv1+BN1+ReLU, conv2+BN2+ReLU, MaxPool1d(2) ----------
    # B is tiny; everything lives in one kernel invocation (no grid, weights
    # loaded once).  Each conv is a sum of K shifted tap-matmuls.
    for b in range(B):
        acc1 = jnp.zeros((L1, C1), jnp.float32)
        for k in range(K):
            acc1 = acc1 + jnp.dot(x_ref[b, pl.ds(k, L1), :], w1_ref[k],
                                  preferred_element_type=jnp.float32)
        h1_ref[...] = jnp.maximum(acc1 * s1_ref[...] + t1_ref[...], 0.0)

        acc2 = jnp.zeros((L2, C2), jnp.float32)
        for k in range(K):
            acc2 = acc2 + jnp.dot(h1_ref[pl.ds(k, L2), :], w2_ref[k],
                                  preferred_element_type=jnp.float32)
        h2_ref[...] = jnp.maximum(acc2 * s2_ref[...] + t2_ref[...], 0.0)

        # MaxPool1d(kernel=2, stride=2) over time via strided row reads.
        pooled = jnp.maximum(h2_ref[pl.ds(0, T, stride=2), :],
                             h2_ref[pl.ds(1, T, stride=2), :])          # (T, C2)
        cnn_ref[pl.ds(b * T, T), :] = pooled        # batch-major rows: b*T + t
    # TODO(synk): Dropout(0.2) after the pool is identity in eval mode.

    # ---------- GRU: 2 layers, bidirectional, fwd+bwd fused --------------------
    def input_proj(x2d, wf_ref, bf_ref, wb_ref, bb_ref):
        # Hoisted input projections for ALL timesteps, both directions, per
        # gate.  Weights are zero-padded to 128 lanes so fwd results land in
        # lanes [:64] and bwd results in lanes [64:] with no lane slicing.
        # b_ih (and b_hh for the r/z gates) are pre-folded into bf/bb.
        for g in range(3):
            gif_ref[pl.ds(g * NTB, NTB), :] = (
                jnp.dot(x2d, wf_ref[g], preferred_element_type=jnp.float32)
                + bf_ref[g])
            gib_ref[pl.ds(g * NTB, NTB), :] = (
                jnp.dot(x2d, wb_ref[g], preferred_element_type=jnp.float32)
                + bb_ref[g])

    def bigru_layer(whh_ref, bhhn_ref, seq_out_ref, gi_t_major):
        # Hidden state h = [h_fwd | h_bwd] (B, 128); recurrent weights are
        # block-diagonal (128, 128) per gate => one MXU push per gate per step
        # covers both directions and the whole batch.
        whh_r, whh_z, whh_n = whh_ref[0], whh_ref[1], whh_ref[2]
        bhh_n = jnp.broadcast_to(bhhn_ref[...], (B, H2))   # hoisted broadcast
        h = jnp.zeros((B, H2), jnp.float32)
        for t in range(T):
            tb = T - 1 - t      # bwd direction walks time in reverse
            if gi_t_major:      # rows = t*B + b  (contiguous per time)
                sl_f = [pl.ds(g * NTB + t * B, B) for g in range(3)]
                sl_b = [pl.ds(g * NTB + tb * B, B) for g in range(3)]
            else:               # rows = b*T + t  (strided per time)
                sl_f = [pl.ds(g * NTB + t, B, stride=T) for g in range(3)]
                sl_b = [pl.ds(g * NTB + tb, B, stride=T) for g in range(3)]
            gi_r = gif_ref[sl_f[0], :] + gib_ref[sl_b[0], :]
            gi_z = gif_ref[sl_f[1], :] + gib_ref[sl_b[1], :]
            gi_n = gif_ref[sl_f[2], :] + gib_ref[sl_b[2], :]
            gh_r = jnp.dot(h, whh_r, preferred_element_type=jnp.float32)
            gh_z = jnp.dot(h, whh_z, preferred_element_type=jnp.float32)
            gh_n = jnp.dot(h, whh_n, preferred_element_type=jnp.float32) + bhh_n
            r = jax.nn.sigmoid(gi_r + gh_r)
            z = jax.nn.sigmoid(gi_z + gh_z)
            n = jnp.tanh(gi_n + r * gh_n)
            h = (1.0 - z) * n + z * h
            steps_ref[pl.ds(t * B, B), :] = h           # per-step snapshot
        # Re-align to time order: time-t output = [fwd half of step t |
        # bwd half of step T-1-t], written as lane-dense 128-wide rows.
        lane = lax.broadcasted_iota(jnp.int32, (B, H2), 1)
        is_fwd = lane < HID
        for t in range(T):
            fwd = steps_ref[pl.ds(t * B, B), :]
            bwd = steps_ref[pl.ds((T - 1 - t) * B, B), :]
            seq_out_ref[pl.ds(t * B, B), :] = jnp.where(is_fwd, fwd, bwd)

    input_proj(cnn_ref[...], wf0_ref, bf0_ref, wb0_ref, bb0_ref)
    bigru_layer(whh0_ref, bhhn0_ref, seq1_ref, gi_t_major=False)
    # TODO(synk): inter-layer GRU dropout (p=0.2) is identity in eval mode.
    input_proj(seq1_ref[...], wf1_ref, bf1_ref, wb1_ref, bb1_ref)
    bigru_layer(whh1_ref, bhhn1_ref, seq2_ref, gi_t_major=True)

    # ---------- attention over time + MLP head ---------------------------------
    for b in range(B):
        xb = seq2_ref[pl.ds(b, T, stride=B), :]                  # (T, 128)
        scores = jnp.sum(xb * aw_ref[...], axis=-1, keepdims=True) + ab_ref[...]
        m = jnp.max(scores, axis=0, keepdims=True)
        e = jnp.exp(scores - m)
        wts = e / jnp.sum(e, axis=0, keepdims=True)              # softmax over time
        ctx = jnp.sum(xb * wts, axis=0, keepdims=True)           # (1, 128)
        hh = jnp.dot(ctx, fc1_ref[...], preferred_element_type=jnp.float32)
        hh = jnp.maximum(hh * s3_ref[...] + t3_ref[...], 0.0)    # fc1 + bn3 + relu
        hh = jnp.dot(hh, fc2_ref[...], preferred_element_type=jnp.float32)
        hh = jnp.maximum(hh * s4_ref[...] + t4_ref[...], 0.0)    # fc2 + bn4 + relu
        o = jnp.dot(hh, fc3_ref[...], preferred_element_type=jnp.float32) + b3_ref[...]
        out_ref[pl.ds(b, 1), :] = o
    # TODO(synk): head dropout layers (p=0.2) are identity in eval mode.


# ---------------------------------------------------------------------------
# Wrapper: one pallas_call for the whole forward pass
# ---------------------------------------------------------------------------
def forward(params, x):
    B, L, _ = x.shape
    T = (L - 4) // 2
    vmem = pl.BlockSpec(memory_space=pltpu.MemorySpace.VMEM)
    g0, g1 = params['gru0'], params['gru1']
    args = (x,
            params['w1'], params['s1'], params['t1'],
            params['w2'], params['s2'], params['t2'],
            g0['wihf'], g0['bif'], g0['wihb'], g0['bib'], g0['whh'], g0['bhhn'],
            g1['wihf'], g1['bif'], g1['wihb'], g1['bib'], g1['whh'], g1['bhhn'],
            params['aw'], params['ab'],
            params['fc1_w'], params['s3'], params['t3'],
            params['fc2_w'], params['s4'], params['t4'],
            params['fc3_w'], params['fc3_b'])
    return pl.pallas_call(
        _stock_forward_kernel,
        out_shape=jax.ShapeDtypeStruct((B, 1), jnp.float32),
        in_specs=[vmem] * len(args),
        out_specs=vmem,
        scratch_shapes=[
            pltpu.VMEM((L - 2, C1), jnp.float32),        # h1 (conv1 activations)
            pltpu.VMEM((L - 4, C2), jnp.float32),        # h2 (conv2 activations)
            pltpu.VMEM((B * T, C2), jnp.float32),        # pooled CNN output
            pltpu.VMEM((3 * B * T, H2), jnp.float32),    # hoisted gi (fwd, padded)
            pltpu.VMEM((3 * B * T, H2), jnp.float32),    # hoisted gi (bwd, padded)
            pltpu.VMEM((B * T, H2), jnp.float32),        # per-step GRU states
            pltpu.VMEM((B * T, H2), jnp.float32),        # GRU layer-1 output
            pltpu.VMEM((B * T, H2), jnp.float32),        # GRU layer-2 output
        ],
    )(*args)


# ---------------------------------------------------------------------------
# Deterministic parameter init (PyTorch layouts) + conversion to kernel layouts
# ---------------------------------------------------------------------------
def init_raw_params(key):
    ks = iter(jax.random.split(key, 64))

    def nrm(shape, scale=0.1):
        return scale * jax.random.normal(next(ks), shape, jnp.float32)

    def unif(shape, lo, hi):
        return jax.random.uniform(next(ks), shape, jnp.float32, lo, hi)

    raw = {}
    raw['conv1_w'] = nrm((C1, F_IN, K)); raw['conv1_b'] = nrm((C1,))
    raw['bn1'] = (unif((C1,), 0.5, 1.5), nrm((C1,)), nrm((C1,)), unif((C1,), 0.5, 1.5))
    raw['conv2_w'] = nrm((C2, C1, K)); raw['conv2_b'] = nrm((C2,))
    raw['bn2'] = (unif((C2,), 0.5, 1.5), nrm((C2,)), nrm((C2,)), unif((C2,), 0.5, 1.5))
    raw['gru'] = []
    for layer in range(2):
        I = C2 if layer == 0 else H2
        lp = {}
        for d in ('fwd', 'bwd'):
            lp[d] = (nrm((3 * HID, I)), nrm((3 * HID, HID)),
                     nrm((3 * HID,)), nrm((3 * HID,)))
        raw['gru'].append(lp)
    raw['attn_w'] = nrm((1, H2)); raw['attn_b'] = nrm((1,))
    raw['fc1_w'] = nrm((64, H2)); raw['fc1_b'] = nrm((64,))
    raw['bn3'] = (unif((64,), 0.5, 1.5), nrm((64,)), nrm((64,)), unif((64,), 0.5, 1.5))
    raw['fc2_w'] = nrm((32, 64)); raw['fc2_b'] = nrm((32,))
    raw['bn4'] = (unif((32,), 0.5, 1.5), nrm((32,)), nrm((32,)), unif((32,), 0.5, 1.5))
    raw['fc3_w'] = nrm((1, 32)); raw['fc3_b'] = nrm((1,))
    return raw


def _fold_bn(gamma, beta, mean, var, bias):
    s = gamma / jnp.sqrt(var + EPS)
    t = (bias - mean) * s + beta
    return s, t


def _pack_bigru(lp):
    """Pack one bidirectional GRU layer into fused-kernel layouts.

    Per gate g in (r, z, n):
      wihf[g]/wihb[g]: (I, 128) zero-padded so fwd lives in lanes [:64] and
                       bwd in lanes [64:].
      bif[g]/bib[g]  : (1, 128) with b_ih (+ b_hh for r,z) folded in.
      whh[g]         : (128, 128) block-diagonal recurrent weights.
    bhhn: (1, 128) recurrent bias of the n gate (stays inside r*( . )).
    """
    wih_f, whh_f, bih_f, bhh_f = lp['fwd']
    wih_b, whh_b, bih_b, bhh_b = lp['bwd']
    I = wih_f.shape[1]
    wf, wb, bf, bb, whh = [], [], [], [], []
    for g in range(3):
        sl = slice(g * HID, (g + 1) * HID)
        wf.append(jnp.zeros((I, H2), jnp.float32).at[:, :HID].set(wih_f[sl].T))
        wb.append(jnp.zeros((I, H2), jnp.float32).at[:, HID:].set(wih_b[sl].T))
        b_f = bih_f[sl] + (bhh_f[sl] if g < 2 else 0.0)
        b_b = bih_b[sl] + (bhh_b[sl] if g < 2 else 0.0)
        bf.append(jnp.zeros((1, H2), jnp.float32).at[0, :HID].set(b_f))
        bb.append(jnp.zeros((1, H2), jnp.float32).at[0, HID:].set(b_b))
        w = jnp.zeros((H2, H2), jnp.float32)
        w = w.at[:HID, :HID].set(whh_f[sl].T).at[HID:, HID:].set(whh_b[sl].T)
        whh.append(w)
    return {
        'wihf': jnp.stack(wf), 'wihb': jnp.stack(wb),
        'bif': jnp.stack(bf), 'bib': jnp.stack(bb),
        'whh': jnp.stack(whh),
        'bhhn': jnp.concatenate([bhh_f[2 * HID:], bhh_b[2 * HID:]])[None, :],
    }


def to_kernel_params(raw):
    p = {}
    p['w1'] = jnp.transpose(raw['conv1_w'], (2, 1, 0))           # (K, F, C1)
    s, t = _fold_bn(*raw['bn1'], raw['conv1_b'])
    p['s1'], p['t1'] = s[None, :], t[None, :]
    p['w2'] = jnp.transpose(raw['conv2_w'], (2, 1, 0))           # (K, C1, C2)
    s, t = _fold_bn(*raw['bn2'], raw['conv2_b'])
    p['s2'], p['t2'] = s[None, :], t[None, :]
    p['gru0'] = _pack_bigru(raw['gru'][0])
    p['gru1'] = _pack_bigru(raw['gru'][1])
    p['aw'] = raw['attn_w']                                      # (1, 128)
    p['ab'] = raw['attn_b'].reshape(1, 1)
    p['fc1_w'] = raw['fc1_w'].T
    s, t = _fold_bn(*raw['bn3'], raw['fc1_b'])
    p['s3'], p['t3'] = s[None, :], t[None, :]
    p['fc2_w'] = raw['fc2_w'].T
    s, t = _fold_bn(*raw['bn4'], raw['fc2_b'])
    p['s4'], p['t4'] = s[None, :], t[None, :]
    p['fc3_w'] = raw['fc3_w'].T
    p['fc3_b'] = raw['fc3_b'].reshape(1, 1)
    return p


# ---------------------------------------------------------------------------
# Pure-JAX reference (mirrors PyTorch eval-mode forward) for validation
# ---------------------------------------------------------------------------
def reference_forward(raw, x):
    xt = jnp.transpose(x, (0, 2, 1))                             # (B, F, L), NCW

    def conv1d(xin, w, b):
        y = lax.conv_general_dilated(xin, w, window_strides=(1,), padding='VALID',
                                     dimension_numbers=('NCH', 'OIH', 'NCH'))
        return y + b[None, :, None]

    def bn_ncl(v, bn):
        g, bta, mean, var = bn
        return (v - mean[None, :, None]) * (g[None, :, None] /
               jnp.sqrt(var[None, :, None] + EPS)) + bta[None, :, None]

    h = jax.nn.relu(bn_ncl(conv1d(xt, raw['conv1_w'], raw['conv1_b']), raw['bn1']))
    h = jax.nn.relu(bn_ncl(conv1d(h, raw['conv2_w'], raw['conv2_b']), raw['bn2']))
    B, C, L = h.shape
    Tp = L // 2
    h = h[:, :, :Tp * 2].reshape(B, C, Tp, 2).max(axis=-1)
    h = jnp.transpose(h, (0, 2, 1))                              # (B, T, 64)

    def gru_dir(xs_tbi, wih, whh, bih, bhh):
        H = HID

        def cell(hprev, x_t):
            gi = x_t @ wih.T + bih
            gh = hprev @ whh.T + bhh
            r = jax.nn.sigmoid(gi[:, :H] + gh[:, :H])
            z = jax.nn.sigmoid(gi[:, H:2 * H] + gh[:, H:2 * H])
            n = jnp.tanh(gi[:, 2 * H:] + r * gh[:, 2 * H:])
            hn = (1 - z) * n + z * hprev
            return hn, hn

        h0 = jnp.zeros((xs_tbi.shape[1], H), jnp.float32)
        _, ys = lax.scan(cell, h0, xs_tbi)
        return ys

    seq = jnp.transpose(h, (1, 0, 2))                            # (T, B, 64)
    for lp in raw['gru']:
        yf = gru_dir(seq, *lp['fwd'])
        yb = gru_dir(seq[::-1], *lp['bwd'])[::-1]
        seq = jnp.concatenate([yf, yb], axis=-1)
    gru_out = jnp.transpose(seq, (1, 0, 2))                      # (B, T, 128)

    scores = gru_out @ raw['attn_w'].T + raw['attn_b']           # (B, T, 1)
    aw = jax.nn.softmax(scores, axis=1)
    ctx = jnp.sum(gru_out * aw, axis=1)                          # (B, 128)

    def bn_vec(v, bn):
        g, bta, mean, var = bn
        return (v - mean) * (g / jnp.sqrt(var + EPS)) + bta

    hf = jax.nn.relu(bn_vec(ctx @ raw['fc1_w'].T + raw['fc1_b'], raw['bn3']))
    hf = jax.nn.relu(bn_vec(hf @ raw['fc2_w'].T + raw['fc2_b'], raw['bn4']))
    return hf @ raw['fc3_w'].T + raw['fc3_b']


if __name__ == "__main__":
    key = jax.random.PRNGKey(0)
    k_param, k_x = jax.random.split(key)
    raw = init_raw_params(k_param)
    params = to_kernel_params(raw)

    B = 2
    x = jax.random.normal(k_x, (B, SEQ, F_IN), jnp.float32)

    out = jax.jit(forward)(params, x)
    out = jax.block_until_ready(out)
    assert out.shape == (B, 1), out.shape

    ref = jax.block_until_ready(reference_forward(raw, x))
    if not jnp.allclose(out, ref, rtol=1e-3, atol=1e-3):
        raise AssertionError(f"mismatch: pallas={out} ref={ref}")

    print("KERNEL_OK")
</pallas_src>

<mosaic_0001>
module attributes {stable_mosaic.version = 11 : i64} {
  func.func @_stock_forward_kernel(%arg0: memref<2x16x4xf32, #tpu.memory_space<vmem>>, %arg1: memref<3x4x32xf32, #tpu.memory_space<vmem>>, %arg2: memref<1x32xf32, #tpu.memory_space<vmem>>, %arg3: memref<1x32xf32, #tpu.memory_space<vmem>>, %arg4: memref<3x32x64xf32, #tpu.memory_space<vmem>>, %arg5: memref<1x64xf32, #tpu.memory_space<vmem>>, %arg6: memref<1x64xf32, #tpu.memory_space<vmem>>, %arg7: memref<3x64x128xf32, #tpu.memory_space<vmem>>, %arg8: memref<3x1x128xf32, #tpu.memory_space<vmem>>, %arg9: memref<3x64x128xf32, #tpu.memory_space<vmem>>, %arg10: memref<3x1x128xf32, #tpu.memory_space<vmem>>, %arg11: memref<3x128x128xf32, #tpu.memory_space<vmem>>, %arg12: memref<1x128xf32, #tpu.memory_space<vmem>>, %arg13: memref<3x128x128xf32, #tpu.memory_space<vmem>>, %arg14: memref<3x1x128xf32, #tpu.memory_space<vmem>>, %arg15: memref<3x128x128xf32, #tpu.memory_space<vmem>>, %arg16: memref<3x1x128xf32, #tpu.memory_space<vmem>>, %arg17: memref<3x128x128xf32, #tpu.memory_space<vmem>>, %arg18: memref<1x128xf32, #tpu.memory_space<vmem>>, %arg19: memref<1x128xf32, #tpu.memory_space<vmem>>, %arg20: memref<1x1xf32, #tpu.memory_space<vmem>>, %arg21: memref<128x64xf32, #tpu.memory_space<vmem>>, %arg22: memref<1x64xf32, #tpu.memory_space<vmem>>, %arg23: memref<1x64xf32, #tpu.memory_space<vmem>>, %arg24: memref<64x32xf32, #tpu.memory_space<vmem>>, %arg25: memref<1x32xf32, #tpu.memory_space<vmem>>, %arg26: memref<1x32xf32, #tpu.memory_space<vmem>>, %arg27: memref<32x1xf32, #tpu.memory_space<vmem>>, %arg28: memref<1x1xf32, #tpu.memory_space<vmem>>, %arg29: memref<2x1xf32, #tpu.memory_space<vmem>>, %arg30: memref<14x32xf32, #tpu.memory_space<vmem>>, %arg31: memref<12x64xf32, #tpu.memory_space<vmem>>, %arg32: memref<12x64xf32, #tpu.memory_space<vmem>>, %arg33: memref<36x128xf32, #tpu.memory_space<vmem>>, %arg34: memref<36x128xf32, #tpu.memory_space<vmem>>, %arg35: memref<12x128xf32, #tpu.memory_space<vmem>>, %arg36: memref<12x128xf32, #tpu.memory_space<vmem>>, %arg37: memref<12x128xf32, #tpu.memory_space<vmem>>) attributes {dimension_semantics = [], scalar_prefetch = 0 : i64, scratch_operands = 8 : i64, tpu.core_type = #tpu.core_type<tc>} {
    %cst = arith.constant 0.000000e+00 : f32
    %0 = vector.broadcast %cst : f32 to vector<14x32xf32>
    %c0 = arith.constant 0 : index
    %c0_0 = arith.constant 0 : index
    %c0_1 = arith.constant 0 : index
    %1 = vector.load %arg0[%c0, %c0_0, %c0_1] : memref<2x16x4xf32, #tpu.memory_space<vmem>>, vector<1x14x4xf32>
    %2 = vector.shape_cast %1 : vector<1x14x4xf32> to vector<14x4xf32>
    %c0_2 = arith.constant 0 : index
    %c0_3 = arith.constant 0 : index
    %c0_4 = arith.constant 0 : index
    %3 = vector.load %arg1[%c0_2, %c0_3, %c0_4] : memref<3x4x32xf32, #tpu.memory_space<vmem>>, vector<1x4x32xf32>
    %4 = vector.shape_cast %3 : vector<1x4x32xf32> to vector<4x32xf32>
    %cst_5 = arith.constant dense<0.000000e+00> : vector<14x32xf32>
    %5 = tpu.matmul %2, %4, %cst_5 {dimension_numbers = #tpu.dot_dimension_numbers<[1], [0], [0], [1], [0, 0, 1, 1], [], []>} : vector<14x4xf32>, vector<4x32xf32>, vector<14x32xf32> -> vector<14x32xf32>
    %6 = arith.addf %0, %5 : vector<14x32xf32>
    %c0_6 = arith.constant 0 : index
    %c1 = arith.constant 1 : index
    %c0_7 = arith.constant 0 : index
    %7 = vector.load %arg0[%c0_6, %c1, %c0_7] : memref<2x16x4xf32, #tpu.memory_space<vmem>>, vector<1x14x4xf32>
    %8 = vector.shape_cast %7 : vector<1x14x4xf32> to vector<14x4xf32>
    %c1_8 = arith.constant 1 : index
    %c0_9 = arith.constant 0 : index
    %c0_10 = arith.constant 0 : index
    %9 = vector.load %arg1[%c1_8, %c0_9, %c0_10] : memref<3x4x32xf32, #tpu.memory_space<vmem>>, vector<1x4x32xf32>
    %10 = vector.shape_cast %9 : vector<1x4x32xf32> to vector<4x32xf32>
    %cst_11 = arith.constant dense<0.000000e+00> : vector<14x32xf32>
    %11 = tpu.matmul %8, %10, %cst_11 {dimension_numbers = #tpu.dot_dimension_numbers<[1], [0], [0], [1], [0, 0, 1, 1], [], []>} : vector<14x4xf32>, vector<4x32xf32>, vector<14x32xf32> -> vector<14x32xf32>
    %12 = arith.addf %6, %11 : vector<14x32xf32>
    %c0_12 = arith.constant 0 : index
    %c2 = arith.constant 2 : index
    %c0_13 = arith.constant 0 : index
    %13 = vector.load %arg0[%c0_12, %c2, %c0_13] : memref<2x16x4xf32, #tpu.memory_space<vmem>>, vector<1x14x4xf32>
    %14 = vector.shape_cast %13 : vector<1x14x4xf32> to vector<14x4xf32>
    %c2_14 = arith.constant 2 : index
    %c0_15 = arith.constant 0 : index
    %c0_16 = arith.constant 0 : index
    %15 = vector.load %arg1[%c2_14, %c0_15, %c0_16] : memref<3x4x32xf32, #tpu.memory_space<vmem>>, vector<1x4x32xf32>
    %16 = vector.shape_cast %15 : vector<1x4x32xf32> to vector<4x32xf32>
    %cst_17 = arith.constant dense<0.000000e+00> : vector<14x32xf32>
    %17 = tpu.matmul %14, %16, %cst_17 {dimension_numbers = #tpu.dot_dimension_numbers<[1], [0], [0], [1], [0, 0, 1, 1], [], []>} : vector<14x4xf32>, vector<4x32xf32>, vector<14x32xf32> -> vector<14x32xf32>
    %18 = arith.addf %12, %17 : vector<14x32xf32>
    %c0_18 = arith.constant 0 : index
    %c0_19 = arith.constant 0 : index
    %19 = vector.load %arg2[%c0_18, %c0_19] : memref<1x32xf32, #tpu.memory_space<vmem>>, vector<1x32xf32>
    %20 = vector.broadcast %19 : vector<1x32xf32> to vector<14x32xf32>
    %21 = arith.mulf %18, %20 : vector<14x32xf32>
    %c0_20 = arith.constant 0 : index
    %c0_21 = arith.constant 0 : index
    %22 = vector.load %arg3[%c0_20, %c0_21] : memref<1x32xf32, #tpu.memory_space<vmem>>, vector<1x32xf32>
    %23 = vector.broadcast %22 : vector<1x32xf32> to vector<14x32xf32>
    %24 = arith.addf %21, %23 : vector<14x32xf32>
    %cst_22 = arith.constant 0.000000e+00 : f32
    %25 = vector.broadcast %cst_22 : f32 to vector<14x32xf32>
    %26 = arith.maximumf %24, %25 : vector<14x32xf32>
    %c0_23 = arith.constant 0 : index
    %c0_24 = arith.constant 0 : index
    %27 = vector.load %arg30[%c0_23, %c0_24] : memref<14x32xf32, #tpu.memory_space<vmem>>, vector<14x32xf32>
    tpu.vector_store %arg30[%c0_23, %c0_24], %26 {strides = array<i32>} : memref<14x32xf32, #tpu.memory_space<vmem>>, vector<14x32xf32>,
    %cst_25 = arith.constant 0.000000e+00 : f32
    %28 = vector.broadcast %cst_25 : f32 to vector<12x64xf32>
    %c0_26 = arith.constant 0 : index
    %c0_27 = arith.constant 0 : index
    %29 = vector.load %arg30[%c0_26, %c0_27] : memref<14x32xf32, #tpu.memory_space<vmem>>, vector<12x32xf32>
    %c0_28 = arith.constant 0 : index
    %c0_29 = arith.constant 0 : index
    %c0_30 = arith.constant 0 : index
    %30 = vector.load %arg4[%c0_28, %c0_29, %c0_30] : memref<3x32x64xf32, #tpu.memory_space<vmem>>, vector<1x32x64xf32>
    %31 = vector.shape_cast %30 : vector<1x32x64xf32> to vector<32x64xf32>
    %cst_31 = arith.constant dense<0.000000e+00> : vector<12x64xf32>
    %32 = tpu.matmul %29, %31, %cst_31 {dimension_numbers = #tpu.dot_dimension_numbers<[1], [0], [0], [1], [0, 0, 1, 1], [], []>} : vector<12x32xf32>, vector<32x64xf32>, vector<12x64xf32> -> vector<12x64xf32>
    %33 = arith.addf %28, %32 : vector<12x64xf32>
    %c1_32 = arith.constant 1 : index
    %c0_33 = arith.constant 0 : index
    %34 = vector.load %arg30[%c1_32, %c0_33] : memref<14x32xf32, #tpu.memory_space<vmem>>, vector<12x32xf32>
    %c1_34 = arith.constant 1 : index
    %c0_35 = arith.constant 0 : index
    %c0_36 = arith.constant 0 : index
    %35 = vector.load %arg4[%c1_34, %c0_35, %c0_36] : memref<3x32x64xf32, #tpu.memory_space<vmem>>, vector<1x32x64xf32>
    %36 = vector.shape_cast %35 : vector<1x32x64xf32> to vector<32x64xf32>
    %cst_37 = arith.constant dense<0.000000e+00> : vector<12x64xf32>
    %37 = tpu.matmul %34, %36, %cst_37 {dimension_numbers = #tpu.dot_dimension_numbers<[1], [0], [0], [1], [0, 0, 1, 1], [], []>} : vector<12x32xf32>, vector<32x64xf32>, vector<12x64xf32> -> vector<12x64xf32>
    %38 = arith.addf %33, %37 : vector<12x64xf32>
    %c2_38 = arith.constant 2 : index
    %c0_39 = arith.constant 0 : index
    %39 = vector.load %arg30[%c2_38, %c0_39] : memref<14x32xf32, #tpu.memory_space<vmem>>, vector<12x32xf32>
    %c2_40 = arith.constant 2 : index
    %c0_41 = arith.constant 0 : index
    %c0_42 = arith.constant 0 : index
    %40 = vector.load %arg4[%c2_40, %c0_41, %c0_42] : memref<3x32x64xf32, #tpu.memory_space<vmem>>, vector<1x32x64xf32>
    %41 = vector.shape_cast %40 : vector<1x32x64xf32> to vector<32x64xf32>
    %cst_43 = arith.constant dense<0.000000e+00> : vector<12x64xf32>
    %42 = tpu.matmul %39, %41, %cst_43 {dimension_numbers = #tpu.dot_dimension_numbers<[1], [0], [0], [1], [0, 0, 1, 1], [], []>} : vector<12x32xf32>, vector<32x64xf32>, vector<12x64xf32> -> vector<12x64xf32>
    %43 = arith.addf %38, %42 : vector<12x64xf32>
    %c0_44 = arith.constant 0 : index
    %c0_45 = arith.constant 0 : index
    %44 = vector.load %arg5[%c0_44, %c0_45] : memref<1x64xf32, #tpu.memory_space<vmem>>, vector<1x64xf32>
    %45 = vector.broadcast %44 : vector<1x64xf32> to vector<12x64xf32>
    %46 = arith.mulf %43, %45 : vector<12x64xf32>
    %c0_46 = arith.constant 0 : index
    %c0_47 = arith.constant 0 : index
    %47 = vector.load %arg6[%c0_46, %c0_47] : memref<1x64xf32, #tpu.memory_space<vmem>>, vector<1x64xf32>
    %48 = vector.broadcast %47 : vector<1x64xf32> to vector<12x64xf32>
    %49 = arith.addf %46, %48 : vector<12x64xf32>
    %cst_48 = arith.constant 0.000000e+00 : f32
    %50 = vector.broadcast %cst_48 : f32 to vector<12x64xf32>
    %51 = arith.maximumf %49, %50 : vector<12x64xf32>
    %c0_49 = arith.constant 0 : index
    %c0_50 = arith.constant 0 : index
    %52 = vector.load %arg31[%c0_49, %c0_50] : memref<12x64xf32, #tpu.memory_space<vmem>>, vector<12x64xf32>
    tpu.vector_store %arg31[%c0_49, %c0_50], %51 {strides = array<i32>} : memref<12x64xf32, #tpu.memory_space<vmem>>, vector<12x64xf32>,
    %c0_51 = arith.constant 0 : index
    %c0_52 = arith.constant 0 : index
    %53 = tpu.strided_load %arg31[%c0_51, %c0_52] {strides = array<i32: 2, 1>} : memref<12x64xf32, #tpu.memory_space<vmem>>, vector<6x64xf32>
    %c1_53 = arith.constant 1 : index
    %c0_54 = arith.constant 0 : index
    %54 = tpu.strided_load %arg31[%c1_53, %c0_54] {strides = array<i32: 2, 1>} : memref<12x64xf32, #tpu.memory_space<vmem>>, vector<6x64xf32>
    %55 = arith.maximumf %53, %54 : vector<6x64xf32>
    %c0_55 = arith.constant 0 : index
    %c0_56 = arith.constant 0 : index
    %56 = vector.load %arg32[%c0_55, %c0_56] : memref<12x64xf32, #tpu.memory_space<vmem>>, vector<6x64xf32>
    tpu.vector_store %arg32[%c0_55, %c0_56], %55 {strides = array<i32>} : memref<12x64xf32, #tpu.memory_space<vmem>>, vector<6x64xf32>,
    %cst_57 = arith.constant 0.000000e+00 : f32
    %57 = vector.broadcast %cst_57 : f32 to vector<14x32xf32>
    %c1_58 = arith.constant 1 : index
    %c0_59 = arith.constant 0 : index
    %c0_60 = arith.constant 0 : index
    %58 = vector.load %arg0[%c1_58, %c0_59, %c0_60] : memref<2x16x4xf32, #tpu.memory_space<vmem>>, vector<1x14x4xf32>
    %59 = vector.shape_cast %58 : vector<1x14x4xf32> to vector<14x4xf32>
    %c0_61 = arith.constant 0 : index
    %c0_62 = arith.constant 0 : index
    %c0_63 = arith.constant 0 : index
    %60 = vector.load %arg1[%c0_61, %c0_62, %c0_63] : memref<3x4x32xf32, #tpu.memory_space<vmem>>, vector<1x4x32xf32>
    %61 = vector.shape_cast %60 : vector<1x4x32xf32> to vector<4x32xf32>
    %cst_64 = arith.constant dense<0.000000e+00> : vector<14x32xf32>
    %62 = tpu.matmul %59, %61, %cst_64 {dimension_numbers = #tpu.dot_dimension_numbers<[1], [0], [0], [1], [0, 0, 1, 1], [], []>} : vector<14x4xf32>, vector<4x32xf32>, vector<14x32xf32> -> vector<14x32xf32>
    %63 = arith.addf %57, %62 : vector<14x32xf32>
    %c1_65 = arith.constant 1 : index
    %c1_66 = arith.constant 1 : index
    %c0_67 = arith.constant 0 : index
    %64 = vector.load %arg0[%c1_65, %c1_66, %c0_67] : memref<2x16x4xf32, #tpu.memory_space<vmem>>, vector<1x14x4xf32>
    %65 = vector.shape_cast %64 : vector<1x14x4xf32> to vector<14x4xf32>
    %c1_68 = arith.constant 1 : index
    %c0_69 = arith.constant 0 : index
    %c0_70 = arith.constant 0 : index
    %66 = vector.load %arg1[%c1_68, %c0_69, %c0_70] : memref<3x4x32xf32, #tpu.memory_space<vmem>>, vector<1x4x32xf32>
    %67 = vector.shape_cast %66 : vector<1x4x32xf32> to vector<4x32xf32>
    %cst_71 = arith.constant dense<0.000000e+00> : vector<14x32xf32>
    %68 = tpu.matmul %65, %67, %cst_71 {dimension_numbers = #tpu.dot_dimension_numbers<[1], [0], [0], [1], [0, 0, 1, 1], [], []>} : vector<14x4xf32>, vector<4x32xf32>, vector<14x32xf32> -> vector<14x32xf32>
    %69 = arith.addf %63, %68 : vector<14x32xf32>
    %c1_72 = arith.constant 1 : index
    %c2_73 = arith.constant 2 : index
    %c0_74 = arith.constant 0 : index
    %70 = vector.load %arg0[%c1_72, %c2_73, %c0_74] : memref<2x16x4xf32, #tpu.memory_space<vmem>>, vector<1x14x4xf32>
    %71 = vector.shape_cast %70 : vector<1x14x4xf32> to vector<14x4xf32>
    %c2_75 = arith.constant 2 : index
    %c0_76 = arith.constant 0 : index
    %c0_77 = arith.constant 0 : index
    %72 = vector.load %arg1[%c2_75, %c0_76, %c0_77] : memref<3x4x32xf32, #tpu.memory_space<vmem>>, vector<1x4x32xf32>
    %73 = vector.shape_cast %72 : vector<1x4x32xf32> to vector<4x32xf32>
    %cst_78 = arith.constant dense<0.000000e+00> : vector<14x32xf32>
    %74 = tpu.matmul %71, %73, %cst_78 {dimension_numbers = #tpu.dot_dimension_numbers<[1], [0], [0], [1], [0, 0, 1, 1], [], []>} : vector<14x4xf32>, vector<4x32xf32>, vector<14x32xf32> -> vector<14x32xf32>
    %75 = arith.addf %69, %74 : vector<14x32xf32>
    %c0_79 = arith.constant 0 : index
    %c0_80 = arith.constant 0 : index
    %76 = vector.load %arg2[%c0_79, %c0_80] : memref<1x32xf32, #tpu.memory_space<vmem>>, vector<1x32xf32>
    %77 = vector.broadcast %76 : vector<1x32xf32> to vector<14x32xf32>
    %78 = arith.mulf %75, %77 : vector<14x32xf32>
    %c0_81 = arith.constant 0 : index
    %c0_82 = arith.constant 0 : index
    %79 = vector.load %arg3[%c0_81, %c0_82] : memref<1x32xf32, #tpu.memory_space<vmem>>, vector<1x32xf32>
    %80 = vector.broadcast %79 : vector<1x32xf32> to vector<14x32xf32>
    %81 = arith.addf %78, %80 : vector<14x32xf32>
    %cst_83 = arith.constant 0.000000e+00 : f32
    %82 = vector.broadcast %cst_83 : f32 to vector<14x32xf32>
    %83 = arith.maximumf %81, %82 : vector<14x32xf32>
    %c0_84 = arith.constant 0 : index
    %c0_85 = arith.constant 0 : index
    %84 = vector.load %arg30[%c0_84, %c0_85] : memref<14x32xf32, #tpu.memory_space<vmem>>, vector<14x32xf32>
    tpu.vector_store %arg30[%c0_84, %c0_85], %83 {strides = array<i32>} : memref<14x32xf32, #tpu.memory_space<vmem>>, vector<14x32xf32>,
    %cst_86 = arith.constant 0.000000e+00 : f32
    %85 = vector.broadcast %cst_86 : f32 to vector<12x64xf32>
    %c0_87 = arith.constant 0 : index
    %c0_88 = arith.constant 0 : index
    %86 = vector.load %arg30[%c0_87, %c0_88] : memref<14x32xf32, #tpu.memory_space<vmem>>, vector<12x32xf32>
    %c0_89 = arith.constant 0 : index
    %c0_90 = arith.constant 0 : index
    %c0_91 = arith.constant 0 : index
    %87 = vector.load %arg4[%c0_89, %c0_90, %c0_91] : memref<3x32x64xf32, #tpu.memory_space<vmem>>, vector<1x32x64xf32>
    %88 = vector.shape_cast %87 : vector<1x32x64xf32> to vector<32x64xf32>
    %cst_92 = arith.constant dense<0.000000e+00> : vector<12x64xf32>
    %89 = tpu.matmul %86, %88, %cst_92 {dimension_numbers = #tpu.dot_dimension_numbers<[1], [0], [0], [1], [0, 0, 1, 1], [], []>} : vector<12x32xf32>, vector<32x64xf32>, vector<12x64xf32> -> vector<12x64xf32>
    %90 = arith.addf %85, %89 : vector<12x64xf32>
    %c1_93 = arith.constant 1 : index
    %c0_94 = arith.constant 0 : index
    %91 = vector.load %arg30[%c1_93, %c0_94] : memref<14x32xf32, #tpu.memory_space<vmem>>, vector<12x32xf32>
    %c1_95 = arith.constant 1 : index
    %c0_96 = arith.constant 0 : index
    %c0_97 = arith.constant 0 : index
    %92 = vector.load %arg4[%c1_95, %c0_96, %c0_97] : memref<3x32x64xf32, #tpu.memory_space<vmem>>, vector<1x32x64xf32>
    %93 = vector.shape_cast %92 : vector<1x32x64xf32> to vector<32x64xf32>
    %cst_98 = arith.constant dense<0.000000e+00> : vector<12x64xf32>
    %94 = tpu.matmul %91, %93, %cst_98 {dimension_numbers = #tpu.dot_dimension_numbers<[1], [0], [0], [1], [0, 0, 1, 1], [], []>} : vector<12x32xf32>, vector<32x64xf32>, vector<12x64xf32> -> vector<12x64xf32>
    %95 = arith.addf %90, %94 : vector<12x64xf32>
    %c2_99 = arith.constant 2 : index
    %c0_100 = arith.constant 0 : index
    %96 = vector.load %arg30[%c2_99, %c0_100] : memref<14x32xf32, #tpu.memory_space<vmem>>, vector<12x32xf32>
    %c2_101 = arith.constant 2 : index
    %c0_102 = arith.constant 0 : index
    %c0_103 = arith.constant 0 : index
    %97 = vector.load %arg4[%c2_101, %c0_102, %c0_103] : memref<3x32x64xf32, #tpu.memory_space<vmem>>, vector<1x32x64xf32>
    %98 = vector.shape_cast %97 : vector<1x32x64xf32> to vector<32x64xf32>
    %cst_104 = arith.constant dense<0.000000e+00> : vector<12x64xf32>
    %99 = tpu.matmul %96, %98, %cst_104 {dimension_numbers = #tpu.dot_dimension_numbers<[1], [0], [0], [1], [0, 0, 1, 1], [], []>} : vector<12x32xf32>, vector<32x64xf32>, vector<12x64xf32> -> vector<12x64xf32>
    %100 = arith.addf %95, %99 : vector<12x64xf32>
    %c0_105 = arith.constant 0 : index
    %c0_106 = arith.constant 0 : index
    %101 = vector.load %arg5[%c0_105, %c0_106] : memref<1x64xf32, #tpu.memory_space<vmem>>, vector<1x64xf32>
    %102 = vector.broadcast %101 : vector<1x64xf32> to vector<12x64xf32>
    %103 = arith.mulf %100, %102 : vector<12x64xf32>
    %c0_107 = arith.constant 0 : index
    %c0_108 = arith.constant 0 : index
    %104 = vector.load %arg6[%c0_107, %c0_108] : memref<1x64xf32, #tpu.memory_space<vmem>>, vector<1x64xf32>
    %105 = vector.broadcast %104 : vector<1x64xf32> to vector<12x64xf32>
    %106 = arith.addf %103, %105 : vector<12x64xf32>
    %cst_109 = arith.constant 0.000000e+00 : f32
    %107 = vector.broadcast %cst_109 : f32 to vector<12x64xf32>
    %108 = arith.maximumf %106, %107 : vector<12x64xf32>
    %c0_110 = arith.constant 0 : index
    %c0_111 = arith.constant 0 : index
    %109 = vector.load %arg31[%c0_110, %c0_111] : memref<12x64xf32, #tpu.memory_space<vmem>>, vector<12x64xf32>
    tpu.vector_store %arg31[%c0_110, %c0_111], %108 {strides = array<i32>} : memref<12x64xf32, #tpu.memory_space<vmem>>, vector<12x64xf32>,
    %c0_112 = arith.constant 0 : index
    %c0_113 = arith.constant 0 : index
    %110 = tpu.strided_load %arg31[%c0_112, %c0_113] {strides = array<i32: 2, 1>} : memref<12x64xf32, #tpu.memory_space<vmem>>, vector<6x64xf32>
    %c1_114 = arith.constant 1 : index
    %c0_115 = arith.constant 0 : index
    %111 = tpu.strided_load %arg31[%c1_114, %c0_115] {strides = array<i32: 2, 1>} : memref<12x64xf32, #tpu.memory_space<vmem>>, vector<6x64xf32>
    %112 = arith.maximumf %110, %111 : vector<6x64xf32>
    %c6 = arith.constant 6 : index
    %c0_116 = arith.constant 0 : index
    %113 = vector.load %arg32[%c6, %c0_116] : memref<12x64xf32, #tpu.memory_space<vmem>>, vector<6x64xf32>
    tpu.vector_store %arg32[%c6, %c0_116], %112 {strides = array<i32>} : memref<12x64xf32, #tpu.memory_space<vmem>>, vector<6x64xf32>,
    %c0_117 = arith.constant 0 : index
    %c0_118 = arith.constant 0 : index
    %114 = vector.load %arg32[%c0_117, %c0_118] : memref<12x64xf32, #tpu.memory_space<vmem>>, vector<12x64xf32>
    %c0_119 = arith.constant 0 : index
    %c0_120 = arith.constant 0 : index
    %c0_121 = arith.constant 0 : index
    %115 = vector.load %arg7[%c0_119, %c0_120, %c0_121] : memref<3x64x128xf32, #tpu.memory_space<vmem>>, vector<1x64x128xf32>
    %116 = vector.shape_cast %115 : vector<1x64x128xf32> to vector<64x128xf32>
    %cst_122 = arith.constant dense<0.000000e+00> : vector<12x128xf32>
    %117 = tpu.matmul %114, %116, %cst_122 {dimension_numbers = #tpu.dot_dimension_numbers<[1], [0], [0], [1], [0, 0, 1, 1], [], []>} : vector<12x64xf32>, vector<64x128xf32>, vector<12x128xf32> -> vector<12x128xf32>
    %c0_123 = arith.constant 0 : index
    %c0_124 = arith.constant 0 : index
    %c0_125 = arith.constant 0 : index
    %118 = vector.load %arg8[%c0_123, %c0_124, %c0_125] : memref<3x1x128xf32, #tpu.memory_space<vmem>>, vector<1x1x128xf32>
    %119 = vector.shape_cast %118 : vector<1x1x128xf32> to vector<1x128xf32>
    %120 = vector.broadcast %119 : vector<1x128xf32> to vector<12x128xf32>
    %121 = arith.addf %117, %120 : vector<12x128xf32>
    %c0_126 = arith.constant 0 : index
    %c0_127 = arith.constant 0 : index
    %122 = vector.load %arg33[%c0_126, %c0_127] : memref<36x128xf32, #tpu.memory_space<vmem>>, vector<12x128xf32>
    tpu.vector_store %arg33[%c0_126, %c0_127], %121 {strides = array<i32>} : memref<36x128xf32, #tpu.memory_space<vmem>>, vector<12x128xf32>,
    %c0_128 = arith.constant 0 : index
    %c0_129 = arith.constant 0 : index
    %c0_130 = arith.constant 0 : index
    %123 = vector.load %arg9[%c0_128, %c0_129, %c0_130] : memref<3x64x128xf32, #tpu.memory_space<vmem>>, vector<1x64x128xf32>
    %124 = vector.shape_cast %123 : vector<1x64x128xf32> to vector<64x128xf32>
    %cst_131 = arith.constant dense<0.000000e+00> : vector<12x128xf32>
    %125 = tpu.matmul %114, %124, %cst_131 {dimension_numbers = #tpu.dot_dimension_numbers<[1], [0], [0], [1], [0, 0, 1, 1], [], []>} : vector<12x64xf32>, vector<64x128xf32>, vector<12x128xf32> -> vector<12x128xf32>
    %c0_132 = arith.constant 0 : index
    %c0_133 = arith.constant 0 : index
    %c0_134 = arith.constant 0 : index
    %126 = vector.load %arg10[%c0_132, %c0_133, %c0_134] : memref<3x1x128xf32, #tpu.memory_space<vmem>>, vector<1x1x128xf32>
    %127 = vector.shape_cast %126 : vector<1x1x128xf32> to vector<1x128xf32>
    %128 = vector.broadcast %127 : vector<1x128xf32> to vector<12x128xf32>
    %129 = arith.addf %125, %128 : vector<12x128xf32>
    %c0_135 = arith.constant 0 : index
    %c0_136 = arith.constant 0 : index
    %130 = vector.load %arg34[%c0_135, %c0_136] : memref<36x128xf32, #tpu.memory_space<vmem>>, vector<12x128xf32>
    tpu.vector_store %arg34[%c0_135, %c0_136], %129 {strides = array<i32>} : memref<36x128xf32, #tpu.memory_space<vmem>>, vector<12x128xf32>,
    %c1_137 = arith.constant 1 : index
    %c0_138 = arith.constant 0 : index
    %c0_139 = arith.constant 0 : index
    %131 = vector.load %arg7[%c1_137, %c0_138, %c0_139] : memref<3x64x128xf32, #tpu.memory_space<vmem>>, vector<1x64x128xf32>
    %132 = vector.shape_cast %131 : vector<1x64x128xf32> to vector<64x128xf32>
    %cst_140 = arith.constant dense<0.000000e+00> : vector<12x128xf32>
    %133 = tpu.matmul %114, %132, %cst_140 {dimension_numbers = #tpu.dot_dimension_numbers<[1], [0], [0], [1], [0, 0, 1, 1], [], []>} : vector<12x64xf32>, vector<64x128xf32>, vector<12x128xf32> -> vector<12x128xf32>
    %c1_141 = arith.constant 1 : index
    %c0_142 = arith.constant 0 : index
    %c0_143 = arith.constant 0 : index
    %134 = vector.load %arg8[%c1_141, %c0_142, %c0_143] : memref<3x1x128xf32, #tpu.memory_space<vmem>>, vector<1x1x128xf32>
    %135 = vector.shape_cast %134 : vector<1x1x128xf32> to vector<1x128xf32>
    %136 = vector.broadcast %135 : vector<1x128xf32> to vector<12x128xf32>
    %137 = arith.addf %133, %136 : vector<12x128xf32>
    %c12 = arith.constant 12 : index
    %c0_144 = arith.constant 0 : index
    %138 = vector.load %arg33[%c12, %c0_144] : memref<36x128xf32, #tpu.memory_space<vmem>>, vector<12x128xf32>
    tpu.vector_store %arg33[%c12, %c0_144], %137 {strides = array<i32>} : memref<36x128xf32, #tpu.memory_space<vmem>>, vector<12x128xf32>,
    %c1_145 = arith.constant 1 : index
    %c0_146 = arith.constant 0 : index
    %c0_147 = arith.constant 0 : index
    %139 = vector.load %arg9[%c1_145, %c0_146, %c0_147] : memref<3x64x128xf32, #tpu.memory_space<vmem>>, vector<1x64x128xf32>
    %140 = vector.shape_cast %139 : vector<1x64x128xf32> to vector<64x128xf32>
    %cst_148 = arith.constant dense<0.000000e+00> : vector<12x128xf32>
    %141 = tpu.matmul %114, %140, %cst_148 {dimension_numbers = #tpu.dot_dimension_numbers<[1], [0], [0], [1], [0, 0, 1, 1], [], []>} : vector<12x64xf32>, vector<64x128xf32>, vector<12x128xf32> -> vector<12x128xf32>
    %c1_149 = arith.constant 1 : index
    %c0_150 = arith.constant 0 : index
    %c0_151 = arith.constant 0 : index
    %142 = vector.load %arg10[%c1_149, %c0_150, %c0_151] : memref<3x1x128xf32, #tpu.memory_space<vmem>>, vector<1x1x128xf32>
    %143 = vector.shape_cast %142 : vector<1x1x128xf32> to vector<1x128xf32>
    %144 = vector.broadcast %143 : vector<1x128xf32> to vector<12x128xf32>
    %145 = arith.addf %141, %144 : vector<12x128xf32>
    %c12_152 = arith.constant 12 : index
    %c0_153 = arith.constant 0 : index
    %146 = vector.load %arg34[%c12_152, %c0_153] : memref<36x128xf32, #tpu.memory_space<vmem>>, vector<12x128xf32>
    tpu.vector_store %arg34[%c12_152, %c0_153], %145 {strides = array<i32>} : memref<36x128xf32, #tpu.memory_space<vmem>>, vector<12x128xf32>,
    %c2_154 = arith.constant 2 : index
    %c0_155 = arith.constant 0 : index
    %c0_156 = arith.constant 0 : index
    %147 = vector.load %arg7[%c2_154, %c0_155, %c0_156] : memref<3x64x128xf32, #tpu.memory_space<vmem>>, vector<1x64x128xf32>
    %148 = vector.shape_cast %147 : vector<1x64x128xf32> to vector<64x128xf32>
    %cst_157 = arith.constant dense<0.000000e+00> : vector<12x128xf32>
    %149 = tpu.matmul %114, %148, %cst_157 {dimension_numbers = #tpu.dot_dimension_numbers<[1], [0], [0], [1], [0, 0, 1, 1], [], []>} : vector<12x64xf32>, vector<64x128xf32>, vector<12x128xf32> -> vector<12x128xf32>
    %c2_158 = arith.constant 2 : index
    %c0_159 = arith.constant 0 : index
    %c0_160 = arith.constant 0 : index
    %150 = vector.load %arg8[%c2_158, %c0_159, %c0_160] : memref<3x1x128xf32, #tpu.memory_space<vmem>>, vector<1x1x128xf32>
    %151 = vector.shape_cast %150 : vector<1x1x128xf32> to vector<1x128xf32>
    %152 = vector.broadcast %151 : vector<1x128xf32> to vector<12x128xf32>
    %153 = arith.addf %149, %152 : vector<12x128xf32>
    %c24 = arith.constant 24 : index
    %c0_161 = arith.constant 0 : index
    %154 = vector.load %arg33[%c24, %c0_161] : memref<36x128xf32, #tpu.memory_space<vmem>>, vector<12x128xf32>
    tpu.vector_store %arg33[%c24, %c0_161], %153 {strides = array<i32>} : memref<36x128xf32, #tpu.memory_space<vmem>>, vector<12x128xf32>,
    %c2_162 = arith.constant 2 : index
    %c0_163 = arith.constant 0 : index
    %c0_164 = arith.constant 0 : index
    %155 = vector.load %arg9[%c2_162, %c0_163, %c0_164] : memref<3x64x128xf32, #tpu.memory_space<vmem>>, vector<1x64x128xf32>
    %156 = vector.shape_cast %155 : vector<1x64x128xf32> to vector<64x128xf32>
    %cst_165 = arith.constant dense<0.000000e+00> : vector<12x128xf32>
    %157 = tpu.matmul %114, %156, %cst_165 {dimension_numbers = #tpu.dot_dimension_numbers<[1], [0], [0], [1], [0, 0, 1, 1], [], []>} : vector<12x64xf32>, vector<64x128xf32>, vector<12x128xf32> -> vector<12x128xf32>
    %c2_166 = arith.constant 2 : index
    %c0_167 = arith.constant 0 : index
    %c0_168 = arith.constant 0 : index
    %158 = vector.load %arg10[%c2_166, %c0_167, %c0_168] : memref<3x1x128xf32, #tpu.memory_space<vmem>>, vector<1x1x128xf32>
    %159 = vector.shape_cast %158 : vector<1x1x128xf32> to vector<1x128xf32>
    %160 = vector.broadcast %159 : vector<1x128xf32> to vector<12x128xf32>
    %161 = arith.addf %157, %160 : vector<12x128xf32>
    %c24_169 = arith.constant 24 : index
    %c0_170 = arith.constant 0 : index
    %162 = vector.load %arg34[%c24_169, %c0_170] : memref<36x128xf32, #tpu.memory_space<vmem>>, vector<12x128xf32>
    tpu.vector_store %arg34[%c24_169, %c0_170], %161 {strides = array<i32>} : memref<36x128xf32, #tpu.memory_space<vmem>>, vector<12x128xf32>,
    %c0_171 = arith.constant 0 : index
    %c0_172 = arith.constant 0 : index
    %c0_173 = arith.constant 0 : index
    %163 = vector.load %arg11[%c0_171, %c0_172, %c0_173] : memref<3x128x128xf32, #tpu.memory_space<vmem>>, vector<1x128x128xf32>
    %164 = vector.shape_cast %163 : vector<1x128x128xf32> to vector<128x128xf32>
    %c1_174 = arith.constant 1 : index
    %c0_175 = arith.constant 0 : index
    %c0_176 = arith.constant 0 : index
    %165 = vector.load %arg11[%c1_174, %c0_175, %c0_176] : memref<3x128x128xf32, #tpu.memory_space<vmem>>, vector<1x128x128xf32>
    %166 = vector.shape_cast %165 : vector<1x128x128xf32> to vector<128x128xf32>
    %c2_177 = arith.constant 2 : index
    %c0_178 = arith.constant 0 : index
    %c0_179 = arith.constant 0 : index
    %167 = vector.load %arg11[%c2_177, %c0_178, %c0_179] : memref<3x128x128xf32, #tpu.memory_space<vmem>>, vector<1x128x128xf32>
    %168 = vector.shape_cast %167 : vector<1x128x128xf32> to vector<128x128xf32>
    %c0_180 = arith.constant 0 : index
    %c0_181 = arith.constant 0 : index
    %169 = vector.load %arg12[%c0_180, %c0_181] : memref<1x128xf32, #tpu.memory_space<vmem>>, vector<1x128xf32>
    %170 = vector.shape_cast %169 : vector<1x128xf32> to vector<1x128xf32>
    %171 = vector.broadcast %170 : vector<1x128xf32> to vector<2x128xf32>
    %cst_182 = arith.constant 0.000000e+00 : f32
    %172 = vector.broadcast %cst_182 : f32 to vector<2x128xf32>
    %c0_183 = arith.constant 0 : index
    %c0_184 = arith.constant 0 : index
    %173 = tpu.strided_load %arg33[%c0_183, %c0_184] {strides = array<i32: 6, 1>} : memref<36x128xf32, #tpu.memory_space<vmem>>, vector<2x128xf32>
    %c5 = arith.constant 5 : index
    %c0_185 = arith.constant 0 : index
    %174 = tpu.strided_load %arg34[%c5, %c0_185] {strides = array<i32: 6, 1>} : memref<36x128xf32, #tpu.memory_space<vmem>>, vector<2x128xf32>
    %175 = arith.addf %173, %174 : vector<2x128xf32>
    %c12_186 = arith.constant 12 : index
    %c0_187 = arith.constant 0 : index
    %176 = tpu.strided_load %arg33[%c12_186, %c0_187] {strides = array<i32: 6, 1>} : memref<36x128xf32, #tpu.memory_space<vmem>>, vector<2x128xf32>
    %c17 = arith.constant 17 : index
    %c0_188 = arith.constant 0 : index
    %177 = tpu.strided_load %arg34[%c17, %c0_188] {strides = array<i32: 6, 1>} : memref<36x128xf32, #tpu.memory_space<vmem>>, vector<2x128xf32>
    %178 = arith.addf %176, %177 : vector<2x128xf32>
    %c24_189 = arith.constant 24 : index
    %c0_190 = arith.constant 0 : index
    %179 = tpu.strided_load %arg33[%c24_189, %c0_190] {strides = array<i32: 6, 1>} : memref<36x128xf32, #tpu.memory_space<vmem>>, vector<2x128xf32>
    %c29 = arith.constant 29 : index
    %c0_191 = arith.constant 0 : index
    %180 = tpu.strided_load %arg34[%c29, %c0_191] {strides = array<i32: 6, 1>} : memref<36x128xf32, #tpu.memory_space<vmem>>, vector<2x128xf32>
    %181 = arith.addf %179, %180 : vector<2x128xf32>
    %cst_192 = arith.constant dense<0.000000e+00> : vector<2x128xf32>
    %182 = tpu.matmul %172, %164, %cst_192 {dimension_numbers = #tpu.dot_dimension_numbers<[1], [0], [0], [1], [0, 0, 1, 1], [], []>} : vector<2x128xf32>, vector<128x128xf32>, vector<2x128xf32> -> vector<2x128xf32>
    %cst_193 = arith.constant dense<0.000000e+00> : vector<2x128xf32>
    %183 = tpu.matmul %172, %166, %cst_193 {dimension_numbers = #tpu.dot_dimension_numbers<[1], [0], [0], [1], [0, 0, 1, 1], [], []>} : vector<2x128xf32>, vector<128x128xf32>, vector<2x128xf32> -> vector<2x128xf32>
    %cst_194 = arith.constant dense<0.000000e+00> : vector<2x128xf32>
    %184 = tpu.matmul %172, %168, %cst_194 {dimension_numbers = #tpu.dot_dimension_numbers<[1], [0], [0], [1], [0, 0, 1, 1], [], []>} : vector<2x128xf32>, vector<128x128xf32>, vector<2x128xf32> -> vector<2x128xf32>
    %185 = arith.addf %184, %171 : vector<2x128xf32>
    %186 = arith.addf %175, %182 : vector<2x128xf32>
    %187 = arith.negf %186 : vector<2x128xf32>
    %188 = math.exp %187 : vector<2x128xf32>
    %cst_195 = arith.constant 1.000000e+00 : f32
    %189 = vector.broadcast %cst_195 : f32 to vector<2x128xf32>
    %190 = arith.addf %189, %188 : vector<2x128xf32>
    %191 = arith.divf %189, %190 : vector<2x128xf32>
    %192 = arith.addf %178, %183 : vector<2x128xf32>
    %193 = arith.negf %192 : vector<2x128xf32>
    %194 = math.exp %193 : vector<2x128xf32>
    %cst_196 = arith.constant 1.000000e+00 : f32
    %195 = vector.broadcast %cst_196 : f32 to vector<2x128xf32>
    %196 = arith.addf %195, %194 : vector<2x128xf32>
    %197 = arith.divf %195, %196 : vector<2x128xf32>
    %198 = arith.mulf %191, %185 : vector<2x128xf32>
    %199 = arith.addf %181, %198 : vector<2x128xf32>
    %200 = math.tanh %199 : vector<2x128xf32>
    %cst_197 = arith.constant 1.000000e+00 : f32
    %201 = vector.broadcast %cst_197 : f32 to vector<2x128xf32>
    %202 = arith.subf %201, %197 : vector<2x128xf32>
    %203 = arith.mulf %202, %200 : vector<2x128xf32>
    %204 = arith.mulf %197, %172 : vector<2x128xf32>
    %205 = arith.addf %203, %204 : vector<2x128xf32>
    %c0_198 = arith.constant 0 : index
    %c0_199 = arith.constant 0 : index
    %206 = vector.load %arg35[%c0_198, %c0_199] : memref<12x128xf32, #tpu.memory_space<vmem>>, vector<2x128xf32>
    tpu.vector_store %arg35[%c0_198, %c0_199], %205 {strides = array<i32>} : memref<12x128xf32, #tpu.memory_space<vmem>>, vector<2x128xf32>,
    %c1_200 = arith.constant 1 : index
    %c0_201 = arith.constant 0 : index
    %207 = tpu.strided_load %arg33[%c1_200, %c0_201] {strides = array<i32: 6, 1>} : memref<36x128xf32, #tpu.memory_space<vmem>>, vector<2x128xf32>
    %c4 = arith.constant 4 : index
    %c0_202 = arith.constant 0 : index
    %208 = tpu.strided_load %arg34[%c4, %c0_202] {strides = array<i32: 6, 1>} : memref<36x128xf32, #tpu.memory_space<vmem>>, vector<2x128xf32>
    %209 = arith.addf %207, %208 : vector<2x128xf32>
    %c13 = arith.constant 13 : index
    %c0_203 = arith.constant 0 : index
    %210 = tpu.strided_load %arg33[%c13, %c0_203] {strides = array<i32: 6, 1>} : memref<36x128xf32, #tpu.memory_space<vmem>>, vector<2x128xf32>
    %c16 = arith.constant 16 : index
    %c0_204 = arith.constant 0 : index
    %211 = tpu.strided_load %arg34[%c16, %c0_204] {strides = array<i32: 6, 1>} : memref<36x128xf32, #tpu.memory_space<vmem>>, vector<2x128xf32>
    %212 = arith.addf %210, %211 : vector<2x128xf32>
    %c25 = arith.constant 25 : index
    %c0_205 = arith.constant 0 : index
    %213 = tpu.strided_load %arg33[%c25, %c0_205] {strides = array<i32: 6, 1>} : memref<36x128xf32, #tpu.memory_space<vmem>>, vector<2x128xf32>
    %c28 = arith.constant 28 : index
    %c0_206 = arith.constant 0 : index
    %214 = tpu.strided_load %arg34[%c28, %c0_206] {strides = array<i32: 6, 1>} : memref<36x128xf32, #tpu.memory_space<vmem>>, vector<2x128xf32>
    %215 = arith.addf %213, %214 : vector<2x128xf32>
    %cst_207 = arith.constant dense<0.000000e+00> : vector<2x128xf32>
    %216 = tpu.matmul %205, %164, %cst_207 {dimension_numbers = #tpu.dot_dimension_numbers<[1], [0], [0], [1], [0, 0, 1, 1], [], []>} : vector<2x128xf32>, vector<128x128xf32>, vector<2x128xf32> -> vector<2x128xf32>
    %cst_208 = arith.constant dense<0.000000e+00> : vector<2x128xf32>
    %217 = tpu.matmul %205, %166, %cst_208 {dimension_numbers = #tpu.dot_dimension_numbers<[1], [0], [0], [1], [0, 0, 1, 1], [], []>} : vector<2x128xf32>, vector<128x128xf32>, vector<2x128xf32> -> vector<2x128xf32>
    %cst_209 = arith.constant dense<0.000000e+00> : vector<2x128xf32>
    %218 = tpu.matmul %205, %168, %cst_209 {dimension_numbers = #tpu.dot_dimension_numbers<[1], [0], [0], [1], [0, 0, 1, 1], [], []>} : vector<2x128xf32>, vector<128x128xf32>, vector<2x128xf32> -> vector<2x128xf32>
    %219 = arith.addf %218, %171 : vector<2x128xf32>
    %220 = arith.addf %209, %216 : vector<2x128xf32>
    %221 = arith.negf %220 : vector<2x128xf32>
    %222 = math.exp %221 : vector<2x128xf32>
    %cst_210 = arith.constant 1.000000e+00 : f32
    %223 = vector.broadcast %cst_210 : f32 to vector<2x128xf32>
    %224 = arith.addf %223, %222 : vector<2x128xf32>
    %225 = arith.divf %223, %224 : vector<2x128xf32>
    %226 = arith.addf %212, %217 : vector<2x128xf32>
    %227 = arith.negf %226 : vector<2x128xf32>
    %228 = math.exp %227 : vector<2x128xf32>
    %cst_211 = arith.constant 1.000000e+00 : f32
    %229 = vector.broadcast %cst_211 : f32 to vector<2x128xf32>
    %230 = arith.addf %229, %228 : vector<2x128xf32>
    %231 = arith.divf %229, %230 : vector<2x128xf32>
    %232 = arith.mulf %225, %219 : vector<2x128xf32>
    %233 = arith.addf %215, %232 : vector<2x128xf32>
    %234 = math.tanh %233 : vector<2x128xf32>
    %cst_212 = arith.constant 1.000000e+00 : f32
    %235 = vector.broadcast %cst_212 : f32 to vector<2x128xf32>
    %236 = arith.subf %235, %231 : vector<2x128xf32>
    %237 = arith.mulf %236, %234 : vector<2x128xf32>
    %238 = arith.mulf %231, %205 : vector<2x128xf32>
    %239 = arith.addf %237, %238 : vector<2x128xf32>
    %c2_213 = arith.constant 2 : index
    %c0_214 = arith.constant 0 : index
    %240 = vector.load %arg35[%c2_213, %c0_214] : memref<12x128xf32, #tpu.memory_space<vmem>>, vector<2x128xf32>
    tpu.vector_store %arg35[%c2_213, %c0_214], %239 {strides = array<i32>} : memref<12x128xf32, #tpu.memory_space<vmem>>, vector<2x128xf32>,
    %c2_215 = arith.constant 2 : index
    %c0_216 = arith.constant 0 : index
    %241 = tpu.strided_load %arg33[%c2_215, %c0_216] {strides = array<i32: 6, 1>} : memref<36x128xf32, #tpu.memory_space<vmem>>, vector<2x128xf32>
    %c3 = arith.constant 3 : index
    %c0_217 = arith.constant 0 : index
    %242 = tpu.strided_load %arg34[%c3, %c0_217] {strides = array<i32: 6, 1>} : memref<36x128xf32, #tpu.memory_space<vmem>>, vector<2x128xf32>
    %243 = arith.addf %241, %242 : vector<2x128xf32>
    %c14 = arith.constant 14 : index
    %c0_218 = arith.constant 0 : index
    %244 = tpu.strided_load %arg33[%c14, %c0_218] {strides = array<i32: 6, 1>} : memref<36x128xf32, #tpu.memory_space<vmem>>, vector<2x128xf32>
    %c15 = arith.constant 15 : index
    %c0_219 = arith.constant 0 : index
    %245 = tpu.strided_load %arg34[%c15, %c0_219] {strides = array<i32: 6, 1>} : memref<36x128xf32, #tpu.memory_space<vmem>>, vector<2x128xf32>
    %246 = arith.addf %244, %245 : vector<2x128xf32>
    %c26 = arith.constant 26 : index
    %c0_220 = arith.constant 0 : index
    %247 = tpu.strided_load %arg33[%c26, %c0_220] {strides = array<i32: 6, 1>} : memref<36x128xf32, #tpu.memory_space<vmem>>, vector<2x128xf32>
    %c27 = arith.constant 27 : index
    %c0_221 = arith.constant 0 : index
    %248 = tpu.strided_load %arg34[%c27, %c0_221] {strides = array<i32: 6, 1>} : memref<36x128xf32, #tpu.memory_space<vmem>>, vector<2x128xf32>
    %249 = arith.addf %247, %248 : vector<2x128xf32>
    %cst_222 = arith.constant dense<0.000000e+00> : vector<2x128xf32>
    %250 = tpu.matmul %239, %164, %cst_222 {dimension_numbers = #tpu.dot_dimension_numbers<[1], [0], [0], [1], [0, 0, 1, 1], [], []>} : vector<2x128xf32>, vector<128x128xf32>, vector<2x128xf32> -> vector<2x128xf32>
    %cst_223 = arith.constant dense<0.000000e+00> : vector<2x128xf32>
    %251 = tpu.matmul %239, %166, %cst_223 {dimension_numbers = #tpu.dot_dimension_numbers<[1], [0], [0], [1], [0, 0, 1, 1], [], []>} : vector<2x128xf32>, vector<128x128xf32>, vector<2x128xf32> -> vector<2x128xf32>
    %cst_224 = arith.constant dense<0.000000e+00> : vector<2x128xf32>
    %252 = tpu.matmul %239, %168, %cst_224 {dimension_numbers = #tpu.dot_dimension_numbers<[1], [0], [0], [1], [0, 0, 1, 1], [], []>} : vector<2x128xf32>, vector<128x128xf32>, vector<2x128xf32> -> vector<2x128xf32>
    %253 = arith.addf %252, %171 : vector<2x128xf32>
    %254 = arith.addf %243, %250 : vector<2x128xf32>
    %255 = arith.negf %254 : vector<2x128xf32>
    %256 = math.exp %255 : vector<2x128xf32>
    %cst_225 = arith.constant 1.000000e+00 : f32
    %257 = vector.broadcast %cst_225 : f32 to vector<2x128xf32>
    %258 = arith.addf %257, %256 : vector<2x128xf32>
    %259 = arith.divf %257, %258 : vector<2x128xf32>
    %260 = arith.addf %246, %251 : vector<2x128xf32>
    %261 = arith.negf %260 : vector<2x128xf32>
    %262 = math.exp %261 : vector<2x128xf32>
    %cst_226 = arith.constant 1.000000e+00 : f32
    %263 = vector.broadcast %cst_226 : f32 to vector<2x128xf32>
    %264 = arith.addf %263, %262 : vector<2x128xf32>
    %265 = arith.divf %263, %264 : vector<2x128xf32>
    %266 = arith.mulf %259, %253 : vector<2x128xf32>
    %267 = arith.addf %249, %266 : vector<2x128xf32>
    %268 = math.tanh %267 : vector<2x128xf32>
    %cst_227 = arith.constant 1.000000e+00 : f32
    %269 = vector.broadcast %cst_227 : f32 to vector<2x128xf32>
    %270 = arith.subf %269, %265 : vector<2x128xf32>
    %271 = arith.mulf %270, %268 : vector<2x128xf32>
    %272 = arith.mulf %265, %239 : vector<2x128xf32>
    %273 = arith.addf %271, %272 : vector<2x128xf32>
    %c4_228 = arith.constant 4 : index
    %c0_229 = arith.constant 0 : index
    %274 = vector.load %arg35[%c4_228, %c0_229] : memref<12x128xf32, #tpu.memory_space<vmem>>, vector<2x128xf32>
    tpu.vector_store %arg35[%c4_228, %c0_229], %273 {strides = array<i32>} : memref<12x128xf32, #tpu.memory_space<vmem>>, vector<2x128xf32>,
    %c3_230 = arith.constant 3 : index
    %c0_231 = arith.constant 0 : index
    %275 = tpu.strided_load %arg33[%c3_230, %c0_231] {strides = array<i32: 6, 1>} : memref<36x128xf32, #tpu.memory_space<vmem>>, vector<2x128xf32>
    %c2_232 = arith.constant 2 : index
    %c0_233 = arith.constant 0 : index
    %276 = tpu.strided_load %arg34[%c2_232, %c0_233] {strides = array<i32: 6, 1>} : memref<36x128xf32, #tpu.memory_space<vmem>>, vector<2x128xf32>
    %277 = arith.addf %275, %276 : vector<2x128xf32>
    %c15_234 = arith.constant 15 : index
    %c0_235 = arith.constant 0 : index
    %278 = tpu.strided_load %arg33[%c15_234, %c0_235] {strides = array<i32: 6, 1>} : memref<36x128xf32, #tpu.memory_space<vmem>>, vector<2x128xf32>
    %c14_236 = arith.constant 14 : index
    %c0_237 = arith.constant 0 : index
    %279 = tpu.strided_load %arg34[%c14_236, %c0_237] {strides = array<i32: 6, 1>} : memref<36x128xf32, #tpu.memory_space<vmem>>, vector<2x128xf32>
    %280 = arith.addf %278, %279 : vector<2x128xf32>
    %c27_238 = arith.constant 27 : index
    %c0_239 = arith.constant 0 : index
    %281 = tpu.strided_load %arg33[%c27_238, %c0_239] {strides = array<i32: 6, 1>} : memref<36x128xf32, #tpu.memory_space<vmem>>, vector<2x128xf32>
    %c26_240 = arith.constant 26 : index
    %c0_241 = arith.constant 0 : index
    %282 = tpu.strided_load %arg34[%c26_240, %c0_241] {strides = array<i32: 6, 1>} : memref<36x128xf32, #tpu.memory_space<vmem>>, vector<2x128xf32>
    %283 = arith.addf %281, %282 : vector<2x128xf32>
    %cst_242 = arith.constant dense<0.000000e+00> : vector<2x128xf32>
    %284 = tpu.matmul %273, %164, %cst_242 {dimension_numbers = #tpu.dot_dimension_numbers<[1], [0], [0], [1], [0, 0, 1, 1], [], []>} : vector<2x128xf32>, vector<128x128xf32>, vector<2x128xf32> -> vector<2x128xf32>
    %cst_243 = arith.constant dense<0.000000e+00> : vector<2x128xf32>
    %285 = tpu.matmul %273, %166, %cst_243 {dimension_numbers = #tpu.dot_dimension_numbers<[1], [0], [0], [1], [0, 0, 1, 1], [], []>} : vector<2x128xf32>, vector<128x128xf32>, vector<2x128xf32> -> vector<2x128xf32>
    %cst_244 = arith.constant dense<0.000000e+00> : vector<2x128xf32>
    %286 = tpu.matmul %273, %168, %cst_244 {dimension_numbers = #tpu.dot_dimension_numbers<[1], [0], [0], [1], [0, 0, 1, 1], [], []>} : vector<2x128xf32>, vector<128x128xf32>, vector<2x128xf32> -> vector<2x128xf32>
    %287 = arith.addf %286, %171 : vector<2x128xf32>
    %288 = arith.addf %277, %284 : vector<2x128xf32>
    %289 = arith.negf %288 : vector<2x128xf32>
    %290 = math.exp %289 : vector<2x128xf32>
    %cst_245 = arith.constant 1.000000e+00 : f32
    %291 = vector.broadcast %cst_245 : f32 to vector<2x128xf32>
    %292 = arith.addf %291, %290 : vector<2x128xf32>
    %293 = arith.divf %291, %292 : vector<2x128xf32>
    %294 = arith.addf %280, %285 : vector<2x128xf32>
    %295 = arith.negf %294 : vector<2x128xf32>
    %296 = math.exp %295 : vector<2x128xf32>
    %cst_246 = arith.constant 1.000000e+00 : f32
    %297 = vector.broadcast %cst_246 : f32 to vector<2x128xf32>
    %298 = arith.addf %297, %296 : vector<2x128xf32>
    %299 = arith.divf %297, %298 : vector<2x128xf32>
    %300 = arith.mulf %293, %287 : vector<2x128xf32>
    %301 = arith.addf %283, %300 : vector<2x128xf32>
    %302 = math.tanh %301 : vector<2x128xf32>
    %cst_247 = arith.constant 1.000000e+00 : f32
    %303 = vector.broadcast %cst_247 : f32 to vector<2x128xf32>
    %304 = arith.subf %303, %299 : vector<2x128xf32>
    %305 = arith.mulf %304, %302 : vector<2x128xf32>
    %306 = arith.mulf %299, %273 : vector<2x128xf32>
    %307 = arith.addf %305, %306 : vector<2x128xf32>
    %c6_248 = arith.constant 6 : index
    %c0_249 = arith.constant 0 : index
    %308 = vector.load %arg35[%c6_248, %c0_249] : memref<12x128xf32, #tpu.memory_space<vmem>>, vector<2x128xf32>
    tpu.vector_store %arg35[%c6_248, %c0_249], %307 {strides = array<i32>} : memref<12x128xf32, #tpu.memory_space<vmem>>, vector<2x128xf32>,
    %c4_250 = arith.constant 4 : index
    %c0_251 = arith.constant 0 : index
    %309 = tpu.strided_load %arg33[%c4_250, %c0_251] {strides = array<i32: 6, 1>} : memref<36x128xf32, #tpu.memory_space<vmem>>, vector<2x128xf32>
    %c1_252 = arith.constant 1 : index
    %c0_253 = arith.constant 0 : index
    %310 = tpu.strided_load %arg34[%c1_252, %c0_253] {strides = array<i32: 6, 1>} : memref<36x128xf32, #tpu.memory_space<vmem>>, vector<2x128xf32>
    %311 = arith.addf %309, %310 : vector<2x128xf32>
    %c16_254 = arith.constant 16 : index
    %c0_255 = arith.constant 0 : index
    %312 = tpu.strided_load %arg33[%c16_254, %c0_255] {strides = array<i32: 6, 1>} : memref<36x128xf32, #tpu.memory_space<vmem>>, vector<2x128xf32>
    %c13_256 = arith.constant 13 : index
    %c0_257 = arith.constant 0 : index
    %313 = tpu.strided_load %arg34[%c13_256, %c0_257] {strides = array<i32: 6, 1>} : memref<36x128xf32, #tpu.memory_space<vmem>>, vector<2x128xf32>
    %314 = arith.addf %312, %313 : vector<2x128xf32>
    %c28_258 = arith.constant 28 : index
    %c0_259 = arith.constant 0 : index
    %315 = tpu.strided_load %arg33[%c28_258, %c0_259] {strides = array<i32: 6, 1>} : memref<36x128xf32, #tpu.memory_space<vmem>>, vector<2x128xf32>
    %c25_260 = arith.constant 25 : index
    %c0_261 = arith.constant 0 : index
    %316 = tpu.strided_load %arg34[%c25_260, %c0_261] {strides = array<i32: 6, 1>} : memref<36x128xf32, #tpu.memory_space<vmem>>, vector<2x128xf32>
    %317 = arith.addf %315, %316 : vector<2x128xf32>
    %cst_262 = arith.constant dense<0.000000e+00> : vector<2x128xf32>
    %318 = tpu.matmul %307, %164, %cst_262 {dimension_numbers = #tpu.dot_dimension_numbers<[1], [0], [0], [1], [0, 0, 1, 1], [], []>} : vector<2x128xf32>, vector<128x128xf32>, vector<2x128xf32> -> vector<2x128xf32>
    %cst_263 = arith.constant dense<0.000000e+00> : vector<2x128xf32>
    %319 = tpu.matmul %307, %166, %cst_263 {dimension_numbers = #tpu.dot_dimension_numbers<[1], [0], [0], [1], [0, 0, 1, 1], [], []>} : vector<2x128xf32>, vector<128x128xf32>, vector<2x128xf32> -> vector<2x128xf32>
    %cst_264 = arith.constant dense<0.000000e+00> : vector<2x128xf32>
    %320 = tpu.matmul %307, %168, %cst_264 {dimension_numbers = #tpu.dot_dimension_numbers<[1], [0], [0], [1], [0, 0, 1, 1], [], []>} : vector<2x128xf32>, vector<128x128xf32>, vector<2x128xf32> -> vector<2x128xf32>
    %321 = arith.addf %320, %171 : vector<2x128xf32>
    %322 = arith.addf %311, %318 : vector<2x128xf32>
    %323 = arith.negf %322 : vector<2x128xf32>
    %324 = math.exp %323 : vector<2x128xf32>
    %cst_265 = arith.constant 1.000000e+00 : f32
    %325 = vector.broadcast %cst_265 : f32 to vector<2x128xf32>
    %326 = arith.addf %325, %324 : vector<2x128xf32>
    %327 = arith.divf %325, %326 : vector<2x128xf32>
    %328 = arith.addf %314, %319 : vector<2x128xf32>
    %329 = arith.negf %328 : vector<2x128xf32>
    %330 = math.exp %329 : vector<2x128xf32>
    %cst_266 = arith.constant 1.000000e+00 : f32
    %331 = vector.broadcast %cst_266 : f32 to vector<2x128xf32>
    %332 = arith.addf %331, %330 : vector<2x128xf32>
    %333 = arith.divf %331, %332 : vector<2x128xf32>
    %334 = arith.mulf %327, %321 : vector<2x128xf32>
    %335 = arith.addf %317, %334 : vector<2x128xf32>
    %336 = math.tanh %335 : vector<2x128xf32>
    %cst_267 = arith.constant 1.000000e+00 : f32
    %337 = vector.broadcast %cst_267 : f32 to vector<2x128xf32>
    %338 = arith.subf %337, %333 : vector<2x128xf32>
    %339 = arith.mulf %338, %336 : vector<2x128xf32>
    %340 = arith.mulf %333, %307 : vector<2x128xf32>
    %341 = arith.addf %339, %340 : vector<2x128xf32>
    %c8 = arith.constant 8 : index
    %c0_268 = arith.constant 0 : index
    %342 = vector.load %arg35[%c8, %c0_268] : memref<12x128xf32, #tpu.memory_space<vmem>>, vector<2x128xf32>
    tpu.vector_store %arg35[%c8, %c0_268], %341 {strides = array<i32>} : memref<12x128xf32, #tpu.memory_space<vmem>>, vector<2x128xf32>,
    %c5_269 = arith.constant 5 : index
    %c0_270 = arith.constant 0 : index
    %343 = tpu.strided_load %arg33[%c5_269, %c0_270] {strides = array<i32: 6, 1>} : memref<36x128xf32, #tpu.memory_space<vmem>>, vector<2x128xf32>
    %c0_271 = arith.constant 0 : index
    %c0_272 = arith.constant 0 : index
    %344 = tpu.strided_load %arg34[%c0_271, %c0_272] {strides = array<i32: 6, 1>} : memref<36x128xf32, #tpu.memory_space<vmem>>, vector<2x128xf32>
    %345 = arith.addf %343, %344 : vector<2x128xf32>
    %c17_273 = arith.constant 17 : index
    %c0_274 = arith.constant 0 : index
    %346 = tpu.strided_load %arg33[%c17_273, %c0_274] {strides = array<i32: 6, 1>} : memref<36x128xf32, #tpu.memory_space<vmem>>, vector<2x128xf32>
    %c12_275 = arith.constant 12 : index
    %c0_276 = arith.constant 0 : index
    %347 = tpu.strided_load %arg34[%c12_275, %c0_276] {strides = array<i32: 6, 1>} : memref<36x128xf32, #tpu.memory_space<vmem>>, vector<2x128xf32>
    %348 = arith.addf %346, %347 : vector<2x128xf32>
    %c29_277 = arith.constant 29 : index
    %c0_278 = arith.constant 0 : index
    %349 = tpu.strided_load %arg33[%c29_277, %c0_278] {strides = array<i32: 6, 1>} : memref<36x128xf32, #tpu.memory_space<vmem>>, vector<2x128xf32>
    %c24_279 = arith.constant 24 : index
    %c0_280 = arith.constant 0 : index
    %350 = tpu.strided_load %arg34[%c24_279, %c0_280] {strides = array<i32: 6, 1>} : memref<36x128xf32, #tpu.memory_space<vmem>>, vector<2x128xf32>
    %351 = arith.addf %349, %350 : vector<2x128xf32>
    %cst_281 = arith.constant dense<0.000000e+00> : vector<2x128xf32>
    %352 = tpu.matmul %341, %164, %cst_281 {dimension_numbers = #tpu.dot_dimension_numbers<[1], [0], [0], [1], [0, 0, 1, 1], [], []>} : vector<2x128xf32>, vector<128x128xf32>, vector<2x128xf32> -> vector<2x128xf32>
    %cst_282 = arith.constant dense<0.000000e+00> : vector<2x128xf32>
    %353 = tpu.matmul %341, %166, %cst_282 {dimension_numbers = #tpu.dot_dimension_numbers<[1], [0], [0], [1], [0, 0, 1, 1], [], []>} : vector<2x128xf32>, vector<128x128xf32>, vector<2x128xf32> -> vector<2x128xf32>
    %cst_283 = arith.constant dense<0.000000e+00> : vector<2x128xf32>
    %354 = tpu.matmul %341, %168, %cst_283 {dimension_numbers = #tpu.dot_dimension_numbers<[1], [0], [0], [1], [0, 0, 1, 1], [], []>} : vector<2x128xf32>, vector<128x128xf32>, vector<2x128xf32> -> vector<2x128xf32>
    %355 = arith.addf %354, %171 : vector<2x128xf32>
    %356 = arith.addf %345, %352 : vector<2x128xf32>
    %357 = arith.negf %356 : vector<2x128xf32>
    %358 = math.exp %357 : vector<2x128xf32>
    %cst_284 = arith.constant 1.000000e+00 : f32
    %359 = vector.broadcast %cst_284 : f32 to vector<2x128xf32>
    %360 = arith.addf %359, %358 : vector<2x128xf32>
    %361 = arith.divf %359, %360 : vector<2x128xf32>
    %362 = arith.addf %348, %353 : vector<2x128xf32>
    %363 = arith.negf %362 : vector<2x128xf32>
    %364 = math.exp %363 : vector<2x128xf32>
    %cst_285 = arith.constant 1.000000e+00 : f32
    %365 = vector.broadcast %cst_285 : f32 to vector<2x128xf32>
    %366 = arith.addf %365, %364 : vector<2x128xf32>
    %367 = arith.divf %365, %366 : vector<2x128xf32>
    %368 = arith.mulf %361, %355 : vector<2x128xf32>
    %369 = arith.addf %351, %368 : vector<2x128xf32>
    %370 = math.tanh %369 : vector<2x128xf32>
    %cst_286 = arith.constant 1.000000e+00 : f32
    %371 = vector.broadcast %cst_286 : f32 to vector<2x128xf32>
    %372 = arith.subf %371, %367 : vector<2x128xf32>
    %373 = arith.mulf %372, %370 : vector<2x128xf32>
    %374 = arith.mulf %367, %341 : vector<2x128xf32>
    %375 = arith.addf %373, %374 : vector<2x128xf32>
    %c10 = arith.constant 10 : index
    %c0_287 = arith.constant 0 : index
    %376 = vector.load %arg35[%c10, %c0_287] : memref<12x128xf32, #tpu.memory_space<vmem>>, vector<2x128xf32>
    tpu.vector_store %arg35[%c10, %c0_287], %375 {strides = array<i32>} : memref<12x128xf32, #tpu.memory_space<vmem>>, vector<2x128xf32>,
    %377 = tpu.iota {dimensions = array<i32: 1>} : vector<2x128xi32>
    %c64_i32 = arith.constant 64 : i32
    %378 = vector.broadcast %c64_i32 : i32 to vector<2x128xi32>
    %379 = arith.cmpi slt, %377, %378 : vector<2x128xi32>
    %c0_288 = arith.constant 0 : index
    %c0_289 = arith.constant 0 : index
    %380 = vector.load %arg35[%c0_288, %c0_289] : memref<12x128xf32, #tpu.memory_space<vmem>>, vector<2x128xf32>
    %c10_290 = arith.constant 10 : index
    %c0_291 = arith.constant 0 : index
    %381 = vector.load %arg35[%c10_290, %c0_291] : memref<12x128xf32, #tpu.memory_space<vmem>>, vector<2x128xf32>
    %382 = arith.select %379, %380, %381 : vector<2x128xi1>, vector<2x128xf32>
    %c0_292 = arith.constant 0 : index
    %c0_293 = arith.constant 0 : index
    %383 = vector.load %arg36[%c0_292, %c0_293] : memref<12x128xf32, #tpu.memory_space<vmem>>, vector<2x128xf32>
    tpu.vector_store %arg36[%c0_292, %c0_293], %382 {strides = array<i32>} : memref<12x128xf32, #tpu.memory_space<vmem>>, vector<2x128xf32>,
    %c2_294 = arith.constant 2 : index
    %c0_295 = arith.constant 0 : index
    %384 = vector.load %arg35[%c2_294, %c0_295] : memref<12x128xf32, #tpu.memory_space<vmem>>, vector<2x128xf32>
    %c8_296 = arith.constant 8 : index
    %c0_297 = arith.constant 0 : index
    %385 = vector.load %arg35[%c8_296, %c0_297] : memref<12x128xf32, #tpu.memory_space<vmem>>, vector<2x128xf32>
    %386 = arith.select %379, %384, %385 : vector<2x128xi1>, vector<2x128xf32>
    %c2_298 = arith.constant 2 : index
    %c0_299 = arith.constant 0 : index
    %387 = vector.load %arg36[%c2_298, %c0_299] : memref<12x128xf32, #tpu.memory_space<vmem>>, vector<2x128xf32>
    tpu.vector_store %arg36[%c2_298, %c0_299], %386 {strides = array<i32>} : memref<12x128xf32, #tpu.memory_space<vmem>>, vector<2x128xf32>,
    %c4_300 = arith.constant 4 : index
    %c0_301 = arith.constant 0 : index
    %388 = vector.load %arg35[%c4_300, %c0_301] : memref<12x128xf32, #tpu.memory_space<vmem>>, vector<2x128xf32>
    %c6_302 = arith.constant 6 : index
    %c0_303 = arith.constant 0 : index
    %389 = vector.load %arg35[%c6_302, %c0_303] : memref<12x128xf32, #tpu.memory_space<vmem>>, vector<2x128xf32>
    %390 = arith.select %379, %388, %389 : vector<2x128xi1>, vector<2x128xf32>
    %c4_304 = arith.constant 4 : index
    %c0_305 = arith.constant 0 : index
    %391 = vector.load %arg36[%c4_304, %c0_305] : memref<12x128xf32, #tpu.memory_space<vmem>>, vector<2x128xf32>
    tpu.vector_store %arg36[%c4_304, %c0_305], %390 {strides = array<i32>} : memref<12x128xf32, #tpu.memory_space<vmem>>, vector<2x128xf32>,
    %c6_306 = arith.constant 6 : index
    %c0_307 = arith.constant 0 : index
    %392 = vector.load %arg35[%c6_306, %c0_307] : memref<12x128xf32, #tpu.memory_space<vmem>>, vector<2x128xf32>
    %c4_308 = arith.constant 4 : index
    %c0_309 = arith.constant 0 : index
    %393 = vector.load %arg35[%c4_308, %c0_309] : memref<12x128xf32, #tpu.memory_space<vmem>>, vector<2x128xf32>
    %394 = arith.select %379, %392, %393 : vector<2x128xi1>, vector<2x128xf32>
    %c6_310 = arith.constant 6 : index
    %c0_311 = arith.constant 0 : index
    %395 = vector.load %arg36[%c6_310, %c0_311] : memref<12x128xf32, #tpu.memory_space<vmem>>, vector<2x128xf32>
    tpu.vector_store %arg36[%c6_310, %c0_311], %394 {strides = array<i32>} : memref<12x128xf32, #tpu.memory_space<vmem>>, vector<2x128xf32>,
    %c8_312 = arith.constant 8 : index
    %c0_313 = arith.constant 0 : index
    %396 = vector.load %arg35[%c8_312, %c0_313] : memref<12x128xf32, #tpu.memory_space<vmem>>, vector<2x128xf32>
    %c2_314 = arith.constant 2 : index
    %c0_315 = arith.constant 0 : index
    %397 = vector.load %arg35[%c2_314, %c0_315] : memref<12x128xf32, #tpu.memory_space<vmem>>, vector<2x128xf32>
    %398 = arith.select %379, %396, %397 : vector<2x128xi1>, vector<2x128xf32>
    %c8_316 = arith.constant 8 : index
    %c0_317 = arith.constant 0 : index
    %399 = vector.load %arg36[%c8_316, %c0_317] : memref<12x128xf32, #tpu.memory_space<vmem>>, vector<2x128xf32>
    tpu.vector_store %arg36[%c8_316, %c0_317], %398 {strides = array<i32>} : memref<12x128xf32, #tpu.memory_space<vmem>>, vector<2x128xf32>,
    %c10_318 = arith.constant 10 : index
    %c0_319 = arith.constant 0 : index
    %400 = vector.load %arg35[%c10_318, %c0_319] : memref<12x128xf32, #tpu.memory_space<vmem>>, vector<2x128xf32>
    %c0_320 = arith.constant 0 : index
    %c0_321 = arith.constant 0 : index
    %401 = vector.load %arg35[%c0_320, %c0_321] : memref<12x128xf32, #tpu.memory_space<vmem>>, vector<2x128xf32>
    %402 = arith.select %379, %400, %401 : vector<2x128xi1>, vector<2x128xf32>
    %c10_322 = arith.constant 10 : index
    %c0_323 = arith.constant 0 : index
    %403 = vector.load %arg36[%c10_322, %c0_323] : memref<12x128xf32, #tpu.memory_space<vmem>>, vector<2x128xf32>
    tpu.vector_store %arg36[%c10_322, %c0_323], %402 {strides = array<i32>} : memref<12x128xf32, #tpu.memory_space<vmem>>, vector<2x128xf32>,
    %c0_324 = arith.constant 0 : index
    %c0_325 = arith.constant 0 : index
    %404 = vector.load %arg36[%c0_324, %c0_325] : memref<12x128xf32, #tpu.memory_space<vmem>>, vector<12x128xf32>
    %c0_326 = arith.constant 0 : index
    %c0_327 = arith.constant 0 : index
    %c0_328 = arith.constant 0 : index
    %405 = vector.load %arg13[%c0_326, %c0_327, %c0_328] : memref<3x128x128xf32, #tpu.memory_space<vmem>>, vector<1x128x128xf32>
    %406 = vector.shape_cast %405 : vector<1x128x128xf32> to vector<128x128xf32>
    %cst_329 = arith.constant dense<0.000000e+00> : vector<12x128xf32>
    %407 = tpu.matmul %404, %406, %cst_329 {dimension_numbers = #tpu.dot_dimension_numbers<[1], [0], [0], [1], [0, 0, 1, 1], [], []>} : vector<12x128xf32>, vector<128x128xf32>, vector<12x128xf32> -> vector<12x128xf32>
    %c0_330 = arith.constant 0 : index
    %c0_331 = arith.constant 0 : index
    %c0_332 = arith.constant 0 : index
    %408 = vector.load %arg14[%c0_330, %c0_331, %c0_332] : memref<3x1x128xf32, #tpu.memory_space<vmem>>, vector<1x1x128xf32>
    %409 = vector.shape_cast %408 : vector<1x1x128xf32> to vector<1x128xf32>
    %410 = vector.broadcast %409 : vector<1x128xf32> to vector<12x128xf32>
    %411 = arith.addf %407, %410 : vector<12x128xf32>
    %c0_333 = arith.constant 0 : index
    %c0_334 = arith.constant 0 : index
    %412 = vector.load %arg33[%c0_333, %c0_334] : memref<36x128xf32, #tpu.memory_space<vmem>>, vector<12x128xf32>
    tpu.vector_store %arg33[%c0_333, %c0_334], %411 {strides = array<i32>} : memref<36x128xf32, #tpu.memory_space<vmem>>, vector<12x128xf32>,
    %c0_335 = arith.constant 0 : index
    %c0_336 = arith.constant 0 : index
    %c0_337 = arith.constant 0 : index
    %413 = vector.load %arg15[%c0_335, %c0_336, %c0_337] : memref<3x128x128xf32, #tpu.memory_space<vmem>>, vector<1x128x128xf32>
    %414 = vector.shape_cast %413 : vector<1x128x128xf32> to vector<128x128xf32>
    %cst_338 = arith.constant dense<0.000000e+00> : vector<12x128xf32>
    %415 = tpu.matmul %404, %414, %cst_338 {dimension_numbers = #tpu.dot_dimension_numbers<[1], [0], [0], [1], [0, 0, 1, 1], [], []>} : vector<12x128xf32>, vector<128x128xf32>, vector<12x128xf32> -> vector<12x128xf32>
    %c0_339 = arith.constant 0 : index
    %c0_340 = arith.constant 0 : index
    %c0_341 = arith.constant 0 : index
    %416 = vector.load %arg16[%c0_339, %c0_340, %c0_341] : memref<3x1x128xf32, #tpu.memory_space<vmem>>, vector<1x1x128xf32>
    %417 = vector.shape_cast %416 : vector<1x1x128xf32> to vector<1x128xf32>
    %418 = vector.broadcast %417 : vector<1x128xf32> to vector<12x128xf32>
    %419 = arith.addf %415, %418 : vector<12x128xf32>
    %c0_342 = arith.constant 0 : index
    %c0_343 = arith.constant 0 : index
    %420 = vector.load %arg34[%c0_342, %c0_343] : memref<36x128xf32, #tpu.memory_space<vmem>>, vector<12x128xf32>
    tpu.vector_store %arg34[%c0_342, %c0_343], %419 {strides = array<i32>} : memref<36x128xf32, #tpu.memory_space<vmem>>, vector<12x128xf32>,
    %c1_344 = arith.constant 1 : index
    %c0_345 = arith.constant 0 : index
    %c0_346 = arith.constant 0 : index
    %421 = vector.load %arg13[%c1_344, %c0_345, %c0_346] : memref<3x128x128xf32, #tpu.memory_space<vmem>>, vector<1x128x128xf32>
    %422 = vector.shape_cast %421 : vector<1x128x128xf32> to vector<128x128xf32>
    %cst_347 = arith.constant dense<0.000000e+00> : vector<12x128xf32>
    %423 = tpu.matmul %404, %422, %cst_347 {dimension_numbers = #tpu.dot_dimension_numbers<[1], [0], [0], [1], [0, 0, 1, 1], [], []>} : vector<12x128xf32>, vector<128x128xf32>, vector<12x128xf32> -> vector<12x128xf32>
    %c1_348 = arith.constant 1 : index
    %c0_349 = arith.constant 0 : index
    %c0_350 = arith.constant 0 : index
    %424 = vector.load %arg14[%c1_348, %c0_349, %c0_350] : memref<3x1x128xf32, #tpu.memory_space<vmem>>, vector<1x1x128xf32>
    %425 = vector.shape_cast %424 : vector<1x1x128xf32> to vector<1x128xf32>
    %426 = vector.broadcast %425 : vector<1x128xf32> to vector<12x128xf32>
    %427 = arith.addf %423, %426 : vector<12x128xf32>
    %c12_351 = arith.constant 12 : index
    %c0_352 = arith.constant 0 : index
    %428 = vector.load %arg33[%c12_351, %c0_352] : memref<36x128xf32, #tpu.memory_space<vmem>>, vector<12x128xf32>
    tpu.vector_store %arg33[%c12_351, %c0_352], %427 {strides = array<i32>} : memref<36x128xf32, #tpu.memory_space<vmem>>, vector<12x128xf32>,
    %c1_353 = arith.constant 1 : index
    %c0_354 = arith.constant 0 : index
    %c0_355 = arith.constant 0 : index
    %429 = vector.load %arg15[%c1_353, %c0_354, %c0_355] : memref<3x128x128xf32, #tpu.memory_space<vmem>>, vector<1x128x128xf32>
    %430 = vector.shape_cast %429 : vector<1x128x128xf32> to vector<128x128xf32>
    %cst_356 = arith.constant dense<0.000000e+00> : vector<12x128xf32>
    %431 = tpu.matmul %404, %430, %cst_356 {dimension_numbers = #tpu.dot_dimension_numbers<[1], [0], [0], [1], [0, 0, 1, 1], [], []>} : vector<12x128xf32>, vector<128x128xf32>, vector<12x128xf32> -> vector<12x128xf32>
    %c1_357 = arith.constant 1 : index
    %c0_358 = arith.constant 0 : index
    %c0_359 = arith.constant 0 : index
    %432 = vector.load %arg16[%c1_357, %c0_358, %c0_359] : memref<3x1x128xf32, #tpu.memory_space<vmem>>, vector<1x1x128xf32>
    %433 = vector.shape_cast %432 : vector<1x1x128xf32> to vector<1x128xf32>
    %434 = vector.broadcast %433 : vector<1x128xf32> to vector<12x128xf32>
    %435 = arith.addf %431, %434 : vector<12x128xf32>
    %c12_360 = arith.constant 12 : index
    %c0_361 = arith.constant 0 : index
    %436 = vector.load %arg34[%c12_360, %c0_361] : memref<36x128xf32, #tpu.memory_space<vmem>>, vector<12x128xf32>
    tpu.vector_store %arg34[%c12_360, %c0_361], %435 {strides = array<i32>} : memref<36x128xf32, #tpu.memory_space<vmem>>, vector<12x128xf32>,
    %c2_362 = arith.constant 2 : index
    %c0_363 = arith.constant 0 : index
    %c0_364 = arith.constant 0 : index
    %437 = vector.load %arg13[%c2_362, %c0_363, %c0_364] : memref<3x128x128xf32, #tpu.memory_space<vmem>>, vector<1x128x128xf32>
    %438 = vector.shape_cast %437 : vector<1x128x128xf32> to vector<128x128xf32>
    %cst_365 = arith.constant dense<0.000000e+00> : vector<12x128xf32>
    %439 = tpu.matmul %404, %438, %cst_365 {dimension_numbers = #tpu.dot_dimension_numbers<[1], [0], [0], [1], [0, 0, 1, 1], [], []>} : vector<12x128xf32>, vector<128x128xf32>, vector<12x128xf32> -> vector<12x128xf32>
    %c2_366 = arith.constant 2 : index
    %c0_367 = arith.constant 0 : index
    %c0_368 = arith.constant 0 : index
    %440 = vector.load %arg14[%c2_366, %c0_367, %c0_368] : memref<3x1x128xf32, #tpu.memory_space<vmem>>, vector<1x1x128xf32>
    %441 = vector.shape_cast %440 : vector<1x1x128xf32> to vector<1x128xf32>
    %442 = vector.broadcast %441 : vector<1x128xf32> to vector<12x128xf32>
    %443 = arith.addf %439, %442 : vector<12x128xf32>
    %c24_369 = arith.constant 24 : index
    %c0_370 = arith.constant 0 : index
    %444 = vector.load %arg33[%c24_369, %c0_370] : memref<36x128xf32, #tpu.memory_space<vmem>>, vector<12x128xf32>
    tpu.vector_store %arg33[%c24_369, %c0_370], %443 {strides = array<i32>} : memref<36x128xf32, #tpu.memory_space<vmem>>, vector<12x128xf32>,
    %c2_371 = arith.constant 2 : index
    %c0_372 = arith.constant 0 : index
    %c0_373 = arith.constant 0 : index
    %445 = vector.load %arg15[%c2_371, %c0_372, %c0_373] : memref<3x128x128xf32, #tpu.memory_space<vmem>>, vector<1x128x128xf32>
    %446 = vector.shape_cast %445 : vector<1x128x128xf32> to vector<128x128xf32>
    %cst_374 = arith.constant dense<0.000000e+00> : vector<12x128xf32>
    %447 = tpu.matmul %404, %446, %cst_374 {dimension_numbers = #tpu.dot_dimension_numbers<[1], [0], [0], [1], [0, 0, 1, 1], [], []>} : vector<12x128xf32>, vector<128x128xf32>, vector<12x128xf32> -> vector<12x128xf32>
    %c2_375 = arith.constant 2 : index
    %c0_376 = arith.constant 0 : index
    %c0_377 = arith.constant 0 : index
    %448 = vector.load %arg16[%c2_375, %c0_376, %c0_377] : memref<3x1x128xf32, #tpu.memory_space<vmem>>, vector<1x1x128xf32>
    %449 = vector.shape_cast %448 : vector<1x1x128xf32> to vector<1x128xf32>
    %450 = vector.broadcast %449 : vector<1x128xf32> to vector<12x128xf32>
    %451 = arith.addf %447, %450 : vector<12x128xf32>
    %c24_378 = arith.constant 24 : index
    %c0_379 = arith.constant 0 : index
    %452 = vector.load %arg34[%c24_378, %c0_379] : memref<36x128xf32, #tpu.memory_space<vmem>>, vector<12x128xf32>
    tpu.vector_store %arg34[%c24_378, %c0_379], %451 {strides = array<i32>} : memref<36x128xf32, #tpu.memory_space<vmem>>, vector<12x128xf32>,
    %c0_380 = arith.constant 0 : index
    %c0_381 = arith.constant 0 : index
    %c0_382 = arith.constant 0 : index
    %453 = vector.load %arg17[%c0_380, %c0_381, %c0_382] : memref<3x128x128xf32, #tpu.memory_space<vmem>>, vector<1x128x128xf32>
    %454 = vector.shape_cast %453 : vector<1x128x128xf32> to vector<128x128xf32>
    %c1_383 = arith.constant 1 : index
    %c0_384 = arith.constant 0 : index
    %c0_385 = arith.constant 0 : index
    %455 = vector.load %arg17[%c1_383, %c0_384, %c0_385] : memref<3x128x128xf32, #tpu.memory_space<vmem>>, vector<1x128x128xf32>
    %456 = vector.shape_cast %455 : vector<1x128x128xf32> to vector<128x128xf32>
    %c2_386 = arith.constant 2 : index
    %c0_387 = arith.constant 0 : index
    %c0_388 = arith.constant 0 : index
    %457 = vector.load %arg17[%c2_386, %c0_387, %c0_388] : memref<3x128x128xf32, #tpu.memory_space<vmem>>, vector<1x128x128xf32>
    %458 = vector.shape_cast %457 : vector<1x128x128xf32> to vector<128x128xf32>
    %c0_389 = arith.constant 0 : index
    %c0_390 = arith.constant 0 : index
    %459 = vector.load %arg18[%c0_389, %c0_390] : memref<1x128xf32, #tpu.memory_space<vmem>>, vector<1x128xf32>
    %460 = vector.shape_cast %459 : vector<1x128xf32> to vector<1x128xf32>
    %461 = vector.broadcast %460 : vector<1x128xf32> to vector<2x128xf32>
    %cst_391 = arith.constant 0.000000e+00 : f32
    %462 = vector.broadcast %cst_391 : f32 to vector<2x128xf32>
    %c0_392 = arith.constant 0 : index
    %c0_393 = arith.constant 0 : index
    %463 = vector.load %arg33[%c0_392, %c0_393] : memref<36x128xf32, #tpu.memory_space<vmem>>, vector<2x128xf32>
    %c10_394 = arith.constant 10 : index
    %c0_395 = arith.constant 0 : index
    %464 = vector.load %arg34[%c10_394, %c0_395] : memref<36x128xf32, #tpu.memory_space<vmem>>, vector<2x128xf32>
    %465 = arith.addf %463, %464 : vector<2x128xf32>
    %c12_396 = arith.constant 12 : index
    %c0_397 = arith.constant 0 : index
    %466 = vector.load %arg33[%c12_396, %c0_397] : memref<36x128xf32, #tpu.memory_space<vmem>>, vector<2x128xf32>
    %c22 = arith.constant 22 : index
    %c0_398 = arith.constant 0 : index
    %467 = vector.load %arg34[%c22, %c0_398] : memref<36x128xf32, #tpu.memory_space<vmem>>, vector<2x128xf32>
    %468 = arith.addf %466, %467 : vector<2x128xf32>
    %c24_399 = arith.constant 24 : index
    %c0_400 = arith.constant 0 : index
    %469 = vector.load %arg33[%c24_399, %c0_400] : memref<36x128xf32, #tpu.memory_space<vmem>>, vector<2x128xf32>
    %c34 = arith.constant 34 : index
    %c0_401 = arith.constant 0 : index
    %470 = vector.load %arg34[%c34, %c0_401] : memref<36x128xf32, #tpu.memory_space<vmem>>, vector<2x128xf32>
    %471 = arith.addf %469, %470 : vector<2x128xf32>
    %cst_402 = arith.constant dense<0.000000e+00> : vector<2x128xf32>
    %472 = tpu.matmul %462, %454, %cst_402 {dimension_numbers = #tpu.dot_dimension_numbers<[1], [0], [0], [1], [0, 0, 1, 1], [], []>} : vector<2x128xf32>, vector<128x128xf32>, vector<2x128xf32> -> vector<2x128xf32>
    %cst_403 = arith.constant dense<0.000000e+00> : vector<2x128xf32>
    %473 = tpu.matmul %462, %456, %cst_403 {dimension_numbers = #tpu.dot_dimension_numbers<[1], [0], [0], [1], [0, 0, 1, 1], [], []>} : vector<2x128xf32>, vector<128x128xf32>, vector<2x128xf32> -> vector<2x128xf32>
    %cst_404 = arith.constant dense<0.000000e+00> : vector<2x128xf32>
    %474 = tpu.matmul %462, %458, %cst_404 {dimension_numbers = #tpu.dot_dimension_numbers<[1], [0], [0], [1], [0, 0, 1, 1], [], []>} : vector<2x128xf32>, vector<128x128xf32>, vector<2x128xf32> -> vector<2x128xf32>
    %475 = arith.addf %474, %461 : vector<2x128xf32>
    %476 = arith.addf %465, %472 : vector<2x128xf32>
    %477 = arith.negf %476 : vector<2x128xf32>
    %478 = math.exp %477 : vector<2x128xf32>
    %cst_405 = arith.constant 1.000000e+00 : f32
    %479 = vector.broadcast %cst_405 : f32 to vector<2x128xf32>
    %480 = arith.addf %479, %478 : vector<2x128xf32>
    %481 = arith.divf %479, %480 : vector<2x128xf32>
    %482 = arith.addf %468, %473 : vector<2x128xf32>
    %483 = arith.negf %482 : vector<2x128xf32>
    %484 = math.exp %483 : vector<2x128xf32>
    %cst_406 = arith.constant 1.000000e+00 : f32
    %485 = vector.broadcast %cst_406 : f32 to vector<2x128xf32>
    %486 = arith.addf %485, %484 : vector<2x128xf32>
    %487 = arith.divf %485, %486 : vector<2x128xf32>
    %488 = arith.mulf %481, %475 : vector<2x128xf32>
    %489 = arith.addf %471, %488 : vector<2x128xf32>
    %490 = math.tanh %489 : vector<2x128xf32>
    %cst_407 = arith.constant 1.000000e+00 : f32
    %491 = vector.broadcast %cst_407 : f32 to vector<2x128xf32>
    %492 = arith.subf %491, %487 : vector<2x128xf32>
    %493 = arith.mulf %492, %490 : vector<2x128xf32>
    %494 = arith.mulf %487, %462 : vector<2x128xf32>
    %495 = arith.addf %493, %494 : vector<2x128xf32>
    %c0_408 = arith.constant 0 : index
    %c0_409 = arith.constant 0 : index
    %496 = vector.load %arg35[%c0_408, %c0_409] : memref<12x128xf32, #tpu.memory_space<vmem>>, vector<2x128xf32>
    tpu.vector_store %arg35[%c0_408, %c0_409], %495 {strides = array<i32>} : memref<12x128xf32, #tpu.memory_space<vmem>>, vector<2x128xf32>,
    %c2_410 = arith.constant 2 : index
    %c0_411 = arith.constant 0 : index
    %497 = vector.load %arg33[%c2_410, %c0_411] : memref<36x128xf32, #tpu.memory_space<vmem>>, vector<2x128xf32>
    %c8_412 = arith.constant 8 : index
    %c0_413 = arith.constant 0 : index
    %498 = vector.load %arg34[%c8_412, %c0_413] : memref<36x128xf32, #tpu.memory_space<vmem>>, vector<2x128xf32>
    %499 = arith.addf %497, %498 : vector<2x128xf32>
    %c14_414 = arith.constant 14 : index
    %c0_415 = arith.constant 0 : index
    %500 = vector.load %arg33[%c14_414, %c0_415] : memref<36x128xf32, #tpu.memory_space<vmem>>, vector<2x128xf32>
    %c20 = arith.constant 20 : index
    %c0_416 = arith.constant 0 : index
    %501 = vector.load %arg34[%c20, %c0_416] : memref<36x128xf32, #tpu.memory_space<vmem>>, vector<2x128xf32>
    %502 = arith.addf %500, %501 : vector<2x128xf32>
    %c26_417 = arith.constant 26 : index
    %c0_418 = arith.constant 0 : index
    %503 = vector.load %arg33[%c26_417, %c0_418] : memref<36x128xf32, #tpu.memory_space<vmem>>, vector<2x128xf32>
    %c32 = arith.constant 32 : index
    %c0_419 = arith.constant 0 : index
    %504 = vector.load %arg34[%c32, %c0_419] : memref<36x128xf32, #tpu.memory_space<vmem>>, vector<2x128xf32>
    %505 = arith.addf %503, %504 : vector<2x128xf32>
    %cst_420 = arith.constant dense<0.000000e+00> : vector<2x128xf32>
    %506 = tpu.matmul %495, %454, %cst_420 {dimension_numbers = #tpu.dot_dimension_numbers<[1], [0], [0], [1], [0, 0, 1, 1], [], []>} : vector<2x128xf32>, vector<128x128xf32>, vector<2x128xf32> -> vector<2x128xf32>
    %cst_421 = arith.constant dense<0.000000e+00> : vector<2x128xf32>
    %507 = tpu.matmul %495, %456, %cst_421 {dimension_numbers = #tpu.dot_dimension_numbers<[1], [0], [0], [1], [0, 0, 1, 1], [], []>} : vector<2x128xf32>, vector<128x128xf32>, vector<2x128xf32> -> vector<2x128xf32>
    %cst_422 = arith.constant dense<0.000000e+00> : vector<2x128xf32>
    %508 = tpu.matmul %495, %458, %cst_422 {dimension_numbers = #tpu.dot_dimension_numbers<[1], [0], [0], [1], [0, 0, 1, 1], [], []>} : vector<2x128xf32>, vector<128x128xf32>, vector<2x128xf32> -> vector<2x128xf32>
    %509 = arith.addf %508, %461 : vector<2x128xf32>
    %510 = arith.addf %499, %506 : vector<2x128xf32>
    %511 = arith.negf %510 : vector<2x128xf32>
    %512 = math.exp %511 : vector<2x128xf32>
    %cst_423 = arith.constant 1.000000e+00 : f32
    %513 = vector.broadcast %cst_423 : f32 to vector<2x128xf32>
    %514 = arith.addf %513, %512 : vector<2x128xf32>
    %515 = arith.divf %513, %514 : vector<2x128xf32>
    %516 = arith.addf %502, %507 : vector<2x128xf32>
    %517 = arith.negf %516 : vector<2x128xf32>
    %518 = math.exp %517 : vector<2x128xf32>
    %cst_424 = arith.constant 1.000000e+00 : f32
    %519 = vector.broadcast %cst_424 : f32 to vector<2x128xf32>
    %520 = arith.addf %519, %518 : vector<2x128xf32>
    %521 = arith.divf %519, %520 : vector<2x128xf32>
    %522 = arith.mulf %515, %509 : vector<2x128xf32>
    %523 = arith.addf %505, %522 : vector<2x128xf32>
    %524 = math.tanh %523 : vector<2x128xf32>
    %cst_425 = arith.constant 1.000000e+00 : f32
    %525 = vector.broadcast %cst_425 : f32 to vector<2x128xf32>
    %526 = arith.subf %525, %521 : vector<2x128xf32>
    %527 = arith.mulf %526, %524 : vector<2x128xf32>
    %528 = arith.mulf %521, %495 : vector<2x128xf32>
    %529 = arith.addf %527, %528 : vector<2x128xf32>
    %c2_426 = arith.constant 2 : index
    %c0_427 = arith.constant 0 : index
    %530 = vector.load %arg35[%c2_426, %c0_427] : memref<12x128xf32, #tpu.memory_space<vmem>>, vector<2x128xf32>
    tpu.vector_store %arg35[%c2_426, %c0_427], %529 {strides = array<i32>} : memref<12x128xf32, #tpu.memory_space<vmem>>, vector<2x128xf32>,
    %c4_428 = arith.constant 4 : index
    %c0_429 = arith.constant 0 : index
    %531 = vector.load %arg33[%c4_428, %c0_429] : memref<36x128xf32, #tpu.memory_space<vmem>>, vector<2x128xf32>
    %c6_430 = arith.constant 6 : index
    %c0_431 = arith.constant 0 : index
    %532 = vector.load %arg34[%c6_430, %c0_431] : memref<36x128xf32, #tpu.memory_space<vmem>>, vector<2x128xf32>
    %533 = arith.addf %531, %532 : vector<2x128xf32>
    %c16_432 = arith.constant 16 : index
    %c0_433 = arith.constant 0 : index
    %534 = vector.load %arg33[%c16_432, %c0_433] : memref<36x128xf32, #tpu.memory_space<vmem>>, vector<2x128xf32>
    %c18 = arith.constant 18 : index
    %c0_434 = arith.constant 0 : index
    %535 = vector.load %arg34[%c18, %c0_434] : memref<36x128xf32, #tpu.memory_space<vmem>>, vector<2x128xf32>
    %536 = arith.addf %534, %535 : vector<2x128xf32>
    %c28_435 = arith.constant 28 : index
    %c0_436 = arith.constant 0 : index
    %537 = vector.load %arg33[%c28_435, %c0_436] : memref<36x128xf32, #tpu.memory_space<vmem>>, vector<2x128xf32>
    %c30 = arith.constant 30 : index
    %c0_437 = arith.constant 0 : index
    %538 = vector.load %arg34[%c30, %c0_437] : memref<36x128xf32, #tpu.memory_space<vmem>>, vector<2x128xf32>
    %539 = arith.addf %537, %538 : vector<2x128xf32>
    %cst_438 = arith.constant dense<0.000000e+00> : vector<2x128xf32>
    %540 = tpu.matmul %529, %454, %cst_438 {dimension_numbers = #tpu.dot_dimension_numbers<[1], [0], [0], [1], [0, 0, 1, 1], [], []>} : vector<2x128xf32>, vector<128x128xf32>, vector<2x128xf32> -> vector<2x128xf32>
    %cst_439 = arith.constant dense<0.000000e+00> : vector<2x128xf32>
    %541 = tpu.matmul %529, %456, %cst_439 {dimension_numbers = #tpu.dot_dimension_numbers<[1], [0], [0], [1], [0, 0, 1, 1], [], []>} : vector<2x128xf32>, vector<128x128xf32>, vector<2x128xf32> -> vector<2x128xf32>
    %cst_440 = arith.constant dense<0.000000e+00> : vector<2x128xf32>
    %542 = tpu.matmul %529, %458, %cst_440 {dimension_numbers = #tpu.dot_dimension_numbers<[1], [0], [0], [1], [0, 0, 1, 1], [], []>} : vector<2x128xf32>, vector<128x128xf32>, vector<2x128xf32> -> vector<2x128xf32>
    %543 = arith.addf %542, %461 : vector<2x128xf32>
    %544 = arith.addf %533, %540 : vector<2x128xf32>
    %545 = arith.negf %544 : vector<2x128xf32>
    %546 = math.exp %545 : vector<2x128xf32>
    %cst_441 = arith.constant 1.000000e+00 : f32
    %547 = vector.broadcast %cst_441 : f32 to vector<2x128xf32>
    %548 = arith.addf %547, %546 : vector<2x128xf32>
    %549 = arith.divf %547, %548 : vector<2x128xf32>
    %550 = arith.addf %536, %541 : vector<2x128xf32>
    %551 = arith.negf %550 : vector<2x128xf32>
    %552 = math.exp %551 : vector<2x128xf32>
    %cst_442 = arith.constant 1.000000e+00 : f32
    %553 = vector.broadcast %cst_442 : f32 to vector<2x128xf32>
    %554 = arith.addf %553, %552 : vector<2x128xf32>
    %555 = arith.divf %553, %554 : vector<2x128xf32>
    %556 = arith.mulf %549, %543 : vector<2x128xf32>
    %557 = arith.addf %539, %556 : vector<2x128xf32>
    %558 = math.tanh %557 : vector<2x128xf32>
    %cst_443 = arith.constant 1.000000e+00 : f32
    %559 = vector.broadcast %cst_443 : f32 to vector<2x128xf32>
    %560 = arith.subf %559, %555 : vector<2x128xf32>
    %561 = arith.mulf %560, %558 : vector<2x128xf32>
    %562 = arith.mulf %555, %529 : vector<2x128xf32>
    %563 = arith.addf %561, %562 : vector<2x128xf32>
    %c4_444 = arith.constant 4 : index
    %c0_445 = arith.constant 0 : index
    %564 = vector.load %arg35[%c4_444, %c0_445] : memref<12x128xf32, #tpu.memory_space<vmem>>, vector<2x128xf32>
    tpu.vector_store %arg35[%c4_444, %c0_445], %563 {strides = array<i32>} : memref<12x128xf32, #tpu.memory_space<vmem>>, vector<2x128xf32>,
    %c6_446 = arith.constant 6 : index
    %c0_447 = arith.constant 0 : index
    %565 = vector.load %arg33[%c6_446, %c0_447] : memref<36x128xf32, #tpu.memory_space<vmem>>, vector<2x128xf32>
    %c4_448 = arith.constant 4 : index
    %c0_449 = arith.constant 0 : index
    %566 = vector.load %arg34[%c4_448, %c0_449] : memref<36x128xf32, #tpu.memory_space<vmem>>, vector<2x128xf32>
    %567 = arith.addf %565, %566 : vector<2x128xf32>
    %c18_450 = arith.constant 18 : index
    %c0_451 = arith.constant 0 : index
    %568 = vector.load %arg33[%c18_450, %c0_451] : memref<36x128xf32, #tpu.memory_space<vmem>>, vector<2x128xf32>
    %c16_452 = arith.constant 16 : index
    %c0_453 = arith.constant 0 : index
    %569 = vector.load %arg34[%c16_452, %c0_453] : memref<36x128xf32, #tpu.memory_space<vmem>>, vector<2x128xf32>
    %570 = arith.addf %568, %569 : vector<2x128xf32>
    %c30_454 = arith.constant 30 : index
    %c0_455 = arith.constant 0 : index
    %571 = vector.load %arg33[%c30_454, %c0_455] : memref<36x128xf32, #tpu.memory_space<vmem>>, vector<2x128xf32>
    %c28_456 = arith.constant 28 : index
    %c0_457 = arith.constant 0 : index
    %572 = vector.load %arg34[%c28_456, %c0_457] : memref<36x128xf32, #tpu.memory_space<vmem>>, vector<2x128xf32>
    %573 = arith.addf %571, %572 : vector<2x128xf32>
    %cst_458 = arith.constant dense<0.000000e+00> : vector<2x128xf32>
    %574 = tpu.matmul %563, %454, %cst_458 {dimension_numbers = #tpu.dot_dimension_numbers<[1], [0], [0], [1], [0, 0, 1, 1], [], []>} : vector<2x128xf32>, vector<128x128xf32>, vector<2x128xf32> -> vector<2x128xf32>
    %cst_459 = arith.constant dense<0.000000e+00> : vector<2x128xf32>
    %575 = tpu.matmul %563, %456, %cst_459 {dimension_numbers = #tpu.dot_dimension_numbers<[1], [0], [0], [1], [0, 0, 1, 1], [], []>} : vector<2x128xf32>, vector<128x128xf32>, vector<2x128xf32> -> vector<2x128xf32>
    %cst_460 = arith.constant dense<0.000000e+00> : vector<2x128xf32>
    %576 = tpu.matmul %563, %458, %cst_460 {dimension_numbers = #tpu.dot_dimension_numbers<[1], [0], [0], [1], [0, 0, 1, 1], [], []>} : vector<2x128xf32>, vector<128x128xf32>, vector<2x128xf32> -> vector<2x128xf32>
    %577 = arith.addf %576, %461 : vector<2x128xf32>
    %578 = arith.addf %567, %574 : vector<2x128xf32>
    %579 = arith.negf %578 : vector<2x128xf32>
    %580 = math.exp %579 : vector<2x128xf32>
    %cst_461 = arith.constant 1.000000e+00 : f32
    %581 = vector.broadcast %cst_461 : f32 to vector<2x128xf32>
    %582 = arith.addf %581, %580 : vector<2x128xf32>
    %583 = arith.divf %581, %582 : vector<2x128xf32>
    %584 = arith.addf %570, %575 : vector<2x128xf32>
    %585 = arith.negf %584 : vector<2x128xf32>
    %586 = math.exp %585 : vector<2x128xf32>
    %cst_462 = arith.constant 1.000000e+00 : f32
    %587 = vector.broadcast %cst_462 : f32 to vector<2x128xf32>
    %588 = arith.addf %587, %586 : vector<2x128xf32>
    %589 = arith.divf %587, %588 : vector<2x128xf32>
    %590 = arith.mulf %583, %577 : vector<2x128xf32>
    %591 = arith.addf %573, %590 : vector<2x128xf32>
    %592 = math.tanh %591 : vector<2x128xf32>
    %cst_463 = arith.constant 1.000000e+00 : f32
    %593 = vector.broadcast %cst_463 : f32 to vector<2x128xf32>
    %594 = arith.subf %593, %589 : vector<2x128xf32>
    %595 = arith.mulf %594, %592 : vector<2x128xf32>
    %596 = arith.mulf %589, %563 : vector<2x128xf32>
    %597 = arith.addf %595, %596 : vector<2x128xf32>
    %c6_464 = arith.constant 6 : index
    %c0_465 = arith.constant 0 : index
    %598 = vector.load %arg35[%c6_464, %c0_465] : memref<12x128xf32, #tpu.memory_space<vmem>>, vector<2x128xf32>
    tpu.vector_store %arg35[%c6_464, %c0_465], %597 {strides = array<i32>} : memref<12x128xf32, #tpu.memory_space<vmem>>, vector<2x128xf32>,
    %c8_466 = arith.constant 8 : index
    %c0_467 = arith.constant 0 : index
    %599 = vector.load %arg33[%c8_466, %c0_467] : memref<36x128xf32, #tpu.memory_space<vmem>>, vector<2x128xf32>
    %c2_468 = arith.constant 2 : index
    %c0_469 = arith.constant 0 : index
    %600 = vector.load %arg34[%c2_468, %c0_469] : memref<36x128xf32, #tpu.memory_space<vmem>>, vector<2x128xf32>
    %601 = arith.addf %599, %600 : vector<2x128xf32>
    %c20_470 = arith.constant 20 : index
    %c0_471 = arith.constant 0 : index
    %602 = vector.load %arg33[%c20_470, %c0_471] : memref<36x128xf32, #tpu.memory_space<vmem>>, vector<2x128xf32>
    %c14_472 = arith.constant 14 : index
    %c0_473 = arith.constant 0 : index
    %603 = vector.load %arg34[%c14_472, %c0_473] : memref<36x128xf32, #tpu.memory_space<vmem>>, vector<2x128xf32>
    %604 = arith.addf %602, %603 : vector<2x128xf32>
    %c32_474 = arith.constant 32 : index
    %c0_475 = arith.constant 0 : index
    %605 = vector.load %arg33[%c32_474, %c0_475] : memref<36x128xf32, #tpu.memory_space<vmem>>, vector<2x128xf32>
    %c26_476 = arith.constant 26 : index
    %c0_477 = arith.constant 0 : index
    %606 = vector.load %arg34[%c26_476, %c0_477] : memref<36x128xf32, #tpu.memory_space<vmem>>, vector<2x128xf32>
    %607 = arith.addf %605, %606 : vector<2x128xf32>
    %cst_478 = arith.constant dense<0.000000e+00> : vector<2x128xf32>
    %608 = tpu.matmul %597, %454, %cst_478 {dimension_numbers = #tpu.dot_dimension_numbers<[1], [0], [0], [1], [0, 0, 1, 1], [], []>} : vector<2x128xf32>, vector<128x128xf32>, vector<2x128xf32> -> vector<2x128xf32>
    %cst_479 = arith.constant dense<0.000000e+00> : vector<2x128xf32>
    %609 = tpu.matmul %597, %456, %cst_479 {dimension_numbers = #tpu.dot_dimension_numbers<[1], [0], [0], [1], [0, 0, 1, 1], [], []>} : vector<2x128xf32>, vector<128x128xf32>, vector<2x128xf32> -> vector<2x128xf32>
    %cst_480 = arith.constant dense<0.000000e+00> : vector<2x128xf32>
    %610 = tpu.matmul %597, %458, %cst_480 {dimension_numbers = #tpu.dot_dimension_numbers<[1], [0], [0], [1], [0, 0, 1, 1], [], []>} : vector<2x128xf32>, vector<128x128xf32>, vector<2x128xf32> -> vector<2x128xf32>
    %611 = arith.addf %610, %461 : vector<2x128xf32>
    %612 = arith.addf %601, %608 : vector<2x128xf32>
    %613 = arith.negf %612 : vector<2x128xf32>
    %614 = math.exp %613 : vector<2x128xf32>
    %cst_481 = arith.constant 1.000000e+00 : f32
    %615 = vector.broadcast %cst_481 : f32 to vector<2x128xf32>
    %616 = arith.addf %615, %614 : vector<2x128xf32>
    %617 = arith.divf %615, %616 : vector<2x128xf32>
    %618 = arith.addf %604, %609 : vector<2x128xf32>
    %619 = arith.negf %618 : vector<2x128xf32>
    %620 = math.exp %619 : vector<2x128xf32>
    %cst_482 = arith.constant 1.000000e+00 : f32
    %621 = vector.broadcast %cst_482 : f32 to vector<2x128xf32>
    %622 = arith.addf %621, %620 : vector<2x128xf32>
    %623 = arith.divf %621, %622 : vector<2x128xf32>
    %624 = arith.mulf %617, %611 : vector<2x128xf32>
    %625 = arith.addf %607, %624 : vector<2x128xf32>
    %626 = math.tanh %625 : vector<2x128xf32>
    %cst_483 = arith.constant 1.000000e+00 : f32
    %627 = vector.broadcast %cst_483 : f32 to vector<2x128xf32>
    %628 = arith.subf %627, %623 : vector<2x128xf32>
    %629 = arith.mulf %628, %626 : vector<2x128xf32>
    %630 = arith.mulf %623, %597 : vector<2x128xf32>
    %631 = arith.addf %629, %630 : vector<2x128xf32>
    %c8_484 = arith.constant 8 : index
    %c0_485 = arith.constant 0 : index
    %632 = vector.load %arg35[%c8_484, %c0_485] : memref<12x128xf32, #tpu.memory_space<vmem>>, vector<2x128xf32>
    tpu.vector_store %arg35[%c8_484, %c0_485], %631 {strides = array<i32>} : memref<12x128xf32, #tpu.memory_space<vmem>>, vector<2x128xf32>,
    %c10_486 = arith.constant 10 : index
    %c0_487 = arith.constant 0 : index
    %633 = vector.load %arg33[%c10_486, %c0_487] : memref<36x128xf32, #tpu.memory_space<vmem>>, vector<2x128xf32>
    %c0_488 = arith.constant 0 : index
    %c0_489 = arith.constant 0 : index
    %634 = vector.load %arg34[%c0_488, %c0_489] : memref<36x128xf32, #tpu.memory_space<vmem>>, vector<2x128xf32>
    %635 = arith.addf %633, %634 : vector<2x128xf32>
    %c22_490 = arith.constant 22 : index
    %c0_491 = arith.constant 0 : index
    %636 = vector.load %arg33[%c22_490, %c0_491] : memref<36x128xf32, #tpu.memory_space<vmem>>, vector<2x128xf32>
    %c12_492 = arith.constant 12 : index
    %c0_493 = arith.constant 0 : index
    %637 = vector.load %arg34[%c12_492, %c0_493] : memref<36x128xf32, #tpu.memory_space<vmem>>, vector<2x128xf32>
    %638 = arith.addf %636, %637 : vector<2x128xf32>
    %c34_494 = arith.constant 34 : index
    %c0_495 = arith.constant 0 : index
    %639 = vector.load %arg33[%c34_494, %c0_495] : memref<36x128xf32, #tpu.memory_space<vmem>>, vector<2x128xf32>
    %c24_496 = arith.constant 24 : index
    %c0_497 = arith.constant 0 : index
    %640 = vector.load %arg34[%c24_496, %c0_497] : memref<36x128xf32, #tpu.memory_space<vmem>>, vector<2x128xf32>
    %641 = arith.addf %639, %640 : vector<2x128xf32>
    %cst_498 = arith.constant dense<0.000000e+00> : vector<2x128xf32>
    %642 = tpu.matmul %631, %454, %cst_498 {dimension_numbers = #tpu.dot_dimension_numbers<[1], [0], [0], [1], [0, 0, 1, 1], [], []>} : vector<2x128xf32>, vector<128x128xf32>, vector<2x128xf32> -> vector<2x128xf32>
    %cst_499 = arith.constant dense<0.000000e+00> : vector<2x128xf32>
    %643 = tpu.matmul %631, %456, %cst_499 {dimension_numbers = #tpu.dot_dimension_numbers<[1], [0], [0], [1], [0, 0, 1, 1], [], []>} : vector<2x128xf32>, vector<128x128xf32>, vector<2x128xf32> -> vector<2x128xf32>
    %cst_500 = arith.constant dense<0.000000e+00> : vector<2x128xf32>
    %644 = tpu.matmul %631, %458, %cst_500 {dimension_numbers = #tpu.dot_dimension_numbers<[1], [0], [0], [1], [0, 0, 1, 1], [], []>} : vector<2x128xf32>, vector<128x128xf32>, vector<2x128xf32> -> vector<2x128xf32>
    %645 = arith.addf %644, %461 : vector<2x128xf32>
    %646 = arith.addf %635, %642 : vector<2x128xf32>
    %647 = arith.negf %646 : vector<2x128xf32>
    %648 = math.exp %647 : vector<2x128xf32>
    %cst_501 = arith.constant 1.000000e+00 : f32
    %649 = vector.broadcast %cst_501 : f32 to vector<2x128xf32>
    %650 = arith.addf %649, %648 : vector<2x128xf32>
    %651 = arith.divf %649, %650 : vector<2x128xf32>
    %652 = arith.addf %638, %643 : vector<2x128xf32>
    %653 = arith.negf %652 : vector<2x128xf32>
    %654 = math.exp %653 : vector<2x128xf32>
    %cst_502 = arith.constant 1.000000e+00 : f32
    %655 = vector.broadcast %cst_502 : f32 to vector<2x128xf32>
    %656 = arith.addf %655, %654 : vector<2x128xf32>
    %657 = arith.divf %655, %656 : vector<2x128xf32>
    %658 = arith.mulf %651, %645 : vector<2x128xf32>
    %659 = arith.addf %641, %658 : vector<2x128xf32>
    %660 = math.tanh %659 : vector<2x128xf32>
    %cst_503 = arith.constant 1.000000e+00 : f32
    %661 = vector.broadcast %cst_503 : f32 to vector<2x128xf32>
    %662 = arith.subf %661, %657 : vector<2x128xf32>
    %663 = arith.mulf %662, %660 : vector<2x128xf32>
    %664 = arith.mulf %657, %631 : vector<2x128xf32>
    %665 = arith.addf %663, %664 : vector<2x128xf32>
    %c10_504 = arith.constant 10 : index
    %c0_505 = arith.constant 0 : index
    %666 = vector.load %arg35[%c10_504, %c0_505] : memref<12x128xf32, #tpu.memory_space<vmem>>, vector<2x128xf32>
    tpu.vector_store %arg35[%c10_504, %c0_505], %665 {strides = array<i32>} : memref<12x128xf32, #tpu.memory_space<vmem>>, vector<2x128xf32>,
    %667 = tpu.iota {dimensions = array<i32: 1>} : vector<2x128xi32>
    %c64_i32_506 = arith.constant 64 : i32
    %668 = vector.broadcast %c64_i32_506 : i32 to vector<2x128xi32>
    %669 = arith.cmpi slt, %667, %668 : vector<2x128xi32>
    %c0_507 = arith.constant 0 : index
    %c0_508 = arith.constant 0 : index
    %670 = vector.load %arg35[%c0_507, %c0_508] : memref<12x128xf32, #tpu.memory_space<vmem>>, vector<2x128xf32>
    %c10_509 = arith.constant 10 : index
    %c0_510 = arith.constant 0 : index
    %671 = vector.load %arg35[%c10_509, %c0_510] : memref<12x128xf32, #tpu.memory_space<vmem>>, vector<2x128xf32>
    %672 = arith.select %669, %670, %671 : vector<2x128xi1>, vector<2x128xf32>
    %c0_511 = arith.constant 0 : index
    %c0_512 = arith.constant 0 : index
    %673 = vector.load %arg37[%c0_511, %c0_512] : memref<12x128xf32, #tpu.memory_space<vmem>>, vector<2x128xf32>
    tpu.vector_store %arg37[%c0_511, %c0_512], %672 {strides = array<i32>} : memref<12x128xf32, #tpu.memory_space<vmem>>, vector<2x128xf32>,
    %c2_513 = arith.constant 2 : index
    %c0_514 = arith.constant 0 : index
    %674 = vector.load %arg35[%c2_513, %c0_514] : memref<12x128xf32, #tpu.memory_space<vmem>>, vector<2x128xf32>
    %c8_515 = arith.constant 8 : index
    %c0_516 = arith.constant 0 : index
    %675 = vector.load %arg35[%c8_515, %c0_516] : memref<12x128xf32, #tpu.memory_space<vmem>>, vector<2x128xf32>
    %676 = arith.select %669, %674, %675 : vector<2x128xi1>, vector<2x128xf32>
    %c2_517 = arith.constant 2 : index
    %c0_518 = arith.constant 0 : index
    %677 = vector.load %arg37[%c2_517, %c0_518] : memref<12x128xf32, #tpu.memory_space<vmem>>, vector<2x128xf32>
    tpu.vector_store %arg37[%c2_517, %c0_518], %676 {strides = array<i32>} : memref<12x128xf32, #tpu.memory_space<vmem>>, vector<2x128xf32>,
    %c4_519 = arith.constant 4 : index
    %c0_520 = arith.constant 0 : index
    %678 = vector.load %arg35[%c4_519, %c0_520] : memref<12x128xf32, #tpu.memory_space<vmem>>, vector<2x128xf32>
    %c6_521 = arith.constant 6 : index
    %c0_522 = arith.constant 0 : index
    %679 = vector.load %arg35[%c6_521, %c0_522] : memref<12x128xf32, #tpu.memory_space<vmem>>, vector<2x128xf32>
    %680 = arith.select %669, %678, %679 : vector<2x128xi1>, vector<2x128xf32>
    %c4_523 = arith.constant 4 : index
    %c0_524 = arith.constant 0 : index
    %681 = vector.load %arg37[%c4_523, %c0_524] : memref<12x128xf32, #tpu.memory_space<vmem>>, vector<2x128xf32>
    tpu.vector_store %arg37[%c4_523, %c0_524], %680 {strides = array<i32>} : memref<12x128xf32, #tpu.memory_space<vmem>>, vector<2x128xf32>,
    %c6_525 = arith.constant 6 : index
    %c0_526 = arith.constant 0 : index
    %682 = vector.load %arg35[%c6_525, %c0_526] : memref<12x128xf32, #tpu.memory_space<vmem>>, vector<2x128xf32>
    %c4_527 = arith.constant 4 : index
    %c0_528 = arith.constant 0 : index
    %683 = vector.load %arg35[%c4_527, %c0_528] : memref<12x128xf32, #tpu.memory_space<vmem>>, vector<2x128xf32>
    %684 = arith.select %669, %682, %683 : vector<2x128xi1>, vector<2x128xf32>
    %c6_529 = arith.constant 6 : index
    %c0_530 = arith.constant 0 : index
    %685 = vector.load %arg37[%c6_529, %c0_530] : memref<12x128xf32, #tpu.memory_space<vmem>>, vector<2x128xf32>
    tpu.vector_store %arg37[%c6_529, %c0_530], %684 {strides = array<i32>} : memref<12x128xf32, #tpu.memory_space<vmem>>, vector<2x128xf32>,
    %c8_531 = arith.constant 8 : index
    %c0_532 = arith.constant 0 : index
    %686 = vector.load %arg35[%c8_531, %c0_532] : memref<12x128xf32, #tpu.memory_space<vmem>>, vector<2x128xf32>
    %c2_533 = arith.constant 2 : index
    %c0_534 = arith.constant 0 : index
    %687 = vector.load %arg35[%c2_533, %c0_534] : memref<12x128xf32, #tpu.memory_space<vmem>>, vector<2x128xf32>
    %688 = arith.select %669, %686, %687 : vector<2x128xi1>, vector<2x128xf32>
    %c8_535 = arith.constant 8 : index
    %c0_536 = arith.constant 0 : index
    %689 = vector.load %arg37[%c8_535, %c0_536] : memref<12x128xf32, #tpu.memory_space<vmem>>, vector<2x128xf32>
    tpu.vector_store %arg37[%c8_535, %c0_536], %688 {strides = array<i32>} : memref<12x128xf32, #tpu.memory_space<vmem>>, vector<2x128xf32>,
    %c10_537 = arith.constant 10 : index
    %c0_538 = arith.constant 0 : index
    %690 = vector.load %arg35[%c10_537, %c0_538] : memref<12x128xf32, #tpu.memory_space<vmem>>, vector<2x128xf32>
    %c0_539 = arith.constant 0 : index
    %c0_540 = arith.constant 0 : index
    %691 = vector.load %arg35[%c0_539, %c0_540] : memref<12x128xf32, #tpu.memory_space<vmem>>, vector<2x128xf32>
    %692 = arith.select %669, %690, %691 : vector<2x128xi1>, vector<2x128xf32>
    %c10_541 = arith.constant 10 : index
    %c0_542 = arith.constant 0 : index
    %693 = vector.load %arg37[%c10_541, %c0_542] : memref<12x128xf32, #tpu.memory_space<vmem>>, vector<2x128xf32>
    tpu.vector_store %arg37[%c10_541, %c0_542], %692 {strides = array<i32>} : memref<12x128xf32, #tpu.memory_space<vmem>>, vector<2x128xf32>,
    %c0_543 = arith.constant 0 : index
    %c0_544 = arith.constant 0 : index
    %694 = tpu.strided_load %arg37[%c0_543, %c0_544] {strides = array<i32: 2, 1>} : memref<12x128xf32, #tpu.memory_space<vmem>>, vector<6x128xf32>
    %c0_545 = arith.constant 0 : index
    %c0_546 = arith.constant 0 : index
    %695 = vector.load %arg19[%c0_545, %c0_546] : memref<1x128xf32, #tpu.memory_space<vmem>>, vector<1x128xf32>
    %696 = vector.broadcast %695 : vector<1x128xf32> to vector<6x128xf32>
    %697 = arith.mulf %694, %696 : vector<6x128xf32>
    %cst_547 = arith.constant dense<0.000000e+00> : vector<6xf32>
    %698 = vector.multi_reduction <add>, %697, %cst_547 [1] : vector<6x128xf32> to vector<6xf32>
    %699 = vector.shape_cast %698 : vector<6xf32> to vector<6x1xf32>
    %c0_548 = arith.constant 0 : index
    %c0_549 = arith.constant 0 : index
    %700 = vector.load %arg20[%c0_548, %c0_549] : memref<1x1xf32, #tpu.memory_space<vmem>>, vector<1x1xf32>
    %701 = vector.broadcast %700 : vector<1x1xf32> to vector<6x1xf32>
    %702 = arith.addf %699, %701 : vector<6x1xf32>
    %cst_550 = arith.constant dense<0xFF800000> : vector<1xf32>
    %703 = vector.multi_reduction <maximumf>, %702, %cst_550 [0] : vector<6x1xf32> to vector<1xf32>
    %704 = vector.shape_cast %703 : vector<1xf32> to vector<1x1xf32>
    %705 = vector.broadcast %704 : vector<1x1xf32> to vector<6x1xf32>
    %706 = arith.subf %702, %705 : vector<6x1xf32>
    %707 = math.exp %706 : vector<6x1xf32>
    %cst_551 = arith.constant dense<0.000000e+00> : vector<1xf32>
    %708 = vector.multi_reduction <add>, %707, %cst_551 [0] : vector<6x1xf32> to vector<1xf32>
    %709 = vector.shape_cast %708 : vector<1xf32> to vector<1x1xf32>
    %710 = vector.broadcast %709 : vector<1x1xf32> to vector<6x1xf32>
    %711 = arith.divf %707, %710 : vector<6x1xf32>
    %712 = vector.broadcast %711 : vector<6x1xf32> to vector<6x128xf32>
    %713 = arith.mulf %694, %712 : vector<6x128xf32>
    %cst_552 = arith.constant dense<0.000000e+00> : vector<128xf32>
    %714 = vector.multi_reduction <add>, %713, %cst_552 [0] : vector<6x128xf32> to vector<128xf32>
    %715 = vector.shape_cast %714 : vector<128xf32> to vector<1x128xf32>
    %c0_553 = arith.constant 0 : index
    %c0_554 = arith.constant 0 : index
    %716 = vector.load %arg21[%c0_553, %c0_554] : memref<128x64xf32, #tpu.memory_space<vmem>>, vector<128x64xf32>
    %cst_555 = arith.constant dense<0.000000e+00> : vector<1x64xf32>
    %717 = tpu.matmul %715, %716, %cst_555 {dimension_numbers = #tpu.dot_dimension_numbers<[1], [0], [0], [1], [0, 0, 1, 1], [], []>} : vector<1x128xf32>, vector<128x64xf32>, vector<1x64xf32> -> vector<1x64xf32>
    %c0_556 = arith.constant 0 : index
    %c0_557 = arith.constant 0 : index
    %718 = vector.load %arg22[%c0_556, %c0_557] : memref<1x64xf32, #tpu.memory_space<vmem>>, vector<1x64xf32>
    %719 = arith.mulf %717, %718 : vector<1x64xf32>
    %c0_558 = arith.constant 0 : index
    %c0_559 = arith.constant 0 : index
    %720 = vector.load %arg23[%c0_558, %c0_559] : memref<1x64xf32, #tpu.memory_space<vmem>>, vector<1x64xf32>
    %721 = arith.addf %719, %720 : vector<1x64xf32>
    %cst_560 = arith.constant 0.000000e+00 : f32
    %722 = vector.broadcast %cst_560 : f32 to vector<1x64xf32>
    %723 = arith.maximumf %721, %722 : vector<1x64xf32>
    %c0_561 = arith.constant 0 : index
    %c0_562 = arith.constant 0 : index
    %724 = vector.load %arg24[%c0_561, %c0_562] : memref<64x32xf32, #tpu.memory_space<vmem>>, vector<64x32xf32>
    %cst_563 = arith.constant dense<0.000000e+00> : vector<1x32xf32>
    %725 = tpu.matmul %723, %724, %cst_563 {dimension_numbers = #tpu.dot_dimension_numbers<[1], [0], [0], [1], [0, 0, 1, 1], [], []>} : vector<1x64xf32>, vector<64x32xf32>, vector<1x32xf32> -> vector<1x32xf32>
    %c0_564 = arith.constant 0 : index
    %c0_565 = arith.constant 0 : index
    %726 = vector.load %arg25[%c0_564, %c0_565] : memref<1x32xf32, #tpu.memory_space<vmem>>, vector<1x32xf32>
    %727 = arith.mulf %725, %726 : vector<1x32xf32>
    %c0_566 = arith.constant 0 : index
    %c0_567 = arith.constant 0 : index
    %728 = vector.load %arg26[%c0_566, %c0_567] : memref<1x32xf32, #tpu.memory_space<vmem>>, vector<1x32xf32>
    %729 = arith.addf %727, %728 : vector<1x32xf32>
    %cst_568 = arith.constant 0.000000e+00 : f32
    %730 = vector.broadcast %cst_568 : f32 to vector<1x32xf32>
    %731 = arith.maximumf %729, %730 : vector<1x32xf32>
    %c0_569 = arith.constant 0 : index
    %c0_570 = arith.constant 0 : index
    %732 = vector.load %arg27[%c0_569, %c0_570] : memref<32x1xf32, #tpu.memory_space<vmem>>, vector<32x1xf32>
    %cst_571 = arith.constant dense<0.000000e+00> : vector<1x1xf32>
    %733 = tpu.matmul %731, %732, %cst_571 {dimension_numbers = #tpu.dot_dimension_numbers<[1], [0], [0], [1], [0, 0, 1, 1], [], []>} : vector<1x32xf32>, vector<32x1xf32>, vector<1x1xf32> -> vector<1x1xf32>
    %c0_572 = arith.constant 0 : index
    %c0_573 = arith.constant 0 : index
    %734 = vector.load %arg28[%c0_572, %c0_573] : memref<1x1xf32, #tpu.memory_space<vmem>>, vector<1x1xf32>
    %735 = arith.addf %733, %734 : vector<1x1xf32>
    %c0_574 = arith.constant 0 : index
    %c0_575 = arith.constant 0 : index
    %736 = vector.load %arg29[%c0_574, %c0_575] : memref<2x1xf32, #tpu.memory_space<vmem>>, vector<1x1xf32>
    tpu.vector_store %arg29[%c0_574, %c0_575], %735 {strides = array<i32>} : memref<2x1xf32, #tpu.memory_space<vmem>>, vector<1x1xf32>,
    %c1_576 = arith.constant 1 : index
    %c0_577 = arith.constant 0 : index
    %737 = tpu.strided_load %arg37[%c1_576, %c0_577] {strides = array<i32: 2, 1>} : memref<12x128xf32, #tpu.memory_space<vmem>>, vector<6x128xf32>
    %c0_578 = arith.constant 0 : index
    %c0_579 = arith.constant 0 : index
    %738 = vector.load %arg19[%c0_578, %c0_579] : memref<1x128xf32, #tpu.memory_space<vmem>>, vector<1x128xf32>
    %739 = vector.broadcast %738 : vector<1x128xf32> to vector<6x128xf32>
    %740 = arith.mulf %737, %739 : vector<6x128xf32>
    %cst_580 = arith.constant dense<0.000000e+00> : vector<6xf32>
    %741 = vector.multi_reduction <add>, %740, %cst_580 [1] : vector<6x128xf32> to vector<6xf32>
    %742 = vector.shape_cast %741 : vector<6xf32> to vector<6x1xf32>
    %c0_581 = arith.constant 0 : index
    %c0_582 = arith.constant 0 : index
    %743 = vector.load %arg20[%c0_581, %c0_582] : memref<1x1xf32, #tpu.memory_space<vmem>>, vector<1x1xf32>
    %744 = vector.broadcast %743 : vector<1x1xf32> to vector<6x1xf32>
    %745 = arith.addf %742, %744 : vector<6x1xf32>
    %cst_583 = arith.constant dense<0xFF800000> : vector<1xf32>
    %746 = vector.multi_reduction <maximumf>, %745, %cst_583 [0] : vector<6x1xf32> to vector<1xf32>
    %747 = vector.shape_cast %746 : vector<1xf32> to vector<1x1xf32>
    %748 = vector.broadcast %747 : vector<1x1xf32> to vector<6x1xf32>
    %749 = arith.subf %745, %748 : vector<6x1xf32>
    %750 = math.exp %749 : vector<6x1xf32>
    %cst_584 = arith.constant dense<0.000000e+00> : vector<1xf32>
    %751 = vector.multi_reduction <add>, %750, %cst_584 [0] : vector<6x1xf32> to vector<1xf32>
    %752 = vector.shape_cast %751 : vector<1xf32> to vector<1x1xf32>
    %753 = vector.broadcast %752 : vector<1x1xf32> to vector<6x1xf32>
    %754 = arith.divf %750, %753 : vector<6x1xf32>
    %755 = vector.broadcast %754 : vector<6x1xf32> to vector<6x128xf32>
    %756 = arith.mulf %737, %755 : vector<6x128xf32>
    %cst_585 = arith.constant dense<0.000000e+00> : vector<128xf32>
    %757 = vector.multi_reduction <add>, %756, %cst_585 [0] : vector<6x128xf32> to vector<128xf32>
    %758 = vector.shape_cast %757 : vector<128xf32> to vector<1x128xf32>
    %c0_586 = arith.constant 0 : index
    %c0_587 = arith.constant 0 : index
    %759 = vector.load %arg21[%c0_586, %c0_587] : memref<128x64xf32, #tpu.memory_space<vmem>>, vector<128x64xf32>
    %cst_588 = arith.constant dense<0.000000e+00> : vector<1x64xf32>
    %760 = tpu.matmul %758, %759, %cst_588 {dimension_numbers = #tpu.dot_dimension_numbers<[1], [0], [0], [1], [0, 0, 1, 1], [], []>} : vector<1x128xf32>, vector<128x64xf32>, vector<1x64xf32> -> vector<1x64xf32>
    %c0_589 = arith.constant 0 : index
    %c0_590 = arith.constant 0 : index
    %761 = vector.load %arg22[%c0_589, %c0_590] : memref<1x64xf32, #tpu.memory_space<vmem>>, vector<1x64xf32>
    %762 = arith.mulf %760, %761 : vector<1x64xf32>
    %c0_591 = arith.constant 0 : index
    %c0_592 = arith.constant 0 : index
    %763 = vector.load %arg23[%c0_591, %c0_592] : memref<1x64xf32, #tpu.memory_space<vmem>>, vector<1x64xf32>
    %764 = arith.addf %762, %763 : vector<1x64xf32>
    %cst_593 = arith.constant 0.000000e+00 : f32
    %765 = vector.broadcast %cst_593 : f32 to vector<1x64xf32>
    %766 = arith.maximumf %764, %765 : vector<1x64xf32>
    %c0_594 = arith.constant 0 : index
    %c0_595 = arith.constant 0 : index
    %767 = vector.load %arg24[%c0_594, %c0_595] : memref<64x32xf32, #tpu.memory_space<vmem>>, vector<64x32xf32>
    %cst_596 = arith.constant dense<0.000000e+00> : vector<1x32xf32>
    %768 = tpu.matmul %766, %767, %cst_596 {dimension_numbers = #tpu.dot_dimension_numbers<[1], [0], [0], [1], [0, 0, 1, 1], [], []>} : vector<1x64xf32>, vector<64x32xf32>, vector<1x32xf32> -> vector<1x32xf32>
    %c0_597 = arith.constant 0 : index
    %c0_598 = arith.constant 0 : index
    %769 = vector.load %arg25[%c0_597, %c0_598] : memref<1x32xf32, #tpu.memory_space<vmem>>, vector<1x32xf32>
    %770 = arith.mulf %768, %769 : vector<1x32xf32>
    %c0_599 = arith.constant 0 : index
    %c0_600 = arith.constant 0 : index
    %771 = vector.load %arg26[%c0_599, %c0_600] : memref<1x32xf32, #tpu.memory_space<vmem>>, vector<1x32xf32>
    %772 = arith.addf %770, %771 : vector<1x32xf32>
    %cst_601 = arith.constant 0.000000e+00 : f32
    %773 = vector.broadcast %cst_601 : f32 to vector<1x32xf32>
    %774 = arith.maximumf %772, %773 : vector<1x32xf32>
    %c0_602 = arith.constant 0 : index
    %c0_603 = arith.constant 0 : index
    %775 = vector.load %arg27[%c0_602, %c0_603] : memref<32x1xf32, #tpu.memory_space<vmem>>, vector<32x1xf32>
    %cst_604 = arith.constant dense<0.000000e+00> : vector<1x1xf32>
    %776 = tpu.matmul %774, %775, %cst_604 {dimension_numbers = #tpu.dot_dimension_numbers<[1], [0], [0], [1], [0, 0, 1, 1], [], []>} : vector<1x32xf32>, vector<32x1xf32>, vector<1x1xf32> -> vector<1x1xf32>
    %c0_605 = arith.constant 0 : index
    %c0_606 = arith.constant 0 : index
    %777 = vector.load %arg28[%c0_605, %c0_606] : memref<1x1xf32, #tpu.memory_space<vmem>>, vector<1x1xf32>
    %778 = arith.addf %776, %777 : vector<1x1xf32>
    %c1_607 = arith.constant 1 : index
    %c0_608 = arith.constant 0 : index
    %779 = vector.load %arg29[%c1_607, %c0_608] : memref<2x1xf32, #tpu.memory_space<vmem>>, vector<1x1xf32>
    tpu.vector_store %arg29[%c1_607, %c0_608], %778 {strides = array<i32>} : memref<2x1xf32, #tpu.memory_space<vmem>>, vector<1x1xf32>,
    return
  }
}

</mosaic_0001>

<bundles_post_ra>
// kernel: forward.1
= control target key start
LH: loop header
LB: loop body
LE: loop exit
PB: predicated region body
PF: predicated region fallthrough
CT: control target
= control target key end

     0   :  { %s3696_s6 = smov 1   ;;  %s3697_s10 = smov 2   ;;  %s5034_s0 = inlined_call_operand.smem [shape: u32[30], index: -1, kind: input, shape index: {}] }
   0x1   :  { %s3743_s5 = sld [smem:[%s5034_s0]]   ;;  %s3698_s14 = smov 3  }
   0x2   :  { %s3748_s9 = sld [smem:[%s5034_s0 + %s3696_s6]]   ;;  %s3699_s18 = smov 4  }
   0x3   :  { %s3753_s13 = sld [smem:[%s5034_s0 + %s3697_s10]]   ;;  %s3700_s22 = smov 5  }
   0x4   :  { %s3758_s17 = sld [smem:[%s5034_s0 + %s3698_s14]]   ;;  %s3701_s26 = smov 6  }
   0x5   :  { %s3763_s21 = sld [smem:[%s5034_s0 + %s3699_s18]]   ;;  %s3702_s30 = smov 7  }
   0x6   :  { %s3768_s25 = sld [smem:[%s5034_s0 + %s3700_s22]]   ;;  %s3703_s4 = smov 8  }
   0x7   :  { %s3773_s29 = sld [smem:[%s5034_s0 + %s3701_s26]]   ;;  %s3704_s10 = smov 9  }
   0x8   :  { %s3778_s3 = sld [smem:[%s5034_s0 + %s3702_s30]]   ;;  %s3705_s15 = smov 10  }
   0x9   :  { %s3783_s8 = sld [smem:[%s5034_s0 + %s3703_s4]]   ;;  %s3706_s20 = smov 11  }
   0xa   :  { %s3788_s14 = sld [smem:[%s5034_s0 + %s3704_s10]]   ;;  %s3707_s26 = smov 12  }
   0xb   :  { %s3793_s19 = sld [smem:[%s5034_s0 + %s3705_s15]]   ;;  %s3708_s1 = smov 13  }
   0xc   :  { %s3798_s24 = sld [smem:[%s5034_s0 + %s3706_s20]]   ;;  %s3709_s7 = smov 14  }
   0xd   :  { %s3803_s30 = sld [smem:[%s5034_s0 + %s3707_s26]]   ;;  %s3710_s15 = smov 15  }
   0xe   :  { %s3808_s6 = sld [smem:[%s5034_s0 + %s3708_s1]]   ;;  %s3711_s22 = smov 16  }
   0xf   :  { %5081 = sst [smem:[#allocation26_spill]] %s3783_s8  ;;  %s3712_s28 = smov 17  }
  0x10   :  { %s3813_s12 = sld [smem:[%s5034_s0 + %s3709_s7]]   ;;  %s3713_s7 = smov 18  }
  0x11   :  { %5082 = sst [smem:[#allocation27_spill]] %s3793_s19  ;;  %s3716_s1 = smov 21  }
  0x12   :  { %s3818_s20 = sld [smem:[%s5034_s0 + %s3710_s15]]   ;;  %s3714_s15 = smov 19  }
  0x13   :  { %5083 = sst [smem:[#allocation28_spill]] %s3803_s30  ;;  %s3717_s10 = smov 22  }
  0x14   :  { %s3823_s27 = sld [smem:[%s5034_s0 + %s3711_s22]]   ;;  %s3715_s22 = smov 20  }
  0x15   :  { %s3828_s4 = sld [smem:[%s5034_s0 + %s3712_s28]]   ;;  %s3718_s16 = smov 23  }
  0x16   :  { %5084 = sst [smem:[#allocation29_spill]] %s3813_s12  ;;  %s3719_s23 = smov 24  }
  0x17   :  { %s3833_s12 = sld [smem:[%s5034_s0 + %s3713_s7]]   ;;  %s3724_s28 = smov 28  }
  0x18   :  { %s3838_s30 = sld [smem:[%s5034_s0 + %s3714_s15]]  }
  0x19   :  { %s3846_s19 = sld [smem:[%s5034_s0 + %s3716_s1]]   ;;  %s3720_s1 = smov 25  }
  0x1a   :  { %5085 = sst [smem:[#allocation30_spill]] %s3823_s27 }
  0x1b   :  { %s3209_s27 = sld [smem:[%s5034_s0 + %s3715_s22]]  }
  0x1c   :  { %s3861_s8 = sld [smem:[%s5034_s0 + %s3719_s23]]   ;;  %s3723_s23 = smov 29  }
  0x1d   :  { %5086 = sst [smem:[#allocation31_spill]] %s3833_s12 }
  0x1e   :  { %5087 = sst [smem:[#allocation32_spill]] %s3838_s30 }
  0x1f   :  { %5088 = sst [smem:[#allocation33_spill]] %s3846_s19 }
  0x20   :  { %s3851_s12 = sld [smem:[%s5034_s0 + %s3717_s10]]   ;;  %s3721_s10 = smov 26  }
  0x21   :  { %s3856_s30 = sld [smem:[%s5034_s0 + %s3718_s16]]   ;;  %v64_v0 = vstv %s3209_s27  ;;  %s3722_s16 = smov 27  }
  0x22   :  { %s3866_s19 = sld [smem:[%s5034_s0 + %s3720_s1]]   ;;  %65 = vst [vmem:[#allocation10] sm:$0x1] %v64_v0 }
  0x23   :  { %s3876_s22 = sld [smem:[%s5034_s0 + %s3722_s16]]  }
  0x24   :  { %s3881_s1 = sld [smem:[%s5034_s0 + %s3723_s23]]  }
  0x26   :  { %5089 = sst [smem:[#allocation34_spill]] %s3851_s12 }
  0x27   :  { %5090 = sst [smem:[#allocation35_spill]] %s3856_s30 }
  0x28   :  { %5091 = sst [smem:[#allocation36_spill]] %s3866_s19 }
  0x29   :  { %s3871_s12 = sld [smem:[%s5034_s0 + %s3721_s10]]  }
  0x2a   :  { %s3217_s10 = sld [smem:[%s5034_s0 + %s3724_s28]]  }
  0x30   :  { %v66_v1 = vstv %s3217_s10 }
  0x31   :  { %67 = vst [vmem:[#allocation11] sm:$0x1] %v66_v1 }
  0x32   :  { %68 = vsyncpa [#allocation13], 0 }
  0x33   :  { %69 = vsyncpa [#allocation15], 0 }
  0x34   :  { %70 = vsyncpa [#allocation18], 0 }
  0x35   :  { %71 = vsyncpa [#allocation21], 0  ;;  %s105_s27 = sshll.u32 %s3788_s14, 4  ;;  %s3725_s30 = smov [#allocation14]   ;;  %s106_s27 = int_to_ptr.hbm [resolvable:$true] %s105_s27 }
  0x36   :  { %s107_s7 = sshll.u32 %s3725_s30, 4  ;;  %s135_s11 = sshll.u32 %s3808_s6, 4  ;;  %s108_s7 = int_to_ptr.vmem [resolvable:$true] %s107_s7  ;;  %s136_s11 = int_to_ptr.hbm [resolvable:$true] %s135_s11 }
  0x37   :  { %s3544_s16 = sshra.s32 %s106_s27, 4  ;;  %s3548_s0 = scalar_lea.hbm %s3788_s14, 192  ;;  %s3545_s16 = int_to_ptr.hbm [resolvable:$true] %s3544_s16 }
  0x38   :  { %s3546_s19 = scalar_lea.hbm %s3545_s16, 192  ;;  %p3549_p1 = scmp.lt.s32.totalorder %s3545_s16, %s3788_s14 }
  0x39   :  { %p3547_p0 = scmp.ne.s32.totalorder %s3545_s16, %s3546_s19  ;;  %p3550_p2 = scmp.lt.s32.totalorder %s3548_s0, %s3546_s19 }
  0x3b   :  { %p3551_p3 = por %p3550_p2, %p3549_p1 }
  0x3d   :  { %p3552_p4 = pnand %p3551_p3, %p3547_p0 }
  0x3f   :  { %3555 = shalt.err (!%p3552_p4)
}
  0x40   :  { %s3726_s15 = smov 128   ;;  %s3727_s18 = smov 8  }
  0x41   :  { %113 = dma.hbm_to_vmem [thread:$0]  %s106_s27, 3072, %s108_s7, [#allocation15], %s3726_s15, %s3726_s15, %s3727_s18  }
  0x42   :  { %s3728_s23 = smov [#allocation17]   ;;  %s84_s28 = sshll.u32 %s3763_s21, 4  ;;  %s3894_s28 = int_to_ptr.hbm [resolvable:$true] %s84_s28 }
  0x43   :  { %s137_s26 = sshll.u32 %s3728_s23, 4  ;;  %s3568_s14 = sshra.s32 %s136_s11, 4  ;;  %s138_s26 = int_to_ptr.vmem [resolvable:$true] %s137_s26  ;;  %s3569_s14 = int_to_ptr.hbm [resolvable:$true] %s3568_s14 }
  0x44   :  { %s3570_s2 = scalar_lea.hbm %s3569_s14, 384  ;;  %s3572_s10 = scalar_lea.hbm %s3808_s6, 384 }
  0x45   :  { %p3571_p5 = scmp.ne.s32.totalorder %s3569_s14, %s3570_s2  ;;  %p3573_p6 = scmp.lt.s32.totalorder %s3569_s14, %s3808_s6 }
  0x46   :  { %p3574_p7 = scmp.lt.s32.totalorder %s3572_s10, %s3570_s2 }
  0x48   :  { %p3575_p8 = por %p3574_p7, %p3573_p6 }
  0x4a   :  { %p3576_p9 = pnand %p3575_p8, %p3571_p5 }
  0x4c   :  { %3579 = shalt.err (!%p3576_p9)
}
  0x4d   :  { %143 = dma.hbm_to_vmem [thread:$0]  %s136_s11, 6144, %s138_s26, [#allocation18], %s3726_s15, %s3726_s15, %s3727_s18  }
  0x4e   :  { %s120_s27 = sshll.u32 %s3798_s24, 4  ;;  %s3729_s30 = smov [#allocation12]   ;;  %s3902_s27 = int_to_ptr.hbm [resolvable:$true] %s120_s27 }
  0x4f   :  { %s86_s7 = sshll.u32 %s3729_s30, 4  ;;  %s3592_s16 = sshra.s32 %s3894_s28, 4  ;;  %s87_s7 = int_to_ptr.vmem [resolvable:$true] %s86_s7  ;;  %s3593_s16 = int_to_ptr.hbm [resolvable:$true] %s3592_s16 }
  0x50   :  { %s3594_s6 = scalar_lea.hbm %s3593_s16, 96  ;;  %s3596_s19 = scalar_lea.hbm %s3763_s21, 96 }
  0x51   :  { %p3595_p10 = scmp.ne.s32.totalorder %s3593_s16, %s3594_s6  ;;  %p3597_p11 = scmp.lt.s32.totalorder %s3593_s16, %s3763_s21 }
  0x52   :  { %p3598_p12 = scmp.lt.s32.totalorder %s3596_s19, %s3594_s6 }
  0x54   :  { %p3599_p13 = por %p3598_p12, %p3597_p11 }
  0x56   :  { %p3600_p0 = pnand %p3599_p13, %p3595_p10 }
  0x58   :  { %3603 = shalt.err (!%p3600_p0)
}
  0x59   :  { %92 = dma.hbm_to_vmem [thread:$0]  %s3894_s28, 1536, %s87_s7, [#allocation13], %s3726_s15, %s3726_s15, %s3727_s18  }
  0x5a   :  { %s3730_s11 = smov [#allocation16]   ;;  %s150_s23 = sshll.u32 %s3818_s20, 4  ;;  %s3912_s23 = int_to_ptr.hbm [resolvable:$true] %s150_s23 }
  0x5b   :  { %s122_s0 = sshll.u32 %s3730_s11, 4  ;;  %s3616_s21 = sshra.s32 %s3902_s27, 4  ;;  %s123_s0 = int_to_ptr.vmem [resolvable:$true] %s122_s0  ;;  %s3617_s21 = int_to_ptr.hbm [resolvable:$true] %s3616_s21 }
  0x5c   :  { %s3618_s26 = scalar_lea.hbm %s3617_s21, 384  ;;  %s3620_s14 = scalar_lea.hbm %s3798_s24, 384 }
  0x5d   :  { %p3619_p1 = scmp.ne.s32.totalorder %s3617_s21, %s3618_s26  ;;  %p3621_p2 = scmp.lt.s32.totalorder %s3617_s21, %s3798_s24 }
  0x5e   :  { %p3622_p3 = scmp.lt.s32.totalorder %s3620_s14, %s3618_s26 }
  0x60   :  { %p3623_p4 = por %p3622_p3, %p3621_p2 }
  0x62   :  { %p3624_p5 = pnand %p3623_p4, %p3619_p1 }
  0x64   :  { %3627 = shalt.err (!%p3624_p5)
}
  0x65   :  { %128 = dma.hbm_to_vmem [thread:$0]  %s3902_s27, 6144, %s123_s0, [#allocation15], %s3726_s15, %s3726_s15, %s3727_s18  }
  0x66   :  { %s165_s28 = sshll.u32 %s3828_s4, 4  ;;  %s3731_s2 = smov [#allocation19]   ;;  %s3922_s28 = int_to_ptr.hbm [resolvable:$true] %s165_s28 }
  0x67   :  { %s152_s10 = sshll.u32 %s3731_s2, 4  ;;  %s3640_s24 = sshra.s32 %s3912_s23, 4  ;;  %s153_s10 = int_to_ptr.vmem [resolvable:$true] %s152_s10  ;;  %s3641_s24 = int_to_ptr.hbm [resolvable:$true] %s3640_s24 }
  0x68   :  { %s3642_s30 = scalar_lea.hbm %s3641_s24, 384  ;;  %s3644_s7 = scalar_lea.hbm %s3818_s20, 384 }
  0x69   :  { %p3643_p6 = scmp.ne.s32.totalorder %s3641_s24, %s3642_s30  ;;  %p3645_p7 = scmp.lt.s32.totalorder %s3641_s24, %s3818_s20 }
  0x6a   :  { %p3646_p8 = scmp.lt.s32.totalorder %s3644_s7, %s3642_s30 }
  0x6c   :  { %p3647_p9 = por %p3646_p8, %p3645_p7 }
  0x6e   :  { %p3648_p10 = pnand %p3647_p9, %p3643_p6 }
  0x70   :  { %3651 = shalt.err (!%p3648_p10)
}
  0x71   :  { %158 = dma.hbm_to_vmem [thread:$0]  %s3912_s23, 6144, %s153_s10, [#allocation18], %s3726_s15, %s3726_s15, %s3727_s18  }
  0x72   :  { %s3732_s27 = smov [#allocation20]   ;;  %s3664_s6 = sshra.s32 %s3922_s28, 4  ;;  %s3665_s6 = int_to_ptr.hbm [resolvable:$true] %s3664_s6 }
  0x73   :  { %s167_s16 = sshll.u32 %s3732_s27, 4  ;;  %s3666_s19 = scalar_lea.hbm %s3665_s6, 384  ;;  %s168_s16 = int_to_ptr.vmem [resolvable:$true] %s167_s16 }
  0x74   :  { %p3667_p11 = scmp.ne.s32.totalorder %s3665_s6, %s3666_s19  ;;  %s3668_s20 = scalar_lea.hbm %s3828_s4, 384 }
  0x75   :  { %p3669_p12 = scmp.lt.s32.totalorder %s3665_s6, %s3828_s4  ;;  %p3670_p13 = scmp.lt.s32.totalorder %s3668_s20, %s3666_s19 }
  0x77   :  { %p3671_p0 = por %p3670_p13, %p3669_p12 }
  0x79   :  { %p3672_p1 = pnand %p3671_p0, %p3667_p11 }
  0x7b   :  { %3675 = shalt.err (!%p3672_p1)
}
  0x7c   :  { %173 = dma.hbm_to_vmem [thread:$0]  %s3922_s28, 6144, %s168_s16, [#allocation21], %s3726_s15, %s3726_s15, %s3727_s18  }
  0x7d   :  { %3688 = dma.done.wait [#allocation13], 1536  }
  0x7e   :  { %3689 = vsyncadd [#allocation13], 4294965760 }
  0x7f   :  { %3690 = dma.done.wait [#allocation15], 9216  }
  0x80   :  { %3691 = vsyncadd [#allocation15], 4294958080 }
  0x81   :  { %3692 = dma.done.wait [#allocation18], 12288  }
  0x82   :  { %3693 = vsyncadd [#allocation18], 4294955008 }
  0x83   :  { %3694 = dma.done.wait [#allocation21], 6144  }
  0x84   :  { %3695 = vsyncadd [#allocation21], 4294961152  ;;  %vm234_vm0 = vcmask 1043456   ;;  %vm227_vm1 = vcmask 31744   ;;  %v3219_v2 = vld [vmem:[%s3748_s9 + $0x4] sm:$0xf] }
  0x85   :  { %v222_v3 = vld [vmem:[%s3748_s9] sm:$0xf]  ;;  %3220 = vmatpush.msk.msra.mxu0 %vm234_vm0, %v3219_v2  ;;  %v3226_v6 = vld [vmem:[%s3748_s9 + $0x8] sm:$0xf]  ;;  %v358_v20 = vld [vmem:[#allocation12 + $0x20] sm:$0xff]  ;;  %vm347_vm2 = vcmask 259072  }
  0x86   :  { %v223_v4 = vld [vmem:[%s3743_s5 + $0x1] sm:$0xff]  ;;  %3223 = vmatpush.msk.msra.mxu1 %vm234_vm0, %v222_v3  ;;  %v294_v7 = vld [vmem:[%s3743_s5 + $0xa] sm:$0x3f]  ;;  %3323 = vmatpush.msk.msra.mxu2 %vm234_vm0, %v3226_v6  ;;  %v351_v21 = vld [vmem:[#allocation12] sm:$0xff]  ;;  %vm345_vm3 = vcmask 261120   ;;  %vm472_vm4 = vcmask 523264  }
  0x87   :  { %v220_v5 = vld [vmem:[%s3743_s5] sm:$0xff]  ;;  %3221 = vmatmul.msk.f32.vlgmr.msra.gmra.mxu0 %vm227_vm1, %v223_v4  ;;  %3229 = vmatmul.msk.f32.vlgmr.msra.gmra.mxu2 %vm227_vm1, %v294_v7  ;;  %v224_v8 = vld [vmem:[%s3743_s5 + $0x9] sm:$0x3f]  ;;  %v423_v22 = vld [vmem:[#allocation12 + $0x40] sm:$0xff]  ;;  %vm474_vm5 = vcmask 519168   ;;  %vm480_vm6 = vcmask 521216  }
  0x88   :  { %3224 = vmatmul.msk.f32.vlgmr.msra.gmra.mxu1 %vm227_vm1, %v220_v5  ;;  %3227 = vmatpush.msk.msrb.mxu0 %vm234_vm0, %v3226_v6  ;;  %v221_v9 = vld [vmem:[%s3743_s5 + $0x8] sm:$0x3f]  ;;  %v359_v17 = vld [vmem:[#allocation12 + $0x28] sm:$0xff]  ;;  %v3240_v31 = vld [vmem:[%s3748_s9 + $0x4] sm:$0xf]  ;;  %s5138_s4 = sld [smem:[#allocation33_spill]] }
  0x89   :  { %v293_v10 = vld [vmem:[%s3743_s5 + $0x2] sm:$0xff]  ;;  %v361_v11 = vld [vmem:[#allocation12 + $0x38] sm:$0xff]  ;;  %v352_v18 = vld [vmem:[#allocation12 + $0x8] sm:$0xff]  ;;  %3241 = vmatpush.msk.msrb.mxu2 %vm234_vm0, %v3240_v31  ;;  %s5139_s15 = sld [smem:[#allocation34_spill]] }
  0x8a   :  { %v354_v12 = vld [vmem:[#allocation12 + $0x18] sm:$0xff]  ;;  %380 = vmatpush.msra.mxu3 %v361_v11  ;;  %v360_v14 = vld [vmem:[#allocation12 + $0x30] sm:$0xff]  ;;  %v424_v19 = vld [vmem:[#allocation12 + $0x48] sm:$0xff]  ;;  %s5140_s18 = sld [smem:[#allocation35_spill]] }
  0x8b   :  { %v3957_v13 = vld [vmem:[#allocation12 + $0x58] sm:$0xff]  ;;  %409 = vmatpush.msra.mxu0 %v354_v12  ;;  %v353_v15 = vld [vmem:[#allocation12 + $0x10] sm:$0xff]  ;;  %v3365_v30 = vld [vmem:[%s3753_s13] ss:$0 sm:$0xff]  ;;  %665 = vmatpush.msra.mxu2 %v354_v12  ;;  %s5141_s11 = sld [smem:[#allocation36_spill]] }
  0x8c   :  { %v3959_v16 = vld [vmem:[#allocation12 + $0x50] sm:$0xff]  ;;  %445 = vmatpush.msrb.mxu1 %v3957_v13  ;;  %381 = vmatpush.msra.mxu3 %v360_v14  ;;  %v3238_v33 = vld [vmem:[%s3743_s5 + $0x11] sm:$0xff]  ;;  %v3366_v35 = vld [vmem:[%s3758_s17] ss:$0 sm:$0xff] }
  0x8d   :  { %410 = vmatpush.msra.mxu0 %v353_v15  ;;  %v485_v25 = vld [vmem:[%s3748_s9] sm:$0xf]  ;;  %v3249_v32 = vld [vmem:[%s3748_s9 + $0x8] sm:$0xf]  ;;  %666 = vmatpush.msra.mxu2 %v353_v15  ;;  %v3239_v42 = vld [vmem:[%s3743_s5 + $0x19] sm:$0x3f] }
  0x8e   :  { %446 = vmatpush.msrb.mxu1 %v3959_v16  ;;  %382 = vmatpush.msra.mxu3 %v359_v17  ;;  %v3236_v52 = vld [vmem:[%s3743_s5 + $0x10] sm:$0xff]  ;;  %v3237_v54 = vld [vmem:[%s3743_s5 + $0x18] sm:$0x3f]  ;;  %v3367_v60 = vld [vmem:[%s3768_s25] ss:$0 sm:$0xff]  ;;  %s5101_s9 = sld [smem:[#allocation27_spill]] }
  0x8f   :  { %3222 = vmatmul.msk.f32.gmra.mxu0 %vm227_vm1, %v224_v8  ;;  %3242 = vmatmul.msk.f32.vlgmr.msrb.gmra.mxu2 %vm227_vm1, %v3238_v33  ;;  %v3247_v53 = vld [vmem:[%s3743_s5 + $0x12] sm:$0xff]  ;;  %v3248_v55 = vld [vmem:[%s3743_s5 + $0x1a] sm:$0x3f]  ;;  %v3368_v62 = vld [vmem:[%s3773_s29] ss:$0 sm:$0xff]  ;;  %s5100_s5 = sld [smem:[#allocation26_spill]] }
  0x90   :  { %3225 = vmatmul.msk.f32.gmra.mxu1 %vm227_vm1, %v221_v9  ;;  %411 = vmatpush.msra.mxu0 %v352_v18 }
  0x91   :  { %447 = vmatpush.msrb.mxu1 %v424_v19  ;;  %383 = vmatpush.msra.mxu3 %v358_v20 }
  0x92   :  { %412 = vmatpush.msra.mxu0 %v351_v21  ;;  %667 = vmatpush.msra.mxu2 %v352_v18 }
  0x93   :  { %448 = vmatpush.msrb.mxu1 %v423_v22  ;;  %3244 = vmatpush.msk.msrb.mxu3 %vm234_vm0, %v485_v25 }
  0x94   :  { %668 = vmatpush.msra.mxu2 %v351_v21 }
  0x95   :  { %636 = vmatpush.msra.mxu1 %v361_v11 }
  0x97   :  { %3228 = vmatmul.msk.f32.vlgmr.msrb.gmra.mxu0 %vm227_vm1, %v293_v10  ;;  %637 = vmatpush.msra.mxu1 %v360_v14  ;;  %v3369_v14 = vld [vmem:[%s3753_s13] ss:$0 sm:$0xff]  ;;  %s5102_s13 = sld [smem:[#allocation28_spill]] }
  0x98   :  { %3250 = vmatpush.msk.msrb.mxu0 %vm234_vm0, %v3249_v32  ;;  %3243 = vmatmul.msk.f32.gmra.mxu2 %vm227_vm1, %v3239_v42  ;;  %v861_v42 = vld [vmem:[#allocation14 + $0x70] sm:$0xff] }
  0x99   :  { %638 = vmatpush.msra.mxu1 %v359_v17 }
  0x9b   :  { %639 = vmatpush.msra.mxu1 %v358_v20 }
 0x104   :  { %v255_v23 = vpop.f32.mrf.mxu0 }
 0x105   :  { %v287_v24 = vpop.f32.mrf.mxu1 }
 0x106   :  { %v288_v37 = vadd.f32 %v287_v24, %v255_v23 }
 0x10a   :  { %v326_v29 = vpop.f32.mrf.mxu2 }
 0x10c   :  { %v258_v26 = vpop.f32.mrf.mxu0 }
 0x10d   :  { %v290_v27 = vpop.f32.mrf.mxu1 }
 0x10e   :  { %v291_v28 = vadd.f32 %v290_v27, %v258_v26 }
 0x110   :  { %v330_v34 = vadd.f32 %v326_v29, %v291_v28 }
 0x112   :  { %v336_v36 = vmul.f32 %v3365_v30, %v330_v34  ;;  %v515_v7 = vpop.f32.mrf.mxu2 }
 0x114   :  { %v342_v38 = vadd.f32 %v3366_v35, %v336_v36  ;;  %v323_v39 = vpop.f32.mrf.mxu0 }
 0x115   :  { %v329_v41 = vadd.f32 %v323_v39, %v288_v37  ;;  %v3270_v37 = vld [vmem:[%s3778_s3 + $0x78] sm:$0xff]  ;;  %v3268_v39 = vld [vmem:[%s3778_s3 + $0x68] sm:$0xff] }
 0x116   :  { %v344_v40 = vmax.f32 %v342_v38, 0.0  ;;  %837 = vmatpush.msrb.mxu2 %v3270_v37  ;;  %v3269_v38 = vld [vmem:[%s3778_s3 + $0x70] sm:$0xff] }
 0x117   :  { %v335_v43 = vmul.f32 %v3365_v30, %v329_v41  ;;  %v3267_v41 = vld [vmem:[%s3778_s3 + $0x60] sm:$0xff]  ;;  %v4078_v37 = vld [vmem:[#allocation16 + $0xc0] sm:$0xff] }
 0x118   :  { %348 = vst.msk [vmem:[#allocation2 + $0x8] sm:$0x3f] %vm347_vm2, %v344_v40  ;;  %838 = vmatpush.msrb.mxu2 %v3269_v38  ;;  %v862_v40 = vld [vmem:[#allocation14 + $0x78] sm:$0xff] }
 0x119   :  { %v341_v44 = vadd.f32 %v3366_v35, %v335_v43  ;;  %v3266_v43 = vld [vmem:[%s3778_s3 + $0x58] sm:$0xff]  ;;  %v3282_v38 = vld [vmem:[%s3778_s3 + $0xa8] sm:$0xff] }
 0x11a   :  { %839 = vmatpush.msrb.mxu2 %v3268_v39 }
 0x11b   :  { %v343_v45 = vmax.f32 %v341_v44, 0.0  ;;  %v518_v18 = vpop.f32.mrf.mxu2  ;;  %v860_v44 = vld [vmem:[#allocation14 + $0x68] sm:$0xff] }
 0x11c   :  { %840 = vmatpush.msrb.mxu2 %v3267_v41  ;;  %v938_v41 = vld [vmem:[#allocation14 + $0xa8] sm:$0xff] }
 0x11d   :  { %346 = vst.msk [vmem:[#allocation2] sm:$0xff] %vm345_vm3, %v343_v45  ;;  %v3265_v45 = vld [vmem:[%s3778_s3 + $0x50] sm:$0xff] }
 0x11e   :  { %841 = vmatpush.msrb.mxu2 %v3266_v43  ;;  %v4083_v43 = vld [vmem:[#allocation16 + $0xb8] sm:$0xff] }
 0x11f   :  { %v356_v49 = vld [vmem:[#allocation2 + $0x9] sm:$0xf] }
 0x120   :  { %v350_v50 = vld [vmem:[#allocation2 + $0x8] sm:$0xf]  ;;  %842 = vmatpush.msrb.mxu2 %v3265_v45  ;;  %v3281_v45 = vld [vmem:[%s3778_s3 + $0xa0] sm:$0xff] }
 0x121   :  { %v421_v51 = vld [vmem:[#allocation2 + $0xa] sm:$0xf] }
 0x124   :  { %v355_v46 = vld [vmem:[#allocation2 + $0x1] sm:$0xff] }
 0x125   :  { %v349_v47 = vld [vmem:[#allocation2] sm:$0xff]  ;;  %3230 = vmatmul.msk.f32.vlgmr.msra.gmra.mxu3 %vm345_vm3, %v355_v46  ;;  %v859_v46 = vld [vmem:[#allocation14 + $0x60] sm:$0xff] }
 0x126   :  { %v420_v48 = vld [vmem:[#allocation2 + $0x2] sm:$0xff]  ;;  %3232 = vmatmul.msk.f32.vlgmr.msra.gmra.mxu0 %vm345_vm3, %v349_v47  ;;  %700 = vmatpush.msra.mxu3 %v3957_v13 }
 0x127   :  { %3234 = vmatmul.msk.f32.vlgmr.msrb.gmra.mxu1 %vm345_vm3, %v420_v48  ;;  %v3264_v47 = vld [vmem:[%s3778_s3 + $0x48] sm:$0xff] }
 0x128   :  { %701 = vmatpush.msra.mxu3 %v3959_v16  ;;  %v3370_v16 = vld [vmem:[%s3758_s17] ss:$0 sm:$0xff]  ;;  %v858_v48 = vld [vmem:[#allocation14 + $0x58] sm:$0xff]  ;;  %843 = vmatpush.msrb.mxu2 %v3264_v47  ;;  %s5125_s17 = sld [smem:[#allocation29_spill]] }
 0x12a   :  { %702 = vmatpush.msra.mxu3 %v424_v19 }
 0x12c   :  { %703 = vmatpush.msra.mxu3 %v423_v22 }
 0x12d   :  { %3231 = vmatmul.msk.f32.gmra.mxu3 %vm345_vm3, %v356_v49  ;;  %v3263_v49 = vld [vmem:[%s3778_s3 + $0x40] sm:$0xff] }
 0x12e   :  { %3233 = vmatmul.msk.f32.gmra.mxu0 %vm345_vm3, %v350_v50  ;;  %v857_v50 = vld [vmem:[#allocation14 + $0x50] sm:$0xff]  ;;  %844 = vmatpush.msrb.mxu2 %v3263_v49 }
 0x12f   :  { %3235 = vmatmul.msk.f32.gmra.mxu1 %vm345_vm3, %v421_v51  ;;  %v742_v51 = vld [vmem:[%s3778_s3 + $0x38] sm:$0xff]  ;;  %v4091_v49 = vld [vmem:[#allocation16 + $0xb0] sm:$0xff] }
 0x130   :  { %761 = vmatpush.msra.mxu0 %v742_v51  ;;  %v3280_v51 = vld [vmem:[%s3778_s3 + $0x98] sm:$0xff] }
 0x135   :  { %3245 = vmatmul.msk.f32.vlgmr.msrb.gmra.mxu3 %vm227_vm1, %v3236_v52  ;;  %v785_v52 = vld [vmem:[#allocation14 + $0x38] sm:$0xff] }
 0x136   :  { %3251 = vmatmul.msk.f32.vlgmr.msrb.gmra.mxu0 %vm227_vm1, %v3247_v53  ;;  %876 = vmatpush.msrb.mxu3 %v862_v40  ;;  %v4017_v53 = vld [vmem:[#allocation16 + $0x78] sm:$0xff] }
 0x137   :  { %798 = vmatpush.msrb.mxu1 %v785_v52  ;;  %v936_v52 = vld [vmem:[#allocation14 + $0x98] sm:$0xff] }
 0x138   :  { %877 = vmatpush.msrb.mxu3 %v861_v42  ;;  %v4081_v42 = vld [vmem:[#allocation16 + $0x28] sm:$0xff] }
 0x13a   :  { %878 = vmatpush.msrb.mxu3 %v860_v44 }
 0x13c   :  { %879 = vmatpush.msrb.mxu3 %v859_v46  ;;  %v937_v46 = vld [vmem:[#allocation14 + $0xa0] sm:$0xff] }
 0x13d   :  { %3246 = vmatmul.msk.f32.gmra.mxu3 %vm227_vm1, %v3237_v54  ;;  %v856_v54 = vld [vmem:[#allocation14 + $0x48] sm:$0xff] }
 0x13e   :  { %3252 = vmatmul.msk.f32.gmra.mxu0 %vm227_vm1, %v3248_v55  ;;  %880 = vmatpush.msrb.mxu3 %v858_v48  ;;  %v741_v55 = vld [vmem:[%s3778_s3 + $0x30] sm:$0xff] }
 0x13f   :  { %762 = vmatpush.msra.mxu0 %v741_v55  ;;  %v4089_v48 = vld [vmem:[#allocation16 + $0x20] sm:$0xff] }
 0x140   :  { %881 = vmatpush.msrb.mxu3 %v857_v50 }
 0x142   :  { %882 = vmatpush.msrb.mxu3 %v856_v54  ;;  %v4098_v54 = vld [vmem:[#allocation16 + $0x18] sm:$0xff] }
 0x1a3   :  { %v414_v56 = vpop.f32.mrf.mxu0 }
 0x1a4   :  { %v450_v57 = vpop.f32.mrf.mxu1 }
 0x1a8   :  { %v385_v58 = vpop.f32.mrf.mxu3 }
 0x1a9   :  { %v415_v59 = vadd.f32 %v414_v56, %v385_v58  ;;  %v784_v56 = vld [vmem:[#allocation14 + $0x30] sm:$0xff]  ;;  %v855_v58 = vld [vmem:[#allocation14 + $0x40] sm:$0xff] }
 0x1aa   :  { %799 = vmatpush.msrb.mxu1 %v784_v56  ;;  %883 = vmatpush.msrb.mxu3 %v855_v58  ;;  %v4100_v56 = vld [vmem:[#allocation16 + $0xa8] sm:$0xff]  ;;  %v3279_v58 = vld [vmem:[%s3778_s3 + $0x90] sm:$0xff] }
 0x1ab   :  { %v456_v61 = vadd.f32 %v450_v57, %v415_v59  ;;  %v417_v0 = vpop.f32.mrf.mxu0  ;;  %v4020_v57 = vld [vmem:[#allocation16 + $0x70] sm:$0xff] }
 0x1ac   :  { %v453_v5 = vpop.f32.mrf.mxu1  ;;  %v740_v59 = vld [vmem:[%s3778_s3 + $0x28] sm:$0xff] }
 0x1ad   :  { %v462_v63 = vmul.f32 %v3367_v60, %v456_v61  ;;  %v4024_v61 = vld [vmem:[#allocation16 + $0x68] sm:$0xff]  ;;  %763 = vmatpush.msra.mxu0 %v740_v59  ;;  %v935_v59 = vld [vmem:[#allocation14 + $0x90] sm:$0xff] }
 0x1af   :  { %v468_v1 = vadd.f32 %v3368_v62, %v462_v63  ;;  %v739_v63 = vld [vmem:[%s3778_s3 + $0x20] sm:$0xff] }
 0x1b0   :  { %v388_v2 = vpop.f32.mrf.mxu3  ;;  %764 = vmatpush.msra.mxu0 %v739_v63  ;;  %v4107_v63 = vld [vmem:[#allocation16 + $0xa0] sm:$0xff] }
 0x1b1   :  { %v470_v3 = vmax.f32 %v468_v1, 0.0  ;;  %v418_v4 = vadd.f32 %v417_v0, %v388_v2  ;;  %v782_v0 = vld [vmem:[#allocation14 + $0x20] sm:$0xff]  ;;  %v4033_v2 = vld [vmem:[#allocation16 + $0xf0] sm:$0xff] }
 0x1b2   :  { %v4030_v1 = vld [vmem:[#allocation16 + $0x60] sm:$0xff] }
 0x1b3   :  { %473 = vst.msk [vmem:[#allocation3] sm:$0xff] %vm472_vm4, %v470_v3  ;;  %v457_v6 = vadd.f32 %v453_v5, %v418_v4  ;;  %v582_v9 = vpop.f32.mrf.mxu0  ;;  %v738_v3 = vld [vmem:[%s3778_s3 + $0x18] sm:$0xff]  ;;  %v781_v4 = vld [vmem:[#allocation14 + $0x18] sm:$0xff] }
 0x1b4   :  { %v4037_v5 = vld [vmem:[#allocation16 + $0x58] sm:$0xff]  ;;  %765 = vmatpush.msra.mxu0 %v738_v3 }
 0x1b5   :  { %v463_v8 = vmul.f32 %v3367_v60, %v457_v6  ;;  %v783_v60 = vld [vmem:[#allocation14 + $0x28] sm:$0xff] }
 0x1b6   :  { %800 = vmatpush.msrb.mxu1 %v783_v60  ;;  %v4105_v60 = vld [vmem:[#allocation16 + $0x10] sm:$0xff] }
 0x1b7   :  { %v469_v10 = vadd.f32 %v3368_v62, %v463_v8  ;;  %v4027_v62 = vld [vmem:[#allocation16 + $0xf8] sm:$0xff]  ;;  %5092 = vst [vmem:[#allocation37_spill] sm:$0xff] %v4105_v60 }
 0x1b8   :  { %v547_v11 = vpop.f32.mrf.mxu3  ;;  %801 = vmatpush.msrb.mxu1 %v782_v0  ;;  %v737_v8 = vld [vmem:[%s3778_s3 + $0x10] sm:$0xff]  ;;  %v3278_v0 = vld [vmem:[%s3778_s3 + $0x88] sm:$0xff] }
 0x1b9   :  { %v471_v12 = vmax.f32 %v469_v10, 0.0  ;;  %v548_v13 = vadd.f32 %v547_v11, %v515_v7  ;;  %v4040_v7 = vld [vmem:[#allocation16 + $0xe8] sm:$0xff]  ;;  %v4044_v10 = vld [vmem:[#allocation16 + $0x50] sm:$0xff]  ;;  %766 = vmatpush.msra.mxu0 %v737_v8  ;;  %v4112_v8 = vld [vmem:[#allocation16 + $0x98] sm:$0xff] }
 0x1ba   :  { %802 = vmatpush.msrb.mxu1 %v781_v4  ;;  %v934_v4 = vld [vmem:[#allocation14 + $0x88] sm:$0xff] }
 0x1bb   :  { %475 = vst.msk [vmem:[#allocation3 + $0x8] sm:$0xf] %vm474_vm5, %v471_v12  ;;  %v588_v15 = vadd.f32 %v582_v9, %v548_v13  ;;  %v585_v21 = vpop.f32.mrf.mxu0  ;;  %v780_v9 = vld [vmem:[#allocation14 + $0x10] sm:$0xff]  ;;  %v4047_v12 = vld [vmem:[#allocation16 + $0xe0] sm:$0xff] }
 0x1bc   :  { %v736_v13 = vld [vmem:[%s3778_s3 + $0x8] sm:$0xff]  ;;  %803 = vmatpush.msrb.mxu1 %v780_v9  ;;  %v3277_v9 = vld [vmem:[%s3778_s3 + $0x80] sm:$0xff] }
 0x1bd   :  { %v594_v17 = vmul.f32 %v3369_v14, %v588_v15  ;;  %v4051_v15 = vld [vmem:[#allocation16 + $0x48] sm:$0xff]  ;;  %767 = vmatpush.msra.mxu0 %v736_v13  ;;  %v4118_v13 = vld [vmem:[#allocation16] sm:$0xff] }
 0x1be   :  { %5094 = vst [vmem:[#allocation39_spill] sm:$0xff] %v4118_v13 }
 0x1bf   :  { %v600_v19 = vadd.f32 %v3370_v16, %v594_v17  ;;  %v735_v17 = vld [vmem:[%s3778_s3] sm:$0xff] }
 0x1c0   :  { %v550_v20 = vpop.f32.mrf.mxu3  ;;  %768 = vmatpush.msra.mxu0 %v735_v17  ;;  %v4126_v17 = vld [vmem:[#allocation16 + $0x88] sm:$0xff] }
 0x1c1   :  { %v602_v22 = vmax.f32 %v600_v19, 0.0  ;;  %v551_v23 = vadd.f32 %v550_v20, %v518_v18  ;;  %v3371_v19 = vld [vmem:[%s3768_s25] ss:$0 sm:$0xff]  ;;  %v778_v20 = vld [vmem:[#allocation14] sm:$0xff]  ;;  %5096 = vst [vmem:[#allocation41_spill] sm:$0xff] %v4126_v17  ;;  %s5126_s25 = sld [smem:[#allocation30_spill]] }
 0x1c2   :  { %v476_v24 = vld [vmem:[#allocation3] ss:$2 sm:$0x3f]  ;;  %v478_v25 = vld [vmem:[#allocation3 + $0x1] ss:$2 sm:$0x3f] }
 0x1c3   :  { %604 = vst.msk [vmem:[#allocation2] sm:$0xff] %vm345_vm3, %v602_v22  ;;  %v589_v26 = vadd.f32 %v585_v21, %v551_v23  ;;  %v479_v27 = vmax.f32 %v476_v24, %v478_v25  ;;  %v4059_v21 = vld [vmem:[#allocation16 + $0x40] sm:$0xff]  ;;  %v4062_v23 = vld [vmem:[#allocation16 + $0xd0] sm:$0xff]  ;;  %v3372_v25 = vld [vmem:[%s3773_s29] ss:$0 sm:$0xff]  ;;  %s5127_s29 = sld [smem:[#allocation31_spill]] }
 0x1c5   :  { %v595_v28 = vmul.f32 %v3369_v14, %v589_v26  ;;  %481 = vst.msk [vmem:[#allocation4] sm:$0x3f] %vm480_vm6, %v479_v27  ;;  %v779_v14 = vld [vmem:[#allocation14 + $0x8] sm:$0xff] }
 0x1c6   :  { %804 = vmatpush.msrb.mxu1 %v779_v14  ;;  %v4120_v14 = vld [vmem:[#allocation16 + $0x90] sm:$0xff] }
 0x1c7   :  { %v601_v29 = vadd.f32 %v3370_v16, %v595_v28  ;;  %v4054_v16 = vld [vmem:[#allocation16 + $0xd8] sm:$0xff]  ;;  %v3284_v28 = vld [vmem:[%s3778_s3 + $0xb8] sm:$0xff]  ;;  %5095 = vst [vmem:[#allocation40_spill] sm:$0xff] %v4120_v14 }
 0x1c8   :  { %805 = vmatpush.msrb.mxu1 %v778_v20  ;;  %915 = vmatpush.msrb.mxu0 %v3284_v28 }
 0x1c9   :  { %v603_v30 = vmax.f32 %v601_v29, 0.0  ;;  %v940_v29 = vld [vmem:[#allocation14 + $0xb8] sm:$0xff] }
 0x1ca   :  { %v606_v31 = vld [vmem:[#allocation2] sm:$0xff] }
 0x1cb   :  { %605 = vst.msk [vmem:[#allocation2 + $0x8] sm:$0x3f] %vm347_vm2, %v603_v30  ;;  %3255 = vmatmul.msk.f32.vlgmr.msra.gmra.mxu2 %vm345_vm3, %v606_v31  ;;  %v4069_v30 = vld [vmem:[#allocation16 + $0x38] sm:$0xff] }
 0x1cc   :  { %1039 = vmatpush.msra.mxu2 %v4017_v53 }
 0x1ce   :  { %1040 = vmatpush.msra.mxu2 %v4020_v57 }
 0x1d0   :  { %1041 = vmatpush.msra.mxu2 %v4024_v61 }
 0x1d2   :  { %v612_v32 = vld [vmem:[#allocation2 + $0x1] sm:$0xff]  ;;  %v613_v35 = vld [vmem:[#allocation2 + $0x9] sm:$0xf]  ;;  %1042 = vmatpush.msra.mxu2 %v4030_v1 }
 0x1d3   :  { %v607_v33 = vld [vmem:[#allocation2 + $0x8] sm:$0xf]  ;;  %3253 = vmatmul.msk.f32.vlgmr.msra.gmra.mxu1 %vm345_vm3, %v612_v32  ;;  %v4071_v32 = vld [vmem:[#allocation16 + $0xc8] sm:$0xff] }
 0x1d4   :  { %v676_v34 = vld [vmem:[#allocation2 + $0x2] sm:$0xff]  ;;  %3256 = vmatmul.msk.f32.gmra.mxu2 %vm345_vm3, %v607_v33  ;;  %v677_v36 = vld [vmem:[#allocation2 + $0xa] sm:$0xf]  ;;  %954 = vmatpush.msra.mxu1 %v940_v29  ;;  %v3283_v33 = vld [vmem:[%s3778_s3 + $0xb0] sm:$0xff]  ;;  %s5137_s3 = sld [smem:[#allocation32_spill]] }
 0x1d5   :  { %3257 = vmatmul.msk.f32.vlgmr.msra.gmra.mxu3 %vm345_vm3, %v676_v34  ;;  %1043 = vmatpush.msra.mxu2 %v4037_v5  ;;  %v939_v34 = vld [vmem:[#allocation14 + $0xb0] sm:$0xff]  ;;  %v4153_v29 = vld [vmem:[#allocation16 + $0x160] sm:$0xff] }
 0x1d6   :  { %1059 = vmatpush.msra.mxu3 %v4027_v62  ;;  %916 = vmatpush.msrb.mxu0 %v3283_v33  ;;  %v4165_v33 = vld [vmem:[#allocation16 + $0x150] sm:$0xff] }
 0x1d7   :  { %1044 = vmatpush.msra.mxu2 %v4044_v10  ;;  %955 = vmatpush.msra.mxu1 %v939_v34  ;;  %v4175_v34 = vld [vmem:[#allocation16 + $0x148] sm:$0xff] }
 0x1d8   :  { %1060 = vmatpush.msra.mxu3 %v4033_v2  ;;  %917 = vmatpush.msrb.mxu0 %v3282_v38  ;;  %v4183_v38 = vld [vmem:[#allocation16 + $0x140] sm:$0xff] }
 0x1d9   :  { %1045 = vmatpush.msra.mxu2 %v4051_v15  ;;  %956 = vmatpush.msra.mxu1 %v938_v41  ;;  %v4203_v41 = vld [vmem:[#allocation16 + $0x128] sm:$0xff] }
 0x1da   :  { %1061 = vmatpush.msra.mxu3 %v4040_v7  ;;  %918 = vmatpush.msrb.mxu0 %v3281_v45  ;;  %v4213_v45 = vld [vmem:[#allocation16 + $0x118] sm:$0xff] }
 0x1db   :  { %3254 = vmatmul.msk.f32.gmra.mxu1 %vm345_vm3, %v613_v35  ;;  %1046 = vmatpush.msra.mxu2 %v4059_v21 }
 0x1dc   :  { %1062 = vmatpush.msra.mxu3 %v4047_v12  ;;  %957 = vmatpush.msra.mxu1 %v937_v46  ;;  %v4219_v46 = vld [vmem:[#allocation16 + $0x110] sm:$0xff] }
 0x1dd   :  { %3258 = vmatmul.msk.f32.gmra.mxu3 %vm345_vm3, %v677_v36  ;;  %1047 = vmatpush.msra.mxu2 %v4069_v30  ;;  %v4076_v36 = vld [vmem:[#allocation16 + $0x30] sm:$0xff] }
 0x1de   :  { %1063 = vmatpush.msra.mxu3 %v4054_v16  ;;  %919 = vmatpush.msrb.mxu0 %v3280_v51  ;;  %v3373_v51 = vld [vmem:[%s5100_s5] ss:$0 sm:$0xff] }
 0x1df   :  { %1048 = vmatpush.msra.mxu2 %v4076_v36  ;;  %958 = vmatpush.msra.mxu1 %v936_v52  ;;  %v3374_v52 = vld [vmem:[%s5101_s9] ss:$0 sm:$0xff] }
 0x1e0   :  { %1064 = vmatpush.msra.mxu3 %v4062_v23  ;;  %920 = vmatpush.msrb.mxu0 %v3279_v58 }
 0x1e1   :  { %1049 = vmatpush.msra.mxu2 %v4081_v42  ;;  %959 = vmatpush.msra.mxu1 %v935_v59 }
 0x1e2   :  { %1065 = vmatpush.msra.mxu3 %v4071_v32  ;;  %921 = vmatpush.msrb.mxu0 %v3278_v0 }
 0x1e3   :  { %1050 = vmatpush.msra.mxu2 %v4089_v48  ;;  %960 = vmatpush.msra.mxu1 %v934_v4  ;;  %v3376_v4 = vld [vmem:[%s5101_s9 + $0x1] ss:$0 sm:$0xff] }
 0x1e4   :  { %1066 = vmatpush.msra.mxu3 %v4078_v37  ;;  %922 = vmatpush.msrb.mxu0 %v3277_v9 }
 0x1e5   :  { %1051 = vmatpush.msra.mxu2 %v4098_v54 }
 0x1e6   :  { %1067 = vmatpush.msra.mxu3 %v4083_v43 }
 0x1e7   :  { %1052 = vmatpush.msra.mxu2 %v4105_v60 }
 0x1e8   :  { %1068 = vmatpush.msra.mxu3 %v4091_v49 }
 0x1ea   :  { %1069 = vmatpush.msra.mxu3 %v4100_v56 }
 0x1ec   :  { %1070 = vmatpush.msra.mxu3 %v4107_v63 }
 0x1ee   :  { %1071 = vmatpush.msra.mxu3 %v4112_v8 }
 0x1f0   :  { %1072 = vmatpush.msra.mxu3 %v4120_v14 }
 0x1f2   :  { %1073 = vmatpush.msra.mxu3 %v4126_v17 }
 0x24e   :  { %v670_v11 = vpop.f32.mrf.mxu2 }
 0x250   :  { %v641_v6 = vpop.f32.mrf.mxu1 }
 0x251   :  { %v671_v18 = vadd.f32 %v670_v11, %v641_v6  ;;  %v4110_v6 = vld [vmem:[#allocation16 + $0x8] sm:$0xff]  ;;  %v933_v11 = vld [vmem:[#allocation14 + $0x80] sm:$0xff] }
 0x252   :  { %5093 = vst [vmem:[#allocation38_spill] sm:$0xff] %v4110_v6  ;;  %1053 = vmatpush.msra.mxu2 %v4110_v6  ;;  %961 = vmatpush.msra.mxu1 %v933_v11 }
 0x254   :  { %1054 = vmatpush.msra.mxu2 %v4118_v13 }
 0x257   :  { %v673_v35 = vpop.f32.mrf.mxu2 }
 0x258   :  { %v705_v22 = vpop.f32.mrf.mxu3  ;;  %v644_v27 = vpop.f32.mrf.mxu1 }
 0x259   :  { %v711_v24 = vadd.f32 %v705_v22, %v671_v18  ;;  %v674_v40 = vadd.f32 %v673_v35, %v644_v27  ;;  %v4128_v18 = vld [vmem:[#allocation16 + $0x80] sm:$0xff]  ;;  %v4143_v27 = vld [vmem:[#allocation16 + $0x168] sm:$0xff]  ;;  %v5045_v35 = vmov 0.0  }
 0x25a   :  { %5097 = vst [vmem:[#allocation42_spill] sm:$0xff] %v4128_v18  ;;  %1074 = vmatpush.msra.mxu3 %v4128_v18 }
 0x25b   :  { %v717_v26 = vmul.f32 %v3371_v19, %v711_v24 }
 0x25d   :  { %v723_v31 = vadd.f32 %v3372_v25, %v717_v26  ;;  %v4139_v26 = vld [vmem:[#allocation16 + $0x170] sm:$0xff] }
 0x25f   :  { %v725_v39 = vmax.f32 %v723_v31, 0.0  ;;  %v4161_v31 = vld [vmem:[#allocation16 + $0x158] sm:$0xff] }
 0x260   :  { %v708_v44 = vpop.f32.mrf.mxu3 }
 0x261   :  { %727 = vst.msk [vmem:[#allocation3] sm:$0xff] %vm472_vm4, %v725_v39  ;;  %v712_v47 = vadd.f32 %v708_v44, %v674_v40  ;;  %v4187_v39 = vld [vmem:[#allocation16 + $0x138] sm:$0xff]  ;;  %v4196_v40 = vld [vmem:[#allocation16 + $0x130] sm:$0xff]  ;;  %v4207_v44 = vld [vmem:[#allocation16 + $0x120] sm:$0xff] }
 0x263   :  { %v718_v50 = vmul.f32 %v3371_v19, %v712_v47  ;;  %v4225_v47 = vld [vmem:[#allocation16 + $0x108] sm:$0xff] }
 0x264   :  { %5098 = vst [vmem:[#allocation43_spill] sm:$0xff] %v4225_v47 }
 0x265   :  { %v724_v55 = vadd.f32 %v3372_v25, %v718_v50  ;;  %v4133_v25 = vld [vmem:[#allocation16 + $0x178] sm:$0xff]  ;;  %v4231_v50 = vld [vmem:[#allocation16 + $0x100] sm:$0xff] }
 0x266   :  { %5099 = vst [vmem:[#allocation44_spill] sm:$0xff] %v4231_v50 }
 0x267   :  { %v726_v3 = vmax.f32 %v724_v55, 0.0 }
 0x269   :  { %728 = vst.msk [vmem:[#allocation3 + $0x8] sm:$0xf] %vm474_vm5, %v726_v3  ;;  %v3375_v3 = vld [vmem:[%s5100_s5 + $0x1] ss:$0 sm:$0xff] }
 0x270   :  { %v729_v19 = vld [vmem:[#allocation3] ss:$2 sm:$0x3f]  ;;  %v730_v20 = vld [vmem:[#allocation3 + $0x1] ss:$2 sm:$0x3f] }
 0x271   :  { %v731_v22 = vmax.f32 %v729_v19, %v730_v20 }
 0x273   :  { %732 = vst.msk [vmem:[#allocation4 + $0x6] sm:$0x3f] %vm480_vm6, %v731_v22 }
 0x27a   :  { %v733_v24 = vld [vmem:[#allocation4] sm:$0xff]  ;;  %v734_v28 = vld [vmem:[#allocation4 + $0x8] sm:$0xf] }
 0x27b   :  { %3259 = vmatmul.msk.f32.vlgmr.msra.gmra.mxu0 %vm472_vm4, %v733_v24  ;;  %3261 = vmatmul.msk.f32.vlgmr.msrb.gmra.mxu1 %vm472_vm4, %v733_v24 }
 0x27c   :  { %3272 = vmatmul.msk.f32.vlgmr.msrb.gmra.mxu2 %vm472_vm4, %v733_v24  ;;  %3275 = vmatmul.msk.f32.vlgmr.msrb.gmra.mxu3 %vm472_vm4, %v733_v24 }
 0x27d   :  { %1079 = vmatpush.msra.mxu0 %v4133_v25  ;;  %1162 = vmatpush.msrb.mxu1 %v4017_v53 }
 0x27e   :  { %1182 = vmatpush.msrb.mxu2 %v4027_v62  ;;  %1202 = vmatpush.msrb.mxu3 %v4133_v25 }
 0x27f   :  { %1080 = vmatpush.msra.mxu0 %v4139_v26  ;;  %1163 = vmatpush.msrb.mxu1 %v4020_v57 }
 0x280   :  { %1183 = vmatpush.msrb.mxu2 %v4033_v2  ;;  %1203 = vmatpush.msrb.mxu3 %v4139_v26 }
 0x281   :  { %1081 = vmatpush.msra.mxu0 %v4143_v27  ;;  %1164 = vmatpush.msrb.mxu1 %v4024_v61 }
 0x282   :  { %1184 = vmatpush.msrb.mxu2 %v4040_v7  ;;  %1204 = vmatpush.msrb.mxu3 %v4143_v27 }
 0x283   :  { %3260 = vmatmul.msk.f32.gmra.mxu0 %vm472_vm4, %v734_v28  ;;  %3262 = vmatmul.msk.f32.gmra.mxu1 %vm472_vm4, %v734_v28 }
 0x284   :  { %3273 = vmatmul.msk.f32.gmra.mxu2 %vm472_vm4, %v734_v28  ;;  %3276 = vmatmul.msk.f32.gmra.mxu3 %vm472_vm4, %v734_v28 }
 0x285   :  { %1082 = vmatpush.msra.mxu0 %v4153_v29  ;;  %1165 = vmatpush.msrb.mxu1 %v4030_v1 }
 0x286   :  { %1185 = vmatpush.msrb.mxu2 %v4047_v12  ;;  %1205 = vmatpush.msrb.mxu3 %v4153_v29 }
 0x287   :  { %1083 = vmatpush.msra.mxu0 %v4161_v31  ;;  %1166 = vmatpush.msrb.mxu1 %v4037_v5 }
 0x288   :  { %1186 = vmatpush.msrb.mxu2 %v4054_v16  ;;  %1206 = vmatpush.msrb.mxu3 %v4161_v31 }
 0x289   :  { %1084 = vmatpush.msra.mxu0 %v4165_v33  ;;  %1167 = vmatpush.msrb.mxu1 %v4044_v10 }
 0x28a   :  { %1187 = vmatpush.msrb.mxu2 %v4062_v23  ;;  %1207 = vmatpush.msrb.mxu3 %v4165_v33 }
 0x28b   :  { %3286 = vmatmul.msk.f32.vlgmr.msrb.gmra.mxu0 %vm472_vm4, %v733_v24  ;;  %3289 = vmatmul.msk.f32.vlgmr.msra.gmra.mxu1 %vm472_vm4, %v733_v24 }
 0x28c   :  { %1055 = vmatmul.f32.vlgmr.msra.gmra.mxu2 %v5045_v35  ;;  %1075 = vmatmul.f32.vlgmr.msra.gmra.mxu3 %v5045_v35 }
 0x28d   :  { %1085 = vmatpush.msra.mxu0 %v4175_v34  ;;  %1168 = vmatpush.msrb.mxu1 %v4051_v15 }
 0x28e   :  { %1188 = vmatpush.msrb.mxu2 %v4071_v32  ;;  %1208 = vmatpush.msrb.mxu3 %v4175_v34 }
 0x28f   :  { %1086 = vmatpush.msra.mxu0 %v4183_v38  ;;  %1169 = vmatpush.msrb.mxu1 %v4059_v21 }
 0x290   :  { %1189 = vmatpush.msrb.mxu2 %v4078_v37  ;;  %1209 = vmatpush.msrb.mxu3 %v4183_v38 }
 0x291   :  { %1087 = vmatpush.msra.mxu0 %v4187_v39  ;;  %1170 = vmatpush.msrb.mxu1 %v4069_v30 }
 0x292   :  { %1190 = vmatpush.msrb.mxu2 %v4083_v43  ;;  %1210 = vmatpush.msrb.mxu3 %v4187_v39 }
 0x293   :  { %3287 = vmatmul.msk.f32.gmra.mxu0 %vm472_vm4, %v734_v28  ;;  %3290 = vmatmul.msk.f32.gmra.mxu1 %vm472_vm4, %v734_v28 }
 0x294   :  { %1088 = vmatpush.msra.mxu0 %v4196_v40  ;;  %1171 = vmatpush.msrb.mxu1 %v4076_v36 }
 0x295   :  { %1191 = vmatpush.msrb.mxu2 %v4091_v49  ;;  %1211 = vmatpush.msrb.mxu3 %v4196_v40 }
 0x296   :  { %1089 = vmatpush.msra.mxu0 %v4203_v41  ;;  %1172 = vmatpush.msrb.mxu1 %v4081_v42 }
 0x297   :  { %1192 = vmatpush.msrb.mxu2 %v4100_v56  ;;  %1212 = vmatpush.msrb.mxu3 %v4203_v41 }
 0x298   :  { %1090 = vmatpush.msra.mxu0 %v4207_v44  ;;  %1173 = vmatpush.msrb.mxu1 %v4089_v48 }
 0x299   :  { %1193 = vmatpush.msrb.mxu2 %v4107_v63  ;;  %1213 = vmatpush.msrb.mxu3 %v4207_v44 }
 0x29a   :  { %1091 = vmatpush.msra.mxu0 %v4213_v45  ;;  %1174 = vmatpush.msrb.mxu1 %v4098_v54 }
 0x29b   :  { %1194 = vmatpush.msrb.mxu2 %v4112_v8  ;;  %1214 = vmatpush.msrb.mxu3 %v4213_v45 }
 0x29c   :  { %1092 = vmatpush.msra.mxu0 %v4219_v46  ;;  %1175 = vmatpush.msrb.mxu1 %v4105_v60 }
 0x29d   :  { %1195 = vmatpush.msrb.mxu2 %v4120_v14  ;;  %1215 = vmatpush.msrb.mxu3 %v4219_v46 }
 0x29e   :  { %1093 = vmatpush.msra.mxu0 %v4225_v47  ;;  %1176 = vmatpush.msrb.mxu1 %v4110_v6 }
 0x29f   :  { %1196 = vmatpush.msrb.mxu2 %v4126_v17  ;;  %1216 = vmatpush.msrb.mxu3 %v4225_v47 }
 0x2a0   :  { %1094 = vmatpush.msra.mxu0 %v4231_v50  ;;  %1177 = vmatpush.msrb.mxu1 %v4118_v13 }
 0x2a1   :  { %1095 = vmatmul.f32.vlgmr.msra.gmra.mxu0 %v5045_v35  ;;  %1197 = vmatpush.msrb.mxu2 %v4128_v18 }
 0x2a2   :  { %1217 = vmatpush.msrb.mxu3 %v4231_v50  ;;  %1285 = vmatpush.msrb.mxu0 %v4017_v53 }
 0x2a3   :  { %1305 = vmatpush.msra.mxu1 %v4027_v62  ;;  %1325 = vmatpush.msra.mxu2 %v4133_v25 }
 0x2a4   :  { %1286 = vmatpush.msrb.mxu0 %v4020_v57  ;;  %1408 = vmatpush.msra.mxu3 %v4017_v53 }
 0x2a5   :  { %1306 = vmatpush.msra.mxu1 %v4033_v2  ;;  %1326 = vmatpush.msra.mxu2 %v4139_v26 }
 0x2a6   :  { %1287 = vmatpush.msrb.mxu0 %v4024_v61  ;;  %1409 = vmatpush.msra.mxu3 %v4020_v57 }
 0x2a7   :  { %1307 = vmatpush.msra.mxu1 %v4040_v7  ;;  %1327 = vmatpush.msra.mxu2 %v4143_v27 }
 0x2a8   :  { %1288 = vmatpush.msrb.mxu0 %v4030_v1  ;;  %1410 = vmatpush.msra.mxu3 %v4024_v61 }
 0x2a9   :  { %1308 = vmatpush.msra.mxu1 %v4047_v12  ;;  %1328 = vmatpush.msra.mxu2 %v4153_v29 }
 0x2aa   :  { %1289 = vmatpush.msrb.mxu0 %v4037_v5  ;;  %1411 = vmatpush.msra.mxu3 %v4030_v1 }
 0x2ab   :  { %1309 = vmatpush.msra.mxu1 %v4054_v16  ;;  %1329 = vmatpush.msra.mxu2 %v4161_v31 }
 0x2ac   :  { %1290 = vmatpush.msrb.mxu0 %v4044_v10  ;;  %1412 = vmatpush.msra.mxu3 %v4037_v5 }
 0x2ad   :  { %1310 = vmatpush.msra.mxu1 %v4062_v23  ;;  %1330 = vmatpush.msra.mxu2 %v4165_v33 }
 0x2ae   :  { %1291 = vmatpush.msrb.mxu0 %v4051_v15  ;;  %1413 = vmatpush.msra.mxu3 %v4044_v10 }
 0x2af   :  { %1311 = vmatpush.msra.mxu1 %v4071_v32  ;;  %1331 = vmatpush.msra.mxu2 %v4175_v34 }
 0x2b0   :  { %1292 = vmatpush.msrb.mxu0 %v4059_v21  ;;  %1414 = vmatpush.msra.mxu3 %v4051_v15 }
 0x2b1   :  { %1312 = vmatpush.msra.mxu1 %v4078_v37  ;;  %1332 = vmatpush.msra.mxu2 %v4183_v38 }
 0x2b2   :  { %1293 = vmatpush.msrb.mxu0 %v4069_v30  ;;  %1415 = vmatpush.msra.mxu3 %v4059_v21 }
 0x2b3   :  { %1313 = vmatpush.msra.mxu1 %v4083_v43  ;;  %1333 = vmatpush.msra.mxu2 %v4187_v39 }
 0x2b4   :  { %1294 = vmatpush.msrb.mxu0 %v4076_v36  ;;  %1416 = vmatpush.msra.mxu3 %v4069_v30 }
 0x2b5   :  { %1314 = vmatpush.msra.mxu1 %v4091_v49  ;;  %1334 = vmatpush.msra.mxu2 %v4196_v40 }
 0x2b6   :  { %1295 = vmatpush.msrb.mxu0 %v4081_v42  ;;  %1417 = vmatpush.msra.mxu3 %v4076_v36 }
 0x2b7   :  { %1315 = vmatpush.msra.mxu1 %v4100_v56  ;;  %1335 = vmatpush.msra.mxu2 %v4203_v41 }
 0x2b8   :  { %1296 = vmatpush.msrb.mxu0 %v4089_v48  ;;  %1418 = vmatpush.msra.mxu3 %v4081_v42 }
 0x2b9   :  { %1316 = vmatpush.msra.mxu1 %v4107_v63  ;;  %1336 = vmatpush.msra.mxu2 %v4207_v44 }
 0x2ba   :  { %1297 = vmatpush.msrb.mxu0 %v4098_v54  ;;  %1419 = vmatpush.msra.mxu3 %v4089_v48 }
 0x2bb   :  { %1317 = vmatpush.msra.mxu1 %v4112_v8  ;;  %1337 = vmatpush.msra.mxu2 %v4213_v45 }
 0x2bc   :  { %1298 = vmatpush.msrb.mxu0 %v4105_v60  ;;  %1420 = vmatpush.msra.mxu3 %v4098_v54 }
 0x2bd   :  { %1318 = vmatpush.msra.mxu1 %v4120_v14  ;;  %1338 = vmatpush.msra.mxu2 %v4219_v46 }
 0x2be   :  { %1299 = vmatpush.msrb.mxu0 %v4110_v6  ;;  %1421 = vmatpush.msra.mxu3 %v4105_v60 }
 0x2bf   :  { %1319 = vmatpush.msra.mxu1 %v4126_v17  ;;  %1339 = vmatpush.msra.mxu2 %v4225_v47 }
 0x2c0   :  { %1300 = vmatpush.msrb.mxu0 %v4118_v13  ;;  %1422 = vmatpush.msra.mxu3 %v4110_v6 }
 0x2c1   :  { %1320 = vmatpush.msra.mxu1 %v4128_v18  ;;  %1340 = vmatpush.msra.mxu2 %v4231_v50 }
 0x2c2   :  { %1428 = vmatpush.msra.mxu0 %v4027_v62  ;;  %1423 = vmatpush.msra.mxu3 %v4118_v13 }
 0x2c4   :  { %1429 = vmatpush.msra.mxu0 %v4033_v2 }
 0x2c6   :  { %1430 = vmatpush.msra.mxu0 %v4040_v7 }
 0x2c8   :  { %1431 = vmatpush.msra.mxu0 %v4047_v12 }
 0x2ca   :  { %1432 = vmatpush.msra.mxu0 %v4054_v16 }
 0x2cc   :  { %1433 = vmatpush.msra.mxu0 %v4062_v23 }
 0x2ce   :  { %1434 = vmatpush.msra.mxu0 %v4071_v32 }
 0x2d0   :  { %1435 = vmatpush.msra.mxu0 %v4078_v37 }
 0x2d2   :  { %1436 = vmatpush.msra.mxu0 %v4083_v43 }
 0x2d4   :  { %1437 = vmatpush.msra.mxu0 %v4091_v49 }
 0x2d6   :  { %1438 = vmatpush.msra.mxu0 %v4100_v56 }
 0x2d8   :  { %1439 = vmatpush.msra.mxu0 %v4107_v63 }
 0x2da   :  { %1440 = vmatpush.msra.mxu0 %v4112_v8 }
 0x2dc   :  { %1441 = vmatpush.msra.mxu0 %v4120_v14 }
 0x2de   :  { %1442 = vmatpush.msra.mxu0 %v4126_v17 }
 0x2e0   :  { %1443 = vmatpush.msra.mxu0 %v4128_v18 }
 0x2f8   :  { %v770_v55 = vpop.f32.mrf.mxu0  ;;  %v807_v58 = vpop.f32.mrf.mxu1 }
 0x2f9   :  { %v771_v59 = vadd.f32 %v3373_v51, %v770_v55  ;;  %v808_v0 = vadd.f32 %v3374_v52, %v807_v58  ;;  %v3377_v55 = vld [vmem:[%s5100_s5 + $0x2] ss:$0 sm:$0xff] }
 0x2fa   :  { %v3378_v58 = vld [vmem:[%s5101_s9 + $0x2] ss:$0 sm:$0xff] }
 0x2fb   :  { %776 = vst [vmem:[#allocation5] sm:$0xff] %v771_v59 }
 0x2fc   :  { %813 = vst [vmem:[#allocation6] sm:$0xff] %v808_v0 }
 0x2ff   :  { %v846_v9 = vpop.f32.mrf.mxu2  ;;  %v885_v11 = vpop.f32.mrf.mxu3 }
 0x300   :  { %v847_v19 = vadd.f32 %v3375_v3, %v846_v9  ;;  %v886_v20 = vadd.f32 %v3376_v4, %v885_v11  ;;  %v773_v22 = vpop.f32.mrf.mxu0  ;;  %v810_v24 = vpop.f32.mrf.mxu1 }
 0x301   :  { %v774_v28 = vadd.f32 %v3373_v51, %v773_v22  ;;  %v811_v35 = vadd.f32 %v3374_v52, %v810_v24 }
 0x302   :  { %852 = vst [vmem:[#allocation5 + $0xc] sm:$0xff] %v847_v19  ;;  %v1025_v51 = vld [vmem:[#allocation5] ss:$6 sm:$0x3] }
 0x303   :  { %891 = vst [vmem:[#allocation6 + $0xc] sm:$0xff] %v886_v20 }
 0x304   :  { %777 = vst [vmem:[#allocation5 + $0x8] sm:$0xf] %v774_v28 }
 0x305   :  { %814 = vst [vmem:[#allocation6 + $0x8] sm:$0xf] %v811_v35 }
 0x307   :  { %v849_v59 = vpop.f32.mrf.mxu2  ;;  %v888_v18 = vpop.f32.mrf.mxu3 }
 0x308   :  { %v850_v0 = vadd.f32 %v3375_v3, %v849_v59  ;;  %v889_v13 = vadd.f32 %v3376_v4, %v888_v18  ;;  %v924_v50 = vpop.f32.mrf.mxu0  ;;  %v963_v17 = vpop.f32.mrf.mxu1 }
 0x309   :  { %v925_v6 = vadd.f32 %v3377_v55, %v924_v50  ;;  %v964_v47 = vadd.f32 %v3378_v58, %v963_v17  ;;  %v1030_v28 = vld [vmem:[#allocation5 + $0xc] ss:$6 sm:$0x3] }
 0x30a   :  { %853 = vst [vmem:[#allocation5 + $0x14] sm:$0xf] %v850_v0 }
 0x30b   :  { %892 = vst [vmem:[#allocation6 + $0x14] sm:$0xf] %v889_v13 }
 0x30c   :  { %930 = vst [vmem:[#allocation5 + $0x18] sm:$0xff] %v925_v6  ;;  %v1027_v9 = vld [vmem:[#allocation6 + $0x5] ss:$6 sm:$0x3] }
 0x30d   :  { %969 = vst [vmem:[#allocation6 + $0x18] sm:$0xff] %v964_v47  ;;  %v1028_v52 = vadd.f32 %v1027_v9, %v1025_v51  ;;  %v4331_v9 = vld [vmem:[%s5102_s13] ss:$0 sm:$0xff] }
 0x30f   :  { %v1056_v11 = vpop.f32.mrf.mxu2  ;;  %v1076_v4 = vpop.f32.mrf.mxu3 }
 0x310   :  { %v1099_v19 = vadd.f32 %v1056_v11, %v1028_v52  ;;  %v927_v35 = vpop.f32.mrf.mxu0  ;;  %v966_v20 = vpop.f32.mrf.mxu1 }
 0x311   :  { %v928_v22 = vadd.f32 %v3377_v55, %v927_v35  ;;  %v967_v24 = vadd.f32 %v3378_v58, %v966_v20 }
 0x312   :  { %v3291_v3 = vmul.f32 -1.442695, %v1099_v19  ;;  %v1032_v18 = vld [vmem:[#allocation6 + $0x11] ss:$6 sm:$0x3] }
 0x313   :  { %931 = vst [vmem:[#allocation5 + $0x20] sm:$0xf] %v928_v22  ;;  %v1033_v17 = vadd.f32 %v1032_v18, %v1030_v28 }
 0x314   :  { %3391 = vpow2.f32 %v3291_v3  ;;  %970 = vst [vmem:[#allocation6 + $0x20] sm:$0xf] %v967_v24 }
 0x315   :  { %v1119_v6 = vadd.f32 %v1076_v4, %v1033_v17 }
 0x317   :  { %v3292_v13 = vmul.f32 -1.442695, %v1119_v6 }
 0x319   :  { %3393 = vpow2.f32 %v3292_v13  ;;  %v1035_v13 = vld [vmem:[#allocation5 + $0x18] ss:$6 sm:$0x3] }
 0x31a   :  { %v3392_v47 = vpop.eup %3391 }
 0x31b   :  { %v1103_v50 = vadd.f32 1.0, %v3392_v47  ;;  %v1037_v18 = vld [vmem:[#allocation6 + $0x1d] ss:$6 sm:$0x3] }
 0x31d   :  { %3395 = vrcp.f32 %v1103_v50  ;;  %v1115_v11 = vand.u32 2147483648, %v1103_v50  ;;  %v1113_v20 = vand.u32 2147483647, %v1103_v50  ;;  %vm1109_vm8 = vweird.f32 %v1103_v50 }
 0x31e   :  { %v1096_v52 = vpop.f32.mrf.mxu0 }
 0x31f   :  { %v3394_v59 = vpop.eup %3393  ;;  %v1097_v24 = vadd.f32 %v4331_v9, %v1096_v52  ;;  %v1116_v4 = vor.u32 1.1754944e-38, %v1115_v11  ;;  %vm1114_vm10 = vcmp.eq.f32.partialorder %v1113_v20, 8.507059e+37 }
 0x320   :  { %v1123_v0 = vadd.f32 1.0, %v3394_v59 }
 0x322   :  { %3397 = vrcp.f32 %v1123_v0  ;;  %v1135_v59 = vand.u32 2147483648, %v1123_v0  ;;  %vm1129_vm12 = vweird.f32 %v1123_v0  ;;  %v1133_v60 = vand.u32 2147483647, %v1123_v0 }
 0x323   :  { %v3396_v55 = vpop.eup %3395 }
 0x324   :  { %v1105_v58 = vmul.f32 %v3396_v55, %v1103_v50  ;;  %vm1110_vm7 = vweird.f32 %v3396_v55  ;;  %v1136_v50 = vor.u32 1.1754944e-38, %v1135_v59  ;;  %vm1134_vm14 = vcmp.eq.f32.partialorder %v1133_v60, 8.507059e+37  ;;  %v1155_v60 = vld [vmem:[#allocation6 + $0x10] ss:$6 sm:$0x3] }
 0x325   :  { %vm1111_vm9 = vmor %vm1109_vm8, %vm1110_vm7 }
 0x326   :  { %v1106_v51 = vsub.f32 1.0, %v1105_v58  ;;  %v1038_v58 = vadd.f32 %v1037_v18, %v1035_v13 }
 0x328   :  { %v3398_v19 = vpop.eup %3397  ;;  %v1107_v35 = vmul.f32 %v3396_v55, %v1106_v51 }
 0x329   :  { %v1125_v22 = vmul.f32 %v3398_v19, %v1123_v0  ;;  %vm1130_vm11 = vweird.f32 %v3398_v19  ;;  %v1153_v0 = vld [vmem:[#allocation5 + $0xd] ss:$6 sm:$0x3] }
 0x32a   :  { %v1108_v28 = vadd.f32 %v3396_v55, %v1107_v35  ;;  %vm1131_vm13 = vmor %vm1129_vm12, %vm1130_vm11 }
 0x32b   :  { %v1126_v3 = vsub.f32 1.0, %v1125_v22 }
 0x32c   :  { %v1112_v17 = vsel %vm1111_vm9, %v3396_v55, %v1108_v28 }
 0x32d   :  { %v1127_v6 = vmul.f32 %v3398_v19, %v1126_v3  ;;  %v1117_v47 = vsel %vm1114_vm10, %v1116_v4, %v1112_v17 }
 0x32e   :  { %v1139_v51 = vmul.f32 %v1117_v47, %v1097_v24 }
 0x32f   :  { %v1128_v14 = vadd.f32 %v3398_v19, %v1127_v6 }
 0x330   :  { %v1140_v52 = vadd.f32 %v1139_v51, %v1038_v58 }
 0x331   :  { %v1132_v35 = vsel %vm1131_vm13, %v3398_v19, %v1128_v14  ;;  %v1156_v19 = vadd.f32 %v1155_v60, %v1153_v0 }
 0x332   :  { %3399 = vtanh.f32 %v1140_v52  ;;  %v1137_v22 = vsel %vm1134_vm14, %v1136_v50, %v1132_v35 }
 0x333   :  { %v1142_v11 = vsub.f32 1.0, %v1137_v22  ;;  %v1144_v28 = vmul.f32 0.0, %v1137_v22 }
 0x338   :  { %v3400_v55 = vpop.eup %3399 }
 0x339   :  { %v1143_v20 = vmul.f32 %v3400_v55, %v1142_v11 }
 0x33b   :  { %v4334_v3 = vadd.f32 %v1144_v28, %v1143_v20  ;;  %v1160_v20 = vld [vmem:[#allocation6 + $0x1c] ss:$6 sm:$0x3] }
 0x33d   :  { %1146 = vst [vmem:[#allocation7] sm:$0x3] %v4334_v3  ;;  %1178 = vmatmul.f32.vlgmr.msrb.gmra.mxu1 %v4334_v3  ;;  %1198 = vmatmul.f32.vlgmr.msrb.gmra.mxu2 %v4334_v3 }
 0x33e   :  { %1218 = vmatmul.f32.vlgmr.msrb.gmra.mxu3 %v4334_v3  ;;  %1448 = vmatpush.msrb.mxu1 %v4133_v25 }
 0x33f   :  { %1531 = vmatpush.msrb.mxu2 %v4017_v53  ;;  %1551 = vmatpush.msrb.mxu3 %v4027_v62  ;;  %v5103_v53 = vld [vmem:[#allocation37_spill] sm:$0xff]  ;;  %v5106_v62 = vld [vmem:[#allocation38_spill] sm:$0xff] }
 0x340   :  { %1449 = vmatpush.msrb.mxu1 %v4139_v26 }
 0x341   :  { %1532 = vmatpush.msrb.mxu2 %v4020_v57  ;;  %1552 = vmatpush.msrb.mxu3 %v4033_v2  ;;  %v5104_v57 = vld [vmem:[#allocation40_spill] sm:$0xff] }
 0x342   :  { %1450 = vmatpush.msrb.mxu1 %v4143_v27  ;;  %v5108_v2 = vld [vmem:[#allocation44_spill] sm:$0xff] }
 0x343   :  { %1533 = vmatpush.msrb.mxu2 %v4024_v61  ;;  %1553 = vmatpush.msrb.mxu3 %v4040_v7  ;;  %v5105_v61 = vld [vmem:[#allocation43_spill] sm:$0xff]  ;;  %v5110_v7 = vld [vmem:[#allocation42_spill] sm:$0xff] }
 0x344   :  { %1451 = vmatpush.msrb.mxu1 %v4153_v29 }
 0x345   :  { %1534 = vmatpush.msrb.mxu2 %v4030_v1  ;;  %1554 = vmatpush.msrb.mxu3 %v4047_v12  ;;  %v5107_v1 = vld [vmem:[#allocation41_spill] sm:$0xff] }
 0x346   :  { %1452 = vmatpush.msrb.mxu1 %v4161_v31  ;;  %v1148_v12 = vld [vmem:[#allocation5 + $0x1] ss:$6 sm:$0x3] }
 0x347   :  { %1535 = vmatpush.msrb.mxu2 %v4037_v5  ;;  %1555 = vmatpush.msrb.mxu3 %v4054_v16  ;;  %v5109_v5 = vld [vmem:[#allocation39_spill] sm:$0xff] }
 0x348   :  { %1453 = vmatpush.msrb.mxu1 %v4165_v33 }
 0x349   :  { %1536 = vmatpush.msrb.mxu2 %v4044_v10  ;;  %1556 = vmatpush.msrb.mxu3 %v4062_v23  ;;  %v1150_v10 = vld [vmem:[#allocation6 + $0x4] ss:$6 sm:$0x3] }
 0x34a   :  { %1454 = vmatpush.msrb.mxu1 %v4175_v34 }
 0x34b   :  { %1537 = vmatpush.msrb.mxu2 %v4051_v15  ;;  %1557 = vmatpush.msrb.mxu3 %v4071_v32  ;;  %v1151_v15 = vadd.f32 %v1150_v10, %v1148_v12 }
 0x34c   :  { %1455 = vmatpush.msrb.mxu1 %v4183_v38 }
 0x34d   :  { %1538 = vmatpush.msrb.mxu2 %v4059_v21  ;;  %1558 = vmatpush.msrb.mxu3 %v4078_v37 }
 0x34e   :  { %1456 = vmatpush.msrb.mxu1 %v4187_v39 }
 0x34f   :  { %1539 = vmatpush.msrb.mxu2 %v4069_v30  ;;  %1559 = vmatpush.msrb.mxu3 %v4083_v43 }
 0x350   :  { %1457 = vmatpush.msrb.mxu1 %v4196_v40 }
 0x351   :  { %1540 = vmatpush.msrb.mxu2 %v4076_v36  ;;  %1560 = vmatpush.msrb.mxu3 %v4091_v49 }
 0x352   :  { %1458 = vmatpush.msrb.mxu1 %v4203_v41 }
 0x353   :  { %1541 = vmatpush.msrb.mxu2 %v4081_v42  ;;  %1561 = vmatpush.msrb.mxu3 %v4100_v56 }
 0x354   :  { %1459 = vmatpush.msrb.mxu1 %v4207_v44 }
 0x355   :  { %1542 = vmatpush.msrb.mxu2 %v4089_v48  ;;  %1562 = vmatpush.msrb.mxu3 %v4107_v63 }
 0x356   :  { %1460 = vmatpush.msrb.mxu1 %v4213_v45 }
 0x357   :  { %1543 = vmatpush.msrb.mxu2 %v4098_v54  ;;  %1563 = vmatpush.msrb.mxu3 %v4112_v8 }
 0x358   :  { %1461 = vmatpush.msrb.mxu1 %v4219_v46 }
 0x359   :  { %1544 = vmatpush.msrb.mxu2 %v5103_v53  ;;  %1564 = vmatpush.msrb.mxu3 %v5104_v57 }
 0x35a   :  { %1462 = vmatpush.msrb.mxu1 %v5105_v61 }
 0x35b   :  { %1545 = vmatpush.msrb.mxu2 %v5106_v62  ;;  %1565 = vmatpush.msrb.mxu3 %v5107_v1 }
 0x35c   :  { %1463 = vmatpush.msrb.mxu1 %v5108_v2 }
 0x35d   :  { %1546 = vmatpush.msrb.mxu2 %v5109_v5  ;;  %1566 = vmatpush.msrb.mxu3 %v5110_v7 }
 0x3ba   :  { %v1179_v16 = vpop.f32.mrf.mxu1 }
 0x3bb   :  { %v1222_v21 = vadd.f32 %v1179_v16, %v1151_v15  ;;  %v1158_v15 = vld [vmem:[#allocation5 + $0x19] ss:$6 sm:$0x3] }
 0x3bc   :  { %v1161_v60 = vadd.f32 %v1160_v20, %v1158_v15  ;;  %v3524_v20 = vld [vmem:[#allocation16 + $0xe8] sm:$0xff]  ;;  %v3528_v15 = vld [vmem:[#allocation16 + $0xd8] sm:$0xff] }
 0x3bd   :  { %v3293_v14 = vmul.f32 -1.442695, %v1222_v21 }
 0x3bf   :  { %3401 = vpow2.f32 %v3293_v14 }
 0x3c0   :  { %v1199_v24 = vpop.f32.mrf.mxu2 }
 0x3c1   :  { %v1242_v18 = vadd.f32 %v1199_v24, %v1156_v19  ;;  %v1219_v11 = vpop.f32.mrf.mxu3 }
 0x3c2   :  { %v1220_v16 = vadd.f32 %v4331_v9, %v1219_v11  ;;  %v3521_v11 = vld [vmem:[#allocation16 + $0x70] sm:$0xff] }
 0x3c3   :  { %v3294_v4 = vmul.f32 -1.442695, %v1242_v18 }
 0x3c5   :  { %v3402_v17 = vpop.eup %3401  ;;  %3403 = vpow2.f32 %v3294_v4 }
 0x3c6   :  { %v1226_v6 = vadd.f32 1.0, %v3402_v17 }
 0x3c8   :  { %3405 = vrcp.f32 %v1226_v6  ;;  %v1238_v52 = vand.u32 2147483648, %v1226_v6  ;;  %v1236_v50 = vand.u32 2147483647, %v1226_v6  ;;  %vm1232_vm0 = vweird.f32 %v1226_v6 }
 0x3ca   :  { %v1239_v10 = vor.u32 1.1754944e-38, %v1238_v52  ;;  %vm1237_vm2 = vcmp.eq.f32.partialorder %v1236_v50, 8.507059e+37 }
 0x3cb   :  { %v3404_v13 = vpop.eup %3403 }
 0x3cc   :  { %v1246_v47 = vadd.f32 1.0, %v3404_v13 }
 0x3ce   :  { %v3406_v59 = vpop.eup %3405  ;;  %3407 = vrcp.f32 %v1246_v47  ;;  %v1258_v19 = vand.u32 2147483648, %v1246_v47  ;;  %v1256_v18 = vand.u32 2147483647, %v1246_v47  ;;  %vm1252_vm6 = vweird.f32 %v1246_v47 }
 0x3cf   :  { %v1228_v58 = vmul.f32 %v3406_v59, %v1226_v6  ;;  %vm1233_vm15 = vweird.f32 %v3406_v59 }
 0x3d0   :  { %vm1234_vm1 = vmor %vm1232_vm0, %vm1233_vm15  ;;  %v1259_v6 = vor.u32 1.1754944e-38, %v1258_v19  ;;  %vm1257_vm8 = vcmp.eq.f32.partialorder %v1256_v18, 8.507059e+37 }
 0x3d1   :  { %v1229_v51 = vsub.f32 1.0, %v1228_v58 }
 0x3d3   :  { %v1230_v35 = vmul.f32 %v3406_v59, %v1229_v51 }
 0x3d4   :  { %v3408_v22 = vpop.eup %3407 }
 0x3d5   :  { %v1248_v55 = vmul.f32 %v3408_v22, %v1246_v47  ;;  %v1231_v28 = vadd.f32 %v3406_v59, %v1230_v35  ;;  %vm1253_vm5 = vweird.f32 %v3408_v22  ;;  %v3519_v47 = vld [vmem:[#allocation16 + $0x78] sm:$0xff] }
 0x3d6   :  { %vm1254_vm7 = vmor %vm1252_vm6, %vm1253_vm5 }
 0x3d7   :  { %v1249_v12 = vsub.f32 1.0, %v1248_v55  ;;  %v1235_v21 = vsel %vm1234_vm1, %v3406_v59, %v1231_v28  ;;  %v3523_v55 = vld [vmem:[#allocation16 + $0x68] sm:$0xff]  ;;  %v3525_v28 = vld [vmem:[#allocation16 + $0x60] sm:$0xff] }
 0x3d8   :  { %v1240_v14 = vsel %vm1237_vm2, %v1239_v10, %v1235_v21  ;;  %v3526_v10 = vld [vmem:[#allocation16 + $0xe0] sm:$0xff]  ;;  %v3530_v21 = vld [vmem:[#allocation16 + $0x48] sm:$0xff] }
 0x3d9   :  { %v1250_v0 = vmul.f32 %v3408_v22, %v1249_v12  ;;  %v1262_v24 = vmul.f32 %v1240_v14, %v1220_v16  ;;  %v3527_v12 = vld [vmem:[#allocation16 + $0x58] sm:$0xff]  ;;  %v3529_v16 = vld [vmem:[#allocation16 + $0x50] sm:$0xff] }
 0x3db   :  { %v1251_v4 = vadd.f32 %v3408_v22, %v1250_v0  ;;  %v1263_v17 = vadd.f32 %v1262_v24, %v1161_v60  ;;  %v3531_v60 = vld [vmem:[#allocation16 + $0x40] sm:$0xff] }
 0x3dd   :  { %v1255_v13 = vsel %vm1254_vm7, %v3408_v22, %v1251_v4  ;;  %3409 = vtanh.f32 %v1263_v17  ;;  %v3520_v22 = vld [vmem:[#allocation16 + $0xf8] sm:$0xff] }
 0x3de   :  { %v1260_v58 = vsel %vm1257_vm8, %v1259_v6, %v1255_v13  ;;  %v1281_v13 = vld [vmem:[#allocation5 + $0x1a] ss:$6 sm:$0x3] }
 0x3df   :  { %v1265_v51 = vsub.f32 1.0, %v1260_v58  ;;  %v1267_v35 = vmul.f32 %v1260_v58, %v4334_v3  ;;  %v3522_v3 = vld [vmem:[#allocation16 + $0xf0] sm:$0xff] }
 0x3e3   :  { %v3410_v52 = vpop.eup %3409 }
 0x3e4   :  { %v1266_v59 = vmul.f32 %v3410_v52, %v1265_v51  ;;  %v1283_v51 = vld [vmem:[#allocation6 + $0x1b] ss:$6 sm:$0x3] }
 0x3e6   :  { %v4390_v50 = vadd.f32 %v1267_v35, %v1266_v59 }
 0x3e8   :  { %1269 = vst [vmem:[#allocation7 + $0x2] sm:$0x3] %v4390_v50  ;;  %1301 = vmatmul.f32.vlgmr.msrb.gmra.mxu0 %v4390_v50  ;;  %1321 = vmatmul.f32.vlgmr.msra.gmra.mxu1 %v4390_v50 }
 0x3e9   :  { %1341 = vmatmul.f32.vlgmr.msra.gmra.mxu2 %v4390_v50  ;;  %1571 = vmatpush.msrb.mxu0 %v4133_v25 }
 0x3ea   :  { %1653 = vmatpush.msra.mxu1 %v3519_v47  ;;  %1673 = vmatpush.msra.mxu2 %v3520_v22 }
 0x3eb   :  { %1572 = vmatpush.msrb.mxu0 %v4139_v26 }
 0x3ec   :  { %1654 = vmatpush.msra.mxu1 %v3521_v11  ;;  %1674 = vmatpush.msra.mxu2 %v3522_v3  ;;  %v1284_v3 = vadd.f32 %v1283_v51, %v1281_v13 }
 0x3ed   :  { %1573 = vmatpush.msrb.mxu0 %v4143_v27 }
 0x3ee   :  { %1655 = vmatpush.msra.mxu1 %v3523_v55  ;;  %1675 = vmatpush.msra.mxu2 %v3524_v20 }
 0x3ef   :  { %1574 = vmatpush.msrb.mxu0 %v4153_v29 }
 0x3f0   :  { %1656 = vmatpush.msra.mxu1 %v3525_v28  ;;  %1676 = vmatpush.msra.mxu2 %v3526_v10 }
 0x3f1   :  { %1575 = vmatpush.msrb.mxu0 %v4161_v31 }
 0x3f2   :  { %1657 = vmatpush.msra.mxu1 %v3527_v12  ;;  %1677 = vmatpush.msra.mxu2 %v3528_v15 }
 0x3f3   :  { %1576 = vmatpush.msrb.mxu0 %v4165_v33 }
 0x3f4   :  { %1658 = vmatpush.msra.mxu1 %v3529_v16  ;;  %1678 = vmatpush.msra.mxu2 %v4062_v23  ;;  %v1271_v23 = vld [vmem:[#allocation5 + $0x2] ss:$6 sm:$0x3] }
 0x3f5   :  { %1577 = vmatpush.msrb.mxu0 %v4175_v34 }
 0x3f6   :  { %1659 = vmatpush.msra.mxu1 %v3530_v21  ;;  %1679 = vmatpush.msra.mxu2 %v4071_v32  ;;  %v1276_v32 = vld [vmem:[#allocation5 + $0xe] ss:$6 sm:$0x3] }
 0x3f7   :  { %1578 = vmatpush.msrb.mxu0 %v4183_v38 }
 0x3f8   :  { %1660 = vmatpush.msra.mxu1 %v3531_v60  ;;  %1680 = vmatpush.msra.mxu2 %v4078_v37 }
 0x3f9   :  { %1579 = vmatpush.msrb.mxu0 %v4187_v39 }
 0x3fa   :  { %1661 = vmatpush.msra.mxu1 %v4069_v30  ;;  %1681 = vmatpush.msra.mxu2 %v4083_v43  ;;  %v1273_v30 = vld [vmem:[#allocation6 + $0x3] ss:$6 sm:$0x3] }
 0x3fb   :  { %1580 = vmatpush.msrb.mxu0 %v4196_v40  ;;  %v1274_v37 = vadd.f32 %v1273_v30, %v1271_v23 }
 0x3fc   :  { %1662 = vmatpush.msra.mxu1 %v4076_v36  ;;  %1682 = vmatpush.msra.mxu2 %v4091_v49  ;;  %v1278_v36 = vld [vmem:[#allocation6 + $0xf] ss:$6 sm:$0x3] }
 0x3fd   :  { %1581 = vmatpush.msrb.mxu0 %v4203_v41 }
 0x3fe   :  { %1663 = vmatpush.msra.mxu1 %v4081_v42  ;;  %1683 = vmatpush.msra.mxu2 %v4100_v56  ;;  %v1279_v42 = vadd.f32 %v1278_v36, %v1276_v32 }
 0x3ff   :  { %1582 = vmatpush.msrb.mxu0 %v4207_v44 }
 0x400   :  { %1664 = vmatpush.msra.mxu1 %v4089_v48  ;;  %1684 = vmatpush.msra.mxu2 %v4107_v63 }
 0x401   :  { %1583 = vmatpush.msrb.mxu0 %v4213_v45 }
 0x402   :  { %1665 = vmatpush.msra.mxu1 %v4098_v54  ;;  %1685 = vmatpush.msra.mxu2 %v4112_v8 }
 0x403   :  { %1584 = vmatpush.msrb.mxu0 %v4219_v46 }
 0x404   :  { %1666 = vmatpush.msra.mxu1 %v5103_v53  ;;  %1686 = vmatpush.msra.mxu2 %v5104_v57 }
 0x405   :  { %1585 = vmatpush.msrb.mxu0 %v5105_v61 }
 0x406   :  { %1667 = vmatpush.msra.mxu1 %v5106_v62  ;;  %1687 = vmatpush.msra.mxu2 %v5107_v1 }
 0x407   :  { %1586 = vmatpush.msrb.mxu0 %v5108_v2 }
 0x408   :  { %1668 = vmatpush.msra.mxu1 %v5109_v5  ;;  %1688 = vmatpush.msra.mxu2 %v5110_v7 }
 0x465   :  { %v1302_v43 = vpop.f32.mrf.mxu0  ;;  %v1322_v48 = vpop.f32.mrf.mxu1 }
 0x466   :  { %v1345_v49 = vadd.f32 %v1302_v43, %v1274_v37  ;;  %v1365_v54 = vadd.f32 %v1322_v48, %v1279_v42 }
 0x468   :  { %v3295_v56 = vmul.f32 -1.442695, %v1345_v49  ;;  %v3296_v63 = vmul.f32 -1.442695, %v1365_v54 }
 0x46a   :  { %3411 = vpow2.f32 %v3295_v56 }
 0x46b   :  { %3413 = vpow2.f32 %v3296_v63 }
 0x46c   :  { %v1342_v6 = vpop.f32.mrf.mxu2 }
 0x46d   :  { %v1343_v59 = vadd.f32 %v4331_v9, %v1342_v6 }
 0x470   :  { %v3412_v8 = vpop.eup %3411 }
 0x471   :  { %v3414_v53 = vpop.eup %3413  ;;  %v1349_v57 = vadd.f32 1.0, %v3412_v8 }
 0x472   :  { %v1369_v62 = vadd.f32 1.0, %v3414_v53  ;;  %v1404_v53 = vld [vmem:[#allocation5 + $0x1b] ss:$6 sm:$0x3] }
 0x473   :  { %3415 = vrcp.f32 %v1349_v57  ;;  %v1361_v24 = vand.u32 2147483648, %v1349_v57  ;;  %v1359_v4 = vand.u32 2147483647, %v1349_v57  ;;  %vm1355_vm10 = vweird.f32 %v1349_v57 }
 0x474   :  { %3417 = vrcp.f32 %v1369_v62  ;;  %v1381_v11 = vand.u32 2147483648, %v1369_v62  ;;  %vm1375_vm14 = vweird.f32 %v1369_v62  ;;  %v1379_v20 = vand.u32 2147483647, %v1369_v62 }
 0x475   :  { %v1362_v52 = vor.u32 1.1754944e-38, %v1361_v24  ;;  %vm1360_vm12 = vcmp.eq.f32.partialorder %v1359_v4, 8.507059e+37 }
 0x476   :  { %v1382_v12 = vor.u32 1.1754944e-38, %v1381_v11  ;;  %vm1380_vm0 = vcmp.eq.f32.partialorder %v1379_v20, 8.507059e+37 }
 0x479   :  { %v3416_v1 = vpop.eup %3415 }
 0x47a   :  { %v3418_v5 = vpop.eup %3417  ;;  %v1351_v7 = vmul.f32 %v3416_v1, %v1349_v57  ;;  %vm1356_vm9 = vweird.f32 %v3416_v1 }
 0x47b   :  { %v1371_v14 = vmul.f32 %v3418_v5, %v1369_v62  ;;  %vm1357_vm11 = vmor %vm1355_vm10, %vm1356_vm9  ;;  %vm1376_vm13 = vweird.f32 %v3418_v5  ;;  %v1406_v62 = vld [vmem:[#allocation6 + $0x1a] ss:$6 sm:$0x3] }
 0x47c   :  { %v1352_v0 = vsub.f32 1.0, %v1351_v7  ;;  %vm1377_vm15 = vmor %vm1375_vm14, %vm1376_vm13  ;;  %v1407_v24 = vadd.f32 %v1406_v62, %v1404_v53 }
 0x47d   :  { %v1372_v19 = vsub.f32 1.0, %v1371_v14 }
 0x47e   :  { %v1353_v18 = vmul.f32 %v3416_v1, %v1352_v0 }
 0x47f   :  { %v1373_v17 = vmul.f32 %v3418_v5, %v1372_v19 }
 0x480   :  { %v1354_v58 = vadd.f32 %v3416_v1, %v1353_v18 }
 0x481   :  { %v1374_v47 = vadd.f32 %v3418_v5, %v1373_v17 }
 0x482   :  { %v1358_v35 = vsel %vm1357_vm11, %v3416_v1, %v1354_v58 }
 0x483   :  { %v1363_v22 = vsel %vm1360_vm12, %v1362_v52, %v1358_v35  ;;  %v1378_v10 = vsel %vm1377_vm15, %v3418_v5, %v1374_v47  ;;  %v1761_v35 = vlaneseq }
 0x484   :  { %v1385_v55 = vmul.f32 %v1363_v22, %v1343_v59  ;;  %v1383_v15 = vsel %vm1380_vm0, %v1382_v12, %v1378_v10  ;;  %v1517_v12 = vld [vmem:[#allocation5 + $0x4] ss:$6 sm:$0x3] }
 0x485   :  { %v1388_v16 = vsub.f32 1.0, %v1383_v15  ;;  %v1390_v23 = vmul.f32 %v1383_v15, %v4390_v50  ;;  %v4463_v22 = vand.u32 127, %v1761_v35  ;;  %v1522_v15 = vld [vmem:[#allocation5 + $0x10] ss:$6 sm:$0x3] }
 0x486   :  { %v1386_v28 = vadd.f32 %v1385_v55, %v1284_v3  ;;  %v1641_v35 = vld [vmem:[#allocation6] ss:$6 sm:$0x3] }
 0x487   :  { %5111 = vst [vmem:[#allocation37_spill] sm:$0xff] %v4463_v22  ;;  %vm1763_vm11 = vcmp.lt.s32.totalorder %v4463_v22, 64 }
 0x488   :  { %3419 = vtanh.f32 %v1386_v28 }
 0x48e   :  { %v3420_v21 = vpop.eup %3419 }
 0x48f   :  { %v1389_v60 = vmul.f32 %v3420_v21, %v1388_v16  ;;  %v1519_v16 = vld [vmem:[#allocation6 + $0x1] ss:$6 sm:$0x3]  ;;  %v1524_v21 = vld [vmem:[#allocation6 + $0xd] ss:$6 sm:$0x3] }
 0x491   :  { %v4433_v30 = vadd.f32 %v1390_v23, %v1389_v60  ;;  %v1520_v60 = vadd.f32 %v1519_v16, %v1517_v12  ;;  %v1525_v23 = vadd.f32 %v1524_v21, %v1522_v15  ;;  %v1849_v12 = vld [vmem:[#allocation19 + $0x70] sm:$0xff] }
 0x492   :  { %v1895_v15 = vld [vmem:[#allocation17 + $0xf0] sm:$0xff] }
 0x493   :  { %1392 = vst [vmem:[#allocation7 + $0x4] sm:$0x3] %v4433_v30  ;;  %1424 = vmatmul.f32.vlgmr.msra.gmra.mxu3 %v4433_v30  ;;  %1444 = vmatmul.f32.vlgmr.msra.gmra.mxu0 %v4433_v30  ;;  %v1644_v16 = vld [vmem:[#allocation5 + $0x11] ss:$6 sm:$0x3] }
 0x494   :  { %1464 = vmatmul.f32.vlgmr.msrb.gmra.mxu1 %v4433_v30  ;;  %1693 = vmatpush.msra.mxu3 %v4133_v25  ;;  %v1399_v25 = vld [vmem:[#allocation5 + $0xf] ss:$6 sm:$0x3] }
 0x496   :  { %1694 = vmatpush.msra.mxu3 %v4139_v26  ;;  %v1401_v26 = vld [vmem:[#allocation6 + $0xe] ss:$6 sm:$0x3] }
 0x498   :  { %1695 = vmatpush.msra.mxu3 %v4143_v27  ;;  %v1402_v27 = vadd.f32 %v1401_v26, %v1399_v25 }
 0x49a   :  { %1696 = vmatpush.msra.mxu3 %v4153_v29  ;;  %v1772_v11 = vld [vmem:[#allocation7 + $0x4] sm:$0x3] }
 0x49b   :  { %v1777_v20 = vld [vmem:[#allocation7 + $0x4] sm:$0x3] }
 0x49c   :  { %1697 = vmatpush.msra.mxu3 %v4161_v31 }
 0x49e   :  { %1698 = vmatpush.msra.mxu3 %v4165_v33  ;;  %v1394_v33 = vld [vmem:[#allocation5 + $0x3] ss:$6 sm:$0x3] }
 0x4a0   :  { %1699 = vmatpush.msra.mxu3 %v4175_v34  ;;  %v1396_v34 = vld [vmem:[#allocation6 + $0x2] ss:$6 sm:$0x3] }
 0x4a2   :  { %1700 = vmatpush.msra.mxu3 %v4183_v38 }
 0x4a4   :  { %1701 = vmatpush.msra.mxu3 %v4187_v39  ;;  %v1397_v39 = vadd.f32 %v1396_v34, %v1394_v33 }
 0x4a6   :  { %1702 = vmatpush.msra.mxu3 %v4196_v40 }
 0x4a8   :  { %1703 = vmatpush.msra.mxu3 %v4203_v41 }
 0x4aa   :  { %1704 = vmatpush.msra.mxu3 %v4207_v44 }
 0x4ac   :  { %1705 = vmatpush.msra.mxu3 %v4213_v45 }
 0x4ae   :  { %1706 = vmatpush.msra.mxu3 %v4219_v46 }
 0x4b0   :  { %1707 = vmatpush.msra.mxu3 %v5105_v61 }
 0x4b2   :  { %1708 = vmatpush.msra.mxu3 %v5108_v2 }
 0x510   :  { %v1445_v29 = vpop.f32.mrf.mxu0 }
 0x511   :  { %v1488_v31 = vadd.f32 %v1445_v29, %v1402_v27  ;;  %v1465_v63 = vpop.f32.mrf.mxu1 }
 0x512   :  { %v1466_v1 = vadd.f32 %v4331_v9, %v1465_v63 }
 0x513   :  { %v3298_v38 = vmul.f32 -1.442695, %v1488_v31 }
 0x515   :  { %3421 = vpow2.f32 %v3298_v38 }
 0x516   :  { %v1425_v40 = vpop.f32.mrf.mxu3 }
 0x517   :  { %v1468_v41 = vadd.f32 %v1425_v40, %v1397_v39 }
 0x519   :  { %v3297_v44 = vmul.f32 -1.442695, %v1468_v41 }
 0x51b   :  { %v3422_v45 = vpop.eup %3421  ;;  %3423 = vpow2.f32 %v3297_v44 }
 0x51c   :  { %v1492_v46 = vadd.f32 1.0, %v3422_v45 }
 0x51e   :  { %3425 = vrcp.f32 %v1492_v46  ;;  %v1504_v0 = vand.u32 2147483648, %v1492_v46  ;;  %vm1498_vm8 = vweird.f32 %v1492_v46  ;;  %v1502_v18 = vand.u32 2147483647, %v1492_v46 }
 0x520   :  { %v1505_v6 = vor.u32 1.1754944e-38, %v1504_v0  ;;  %vm1503_vm10 = vcmp.eq.f32.partialorder %v1502_v18, 8.507059e+37 }
 0x521   :  { %v3424_v61 = vpop.eup %3423 }
 0x522   :  { %v1472_v50 = vadd.f32 1.0, %v3424_v61 }
 0x524   :  { %3427 = vrcp.f32 %v1472_v50  ;;  %v3426_v2 = vpop.eup %3425  ;;  %v1484_v48 = vand.u32 2147483648, %v1472_v50  ;;  %v1482_v54 = vand.u32 2147483647, %v1472_v50  ;;  %vm1478_vm2 = vweird.f32 %v1472_v50 }
 0x525   :  { %v1494_v32 = vmul.f32 %v3426_v2, %v1492_v46  ;;  %vm1499_vm7 = vweird.f32 %v3426_v2 }
 0x526   :  { %v1485_v57 = vor.u32 1.1754944e-38, %v1484_v48  ;;  %vm1483_vm6 = vcmp.eq.f32.partialorder %v1482_v54, 8.507059e+37  ;;  %vm1500_vm9 = vmor %vm1498_vm8, %vm1499_vm7  ;;  %v1527_v48 = vld [vmem:[#allocation5 + $0x1c] ss:$6 sm:$0x3] }
 0x527   :  { %v1495_v42 = vsub.f32 1.0, %v1494_v32 }
 0x529   :  { %v1496_v56 = vmul.f32 %v3426_v2, %v1495_v42 }
 0x52a   :  { %v3428_v36 = vpop.eup %3427 }
 0x52b   :  { %v1474_v37 = vmul.f32 %v3428_v36, %v1472_v50  ;;  %vm1479_vm1 = vweird.f32 %v3428_v36  ;;  %v1497_v7 = vadd.f32 %v3426_v2, %v1496_v56 }
 0x52c   :  { %vm1480_vm5 = vmor %vm1478_vm2, %vm1479_vm1 }
 0x52d   :  { %v1475_v43 = vsub.f32 1.0, %v1474_v37  ;;  %v1501_v17 = vsel %vm1500_vm9, %v3426_v2, %v1497_v7 }
 0x52e   :  { %v1506_v13 = vsel %vm1503_vm10, %v1505_v6, %v1501_v17  ;;  %v1768_v17 = vld [vmem:[#allocation7 + $0x2] sm:$0x3] }
 0x52f   :  { %v1476_v49 = vmul.f32 %v3428_v36, %v1475_v43  ;;  %v1511_v58 = vsub.f32 1.0, %v1506_v13  ;;  %v1513_v59 = vmul.f32 %v1506_v13, %v4433_v30 }
 0x531   :  { %v1477_v8 = vadd.f32 %v3428_v36, %v1476_v49 }
 0x533   :  { %v1481_v5 = vsel %vm1480_vm5, %v3428_v36, %v1477_v8  ;;  %v1529_v8 = vld [vmem:[#allocation6 + $0x19] ss:$6 sm:$0x3] }
 0x534   :  { %v1486_v14 = vsel %vm1483_vm6, %v1485_v57, %v1481_v5  ;;  %v1530_v62 = vadd.f32 %v1529_v8, %v1527_v48  ;;  %v1938_v8 = vld [vmem:[#allocation19 + $0xd0] sm:$0xff] }
 0x535   :  { %v1508_v19 = vmul.f32 %v1486_v14, %v1466_v1 }
 0x537   :  { %v1509_v4 = vadd.f32 %v1508_v19, %v1407_v24 }
 0x539   :  { %3429 = vtanh.f32 %v1509_v4 }
 0x53f   :  { %v3430_v51 = vpop.eup %3429 }
 0x540   :  { %v1512_v52 = vmul.f32 %v3430_v51, %v1511_v58  ;;  %v1781_v58 = vld [vmem:[#allocation7 + $0x2] sm:$0x3] }
 0x542   :  { %v4457_v47 = vadd.f32 %v1513_v59, %v1512_v52  ;;  %v1640_v59 = vld [vmem:[#allocation5 + $0x5] ss:$6 sm:$0x3] }
 0x544   :  { %1515 = vst [vmem:[#allocation7 + $0x6] sm:$0x3] %v4457_v47  ;;  %1547 = vmatmul.f32.vlgmr.msrb.gmra.mxu2 %v4457_v47  ;;  %1567 = vmatmul.f32.vlgmr.msrb.gmra.mxu3 %v4457_v47 }
 0x545   :  { %1587 = vmatmul.f32.vlgmr.msrb.gmra.mxu0 %v4457_v47 }
 0x54b   :  { %v1773_v3 = vld [vmem:[#allocation7 + $0x6] sm:$0x3] }
 0x54c   :  { %v1776_v55 = vld [vmem:[#allocation7 + $0x6] sm:$0x3]  ;;  %v1774_v28 = vsel %vm1763_vm11, %v1772_v11, %v1773_v3  ;;  %v1805_v11 = vld [vmem:[#allocation17 + $0x78] sm:$0xff] }
 0x54d   :  { %v1778_v10 = vsel %vm1763_vm11, %v1776_v55, %v1777_v20  ;;  %1775 = vst [vmem:[#allocation8 + $0x4] sm:$0x3] %v1774_v28  ;;  %v1850_v3 = vld [vmem:[#allocation19 + $0x78] sm:$0xff]  ;;  %1810 = vmatpush.msra.mxu0 %v1805_v11 }
 0x54e   :  { %1779 = vst [vmem:[#allocation8 + $0x6] sm:$0x3] %v1778_v10  ;;  %v1896_v55 = vld [vmem:[#allocation17 + $0xf8] sm:$0xff]  ;;  %1855 = vmatpush.msrb.mxu1 %v1850_v3  ;;  %v1804_v10 = vld [vmem:[#allocation17 + $0x70] sm:$0xff] }
 0x54f   :  { %1902 = vmatpush.msrb.mxu2 %v1896_v55  ;;  %1811 = vmatpush.msra.mxu0 %v1804_v10  ;;  %v1838_v11 = vld [vmem:[#allocation19 + $0x18] sm:$0xff]  ;;  %v1933_v55 = vld [vmem:[#allocation19 + $0xa8] sm:$0xff]  ;;  %v1837_v10 = vld [vmem:[#allocation19 + $0x10] sm:$0xff] }
 0x550   :  { %1856 = vmatpush.msrb.mxu1 %v1849_v12  ;;  %v1884_v3 = vld [vmem:[#allocation17 + $0x98] sm:$0xff] }
 0x551   :  { %1903 = vmatpush.msrb.mxu2 %v1895_v15  ;;  %v1883_v15 = vld [vmem:[#allocation17 + $0x90] sm:$0xff] }
 0x5c2   :  { %v1588_v36 = vpop.f32.mrf.mxu0 }
 0x5c3   :  { %v1589_v49 = vadd.f32 %v4331_v9, %v1588_v36 }
 0x5c7   :  { %v1548_v30 = vpop.f32.mrf.mxu2  ;;  %v1568_v25 = vpop.f32.mrf.mxu3 }
 0x5c8   :  { %v1591_v26 = vadd.f32 %v1548_v30, %v1520_v60  ;;  %v1611_v27 = vadd.f32 %v1568_v25, %v1525_v23  ;;  %v1803_v60 = vld [vmem:[#allocation17 + $0x68] sm:$0xff]  ;;  %v1646_v25 = vld [vmem:[#allocation6 + $0xc] ss:$6 sm:$0x3] }
 0x5c9   :  { %v1848_v23 = vld [vmem:[#allocation19 + $0x68] sm:$0xff]  ;;  %1812 = vmatpush.msra.mxu0 %v1803_v60 }
 0x5ca   :  { %v3299_v29 = vmul.f32 -1.442695, %v1591_v26  ;;  %v3300_v31 = vmul.f32 -1.442695, %v1611_v27  ;;  %v1894_v30 = vld [vmem:[#allocation17 + $0xe8] sm:$0xff]  ;;  %1857 = vmatpush.msrb.mxu1 %v1848_v23  ;;  %v1943_v26 = vld [vmem:[#allocation19 + $0xf8] sm:$0xff]  ;;  %v1647_v27 = vadd.f32 %v1646_v25, %v1644_v16 }
 0x5cb   :  { %1904 = vmatpush.msrb.mxu2 %v1894_v30  ;;  %1949 = vmatpush.msrb.mxu3 %v1943_v26  ;;  %v1932_v16 = vld [vmem:[#allocation19 + $0xa0] sm:$0xff]  ;;  %v1791_v23 = vld [vmem:[#allocation17 + $0x8] sm:$0xff] }
 0x5cc   :  { %3431 = vpow2.f32 %v3299_v29  ;;  %v1802_v29 = vld [vmem:[#allocation17 + $0x60] sm:$0xff]  ;;  %v1836_v30 = vld [vmem:[#allocation19 + $0x8] sm:$0xff] }
 0x5cd   :  { %3433 = vpow2.f32 %v3300_v31  ;;  %v1847_v31 = vld [vmem:[#allocation19 + $0x60] sm:$0xff]  ;;  %1813 = vmatpush.msra.mxu0 %v1802_v29  ;;  %v1931_v29 = vld [vmem:[#allocation19 + $0x98] sm:$0xff] }
 0x5ce   :  { %1858 = vmatpush.msrb.mxu1 %v1847_v31 }
 0x5d2   :  { %v3432_v33 = vpop.eup %3431 }
 0x5d3   :  { %v3434_v34 = vpop.eup %3433  ;;  %v1595_v38 = vadd.f32 1.0, %v3432_v33  ;;  %v1893_v33 = vld [vmem:[#allocation17 + $0xe0] sm:$0xff] }
 0x5d4   :  { %v1615_v39 = vadd.f32 1.0, %v3434_v34  ;;  %1905 = vmatpush.msrb.mxu2 %v1893_v33  ;;  %v1649_v33 = vld [vmem:[#allocation5 + $0x1d] ss:$6 sm:$0x3] }
 0x5d5   :  { %3435 = vrcp.f32 %v1595_v38  ;;  %v1607_v61 = vand.u32 2147483648, %v1595_v38  ;;  %v1605_v32 = vand.u32 2147483647, %v1595_v38  ;;  %vm1601_vm13 = vweird.f32 %v1595_v38 }
 0x5d6   :  { %3437 = vrcp.f32 %v1615_v39  ;;  %v1627_v57 = vand.u32 2147483648, %v1615_v39  ;;  %vm1621_vm1 = vweird.f32 %v1615_v39  ;;  %v1625_v1 = vand.u32 2147483647, %v1615_v39 }
 0x5d7   :  { %v1608_v43 = vor.u32 1.1754944e-38, %v1607_v61  ;;  %vm1606_vm15 = vcmp.eq.f32.partialorder %v1605_v32, 8.507059e+37  ;;  %v1800_v61 = vld [vmem:[#allocation17 + $0x50] sm:$0xff]  ;;  %v1940_v32 = vld [vmem:[#allocation19 + $0xe0] sm:$0xff] }
 0x5d8   :  { %v1628_v14 = vor.u32 1.1754944e-38, %v1627_v57  ;;  %vm1626_vm5 = vcmp.eq.f32.partialorder %v1625_v1, 8.507059e+37  ;;  %v1842_v57 = vld [vmem:[#allocation19 + $0x38] sm:$0xff]  ;;  %v1937_v1 = vld [vmem:[#allocation19 + $0xc8] sm:$0xff] }
 0x5db   :  { %v3436_v40 = vpop.eup %3435 }
 0x5dc   :  { %v3438_v41 = vpop.eup %3437  ;;  %v1597_v44 = vmul.f32 %v3436_v40, %v1595_v38  ;;  %vm1602_vm12 = vweird.f32 %v3436_v40  ;;  %v1942_v38 = vld [vmem:[#allocation19 + $0xf0] sm:$0xff] }
 0x5dd   :  { %v1617_v45 = vmul.f32 %v3438_v41, %v1615_v39  ;;  %vm1603_vm14 = vmor %vm1601_vm13, %vm1602_vm12  ;;  %vm1622_vm0 = vweird.f32 %v3438_v41  ;;  %1950 = vmatpush.msrb.mxu3 %v1942_v38 }
 0x5de   :  { %v1598_v46 = vsub.f32 1.0, %v1597_v44  ;;  %vm1623_vm2 = vmor %vm1621_vm1, %vm1622_vm0  ;;  %v1892_v44 = vld [vmem:[#allocation17 + $0xd8] sm:$0xff] }
 0x5df   :  { %v1618_v50 = vsub.f32 1.0, %v1617_v45  ;;  %v1941_v45 = vld [vmem:[#allocation19 + $0xe8] sm:$0xff]  ;;  %1906 = vmatpush.msrb.mxu2 %v1892_v44 }
 0x5e0   :  { %v1599_v2 = vmul.f32 %v3436_v40, %v1598_v46  ;;  %1951 = vmatpush.msrb.mxu3 %v1941_v45  ;;  %v1881_v45 = vld [vmem:[#allocation17 + $0x80] sm:$0xff] }
 0x5e1   :  { %v1619_v37 = vmul.f32 %v3438_v41, %v1618_v50  ;;  %v1845_v50 = vld [vmem:[#allocation19 + $0x50] sm:$0xff] }
 0x5e2   :  { %v1600_v42 = vadd.f32 %v3436_v40, %v1599_v2  ;;  %v1891_v2 = vld [vmem:[#allocation17 + $0xd0] sm:$0xff]  ;;  %1952 = vmatpush.msrb.mxu3 %v1940_v32 }
 0x5e3   :  { %v1620_v63 = vadd.f32 %v3438_v41, %v1619_v37  ;;  %1907 = vmatpush.msrb.mxu2 %v1891_v2  ;;  %v1799_v37 = vld [vmem:[#allocation17 + $0x48] sm:$0xff] }
 0x5e4   :  { %v1604_v54 = vsel %vm1603_vm14, %v3436_v40, %v1600_v42  ;;  %v1801_v40 = vld [vmem:[#allocation17 + $0x58] sm:$0xff]  ;;  %v1844_v42 = vld [vmem:[#allocation19 + $0x48] sm:$0xff] }
 0x5e5   :  { %v1609_v56 = vsel %vm1606_vm15, %v1608_v43, %v1604_v54  ;;  %v1624_v7 = vsel %vm1623_vm2, %v3438_v41, %v1620_v63  ;;  %v1846_v41 = vld [vmem:[#allocation19 + $0x58] sm:$0xff]  ;;  %1814 = vmatpush.msra.mxu0 %v1801_v40  ;;  %v1890_v43 = vld [vmem:[#allocation17 + $0xc8] sm:$0xff]  ;;  %v1798_v54 = vld [vmem:[#allocation17 + $0x40] sm:$0xff] }
 0x5e6   :  { %v1631_v53 = vmul.f32 %v1609_v56, %v1589_v49  ;;  %v1629_v0 = vsel %vm1626_vm5, %v1628_v14, %v1624_v7  ;;  %1859 = vmatpush.msrb.mxu1 %v1846_v41  ;;  %v1939_v49 = vld [vmem:[#allocation19 + $0xd8] sm:$0xff]  ;;  %1908 = vmatpush.msrb.mxu2 %v1890_v43  ;;  %v1843_v56 = vld [vmem:[#allocation19 + $0x40] sm:$0xff]  ;;  %v1841_v7 = vld [vmem:[#allocation19 + $0x30] sm:$0xff] }
 0x5e7   :  { %v1634_v19 = vsub.f32 1.0, %v1629_v0  ;;  %v1636_v18 = vmul.f32 %v1629_v0, %v4457_v47  ;;  %v1642_v47 = vadd.f32 %v1641_v35, %v1640_v59  ;;  %1815 = vmatpush.msra.mxu0 %v1800_v61  ;;  %1953 = vmatpush.msrb.mxu3 %v1939_v49  ;;  %v1889_v63 = vld [vmem:[#allocation17 + $0xc0] sm:$0xff]  ;;  %v1887_v14 = vld [vmem:[#allocation17 + $0xb0] sm:$0xff]  ;;  %v1929_v49 = vld [vmem:[#allocation19 + $0x88] sm:$0xff] }
 0x5e8   :  { %v1632_v5 = vadd.f32 %v1631_v53, %v1530_v62  ;;  %1860 = vmatpush.msrb.mxu1 %v1845_v50  ;;  %v1797_v53 = vld [vmem:[#allocation17 + $0x38] sm:$0xff]  ;;  %1909 = vmatpush.msrb.mxu2 %v1889_v63  ;;  %v1936_v0 = vld [vmem:[#allocation19 + $0xc0] sm:$0xff]  ;;  %v1934_v59 = vld [vmem:[#allocation19 + $0xb0] sm:$0xff] }
 0x5e9   :  { %1816 = vmatpush.msra.mxu0 %v1799_v37  ;;  %1954 = vmatpush.msrb.mxu3 %v1938_v8  ;;  %v1888_v62 = vld [vmem:[#allocation17 + $0xb8] sm:$0xff]  ;;  %v1835_v40 = vld [vmem:[#allocation19] sm:$0xff]  ;;  %v3532_v50 = vld [vmem:[%s5102_s13] ss:$0 sm:$0xff] }
 0x5ea   :  { %3439 = vtanh.f32 %v1632_v5  ;;  %1861 = vmatpush.msrb.mxu1 %v1844_v42  ;;  %v1796_v5 = vld [vmem:[#allocation17 + $0x30] sm:$0xff]  ;;  %1910 = vmatpush.msrb.mxu2 %v1888_v62  ;;  %v2037_v37 = vld [vmem:[#allocation19 + $0x178] sm:$0xff] }
 0x5eb   :  { %1817 = vmatpush.msra.mxu0 %v1798_v54  ;;  %1955 = vmatpush.msrb.mxu3 %v1937_v1  ;;  %v1989_v8 = vld [vmem:[#allocation17 + $0x170] sm:$0xff]  ;;  %v1928_v1 = vld [vmem:[#allocation19 + $0x80] sm:$0xff] }
 0x5ec   :  { %1862 = vmatpush.msrb.mxu1 %v1843_v56  ;;  %1911 = vmatpush.msrb.mxu2 %v1887_v14  ;;  %v4518_v62 = vld [vmem:[#allocation20 + $0x70] sm:$0xff]  ;;  %v1988_v14 = vld [vmem:[#allocation17 + $0x168] sm:$0xff] }
 0x5ed   :  { %1818 = vmatpush.msra.mxu0 %v1797_v53  ;;  %1956 = vmatpush.msrb.mxu3 %v1936_v0  ;;  %v2036_v53 = vld [vmem:[#allocation19 + $0x170] sm:$0xff]  ;;  %v2035_v0 = vld [vmem:[#allocation19 + $0x168] sm:$0xff] }
 0x5ee   :  { %1863 = vmatpush.msrb.mxu1 %v1842_v57  ;;  %v4574_v41 = vld [vmem:[#allocation20 + $0x30] sm:$0xff] }
 0x5ef   :  { %1819 = vmatpush.msra.mxu0 %v1796_v5 }
 0x5f0   :  { %v3440_v9 = vpop.eup %3439  ;;  %1864 = vmatpush.msrb.mxu1 %v1841_v7 }
 0x5f1   :  { %v1635_v24 = vmul.f32 %v3440_v9, %v1634_v19  ;;  %v1795_v9 = vld [vmem:[#allocation17 + $0x28] sm:$0xff] }
 0x5f2   :  { %1820 = vmatpush.msra.mxu0 %v1795_v9  ;;  %v4529_v9 = vld [vmem:[#allocation20 + $0x68] sm:$0xff] }
 0x5f3   :  { %v4472_v4 = vadd.f32 %v1636_v18, %v1635_v24  ;;  %v1840_v24 = vld [vmem:[#allocation19 + $0x28] sm:$0xff] }
 0x5f4   :  { %1865 = vmatpush.msrb.mxu1 %v1840_v24  ;;  %v4531_v24 = vld [vmem:[#allocation20 + $0xf8] sm:$0xff] }
 0x5f5   :  { %1638 = vst [vmem:[#allocation7 + $0x8] sm:$0x3] %v4472_v4  ;;  %1669 = vmatmul.f32.vlgmr.msra.gmra.mxu1 %v4472_v4  ;;  %1689 = vmatmul.f32.vlgmr.msra.gmra.mxu2 %v4472_v4 }
 0x5f6   :  { %1709 = vmatmul.f32.vlgmr.msra.gmra.mxu3 %v4472_v4 }
 0x5fc   :  { %v1769_v6 = vld [vmem:[#allocation7 + $0x8] sm:$0x3] }
 0x5fd   :  { %v1780_v13 = vld [vmem:[#allocation7 + $0x8] sm:$0x3]  ;;  %v1770_v51 = vsel %vm1763_vm11, %v1768_v17, %v1769_v6  ;;  %v1886_v17 = vld [vmem:[#allocation17 + $0xa8] sm:$0xff]  ;;  %v1935_v6 = vld [vmem:[#allocation19 + $0xb8] sm:$0xff] }
 0x5fe   :  { %v1782_v52 = vsel %vm1763_vm11, %v1780_v13, %v1781_v58  ;;  %1771 = vst [vmem:[#allocation8 + $0x2] sm:$0x3] %v1770_v51  ;;  %v1794_v13 = vld [vmem:[#allocation17 + $0x20] sm:$0xff]  ;;  %1912 = vmatpush.msrb.mxu2 %v1886_v17  ;;  %1957 = vmatpush.msrb.mxu3 %v1935_v6 }
 0x5ff   :  { %1783 = vst [vmem:[#allocation8 + $0x8] sm:$0x3] %v1782_v52  ;;  %v1839_v58 = vld [vmem:[#allocation19 + $0x20] sm:$0xff]  ;;  %1821 = vmatpush.msra.mxu0 %v1794_v13 }
 0x600   :  { %v1885_v52 = vld [vmem:[#allocation17 + $0xa0] sm:$0xff]  ;;  %1866 = vmatpush.msrb.mxu1 %v1839_v58  ;;  %1958 = vmatpush.msrb.mxu3 %v1934_v59  ;;  %v1986_v59 = vld [vmem:[#allocation17 + $0x158] sm:$0xff] }
 0x601   :  { %1913 = vmatpush.msrb.mxu2 %v1885_v52  ;;  %v1987_v6 = vld [vmem:[#allocation17 + $0x160] sm:$0xff] }
 0x602   :  { %1867 = vmatpush.msrb.mxu1 %v1838_v11  ;;  %1959 = vmatpush.msrb.mxu3 %v1933_v55  ;;  %v2034_v13 = vld [vmem:[#allocation19 + $0x160] sm:$0xff]  ;;  %v4545_v11 = vld [vmem:[#allocation20 + $0xe8] sm:$0xff]  ;;  %v2032_v55 = vld [vmem:[#allocation19 + $0x150] sm:$0xff] }
 0x603   :  { %1914 = vmatpush.msrb.mxu2 %v1884_v3  ;;  %v4537_v58 = vld [vmem:[#allocation20 + $0x60] sm:$0xff]  ;;  %v1985_v3 = vld [vmem:[#allocation17 + $0x150] sm:$0xff] }
 0x604   :  { %1868 = vmatpush.msrb.mxu1 %v1837_v10  ;;  %1960 = vmatpush.msrb.mxu3 %v1932_v16  ;;  %v4551_v10 = vld [vmem:[#allocation20 + $0xe0] sm:$0xff]  ;;  %v2031_v16 = vld [vmem:[#allocation19 + $0x148] sm:$0xff] }
 0x605   :  { %1915 = vmatpush.msrb.mxu2 %v1883_v15  ;;  %v1984_v15 = vld [vmem:[#allocation17 + $0x148] sm:$0xff] }
 0x606   :  { %1869 = vmatpush.msrb.mxu1 %v1836_v30  ;;  %1961 = vmatpush.msrb.mxu3 %v1931_v29  ;;  %v4558_v30 = vld [vmem:[#allocation20 + $0xd8] sm:$0xff]  ;;  %v4562_v29 = vld [vmem:[#allocation20 + $0x40] sm:$0xff] }
 0x608   :  { %1870 = vmatpush.msrb.mxu1 %v1835_v40  ;;  %v2028_v40 = vld [vmem:[#allocation19 + $0x130] sm:$0xff] }
 0x60a   :  { %2043 = vmatpush.msra.mxu1 %v2037_v37  ;;  %v1785_v37 = vld [vmem:[#allocation7] sm:$0x3] }
 0x60c   :  { %2044 = vmatpush.msra.mxu1 %v2036_v53 }
 0x60e   :  { %2045 = vmatpush.msra.mxu1 %v2035_v0  ;;  %v4604_v0 = vld [vmem:[#allocation20 + $0xa0] sm:$0xff] }
 0x610   :  { %2046 = vmatpush.msra.mxu1 %v2034_v13  ;;  %v1975_v13 = vld [vmem:[#allocation17 + $0x100] sm:$0xff] }
 0x672   :  { %v1670_v20 = vpop.f32.mrf.mxu1 }
 0x673   :  { %v1713_v28 = vadd.f32 %v1670_v20, %v1642_v47  ;;  %v1793_v47 = vld [vmem:[#allocation17 + $0x18] sm:$0xff] }
 0x674   :  { %1822 = vmatpush.msra.mxu0 %v1793_v47  ;;  %v4543_v47 = vld [vmem:[#allocation20 + $0x58] sm:$0xff] }
 0x675   :  { %v3301_v21 = vmul.f32 -1.442695, %v1713_v28  ;;  %v1792_v28 = vld [vmem:[#allocation17 + $0x10] sm:$0xff] }
 0x676   :  { %1823 = vmatpush.msra.mxu0 %v1792_v28  ;;  %v4549_v28 = vld [vmem:[#allocation20 + $0x50] sm:$0xff] }
 0x677   :  { %3441 = vpow2.f32 %v3301_v21 }
 0x678   :  { %v1690_v34 = vpop.f32.mrf.mxu2  ;;  %1824 = vmatpush.msra.mxu0 %v1791_v23  ;;  %v4556_v23 = vld [vmem:[#allocation20 + $0x48] sm:$0xff] }
 0x679   :  { %v1733_v39 = vadd.f32 %v1690_v34, %v1647_v27  ;;  %v1710_v26 = vpop.f32.mrf.mxu3  ;;  %v1882_v27 = vld [vmem:[#allocation17 + $0x88] sm:$0xff]  ;;  %v1651_v34 = vld [vmem:[#allocation6 + $0x18] ss:$6 sm:$0x3] }
 0x67a   :  { %v1711_v2 = vadd.f32 %v3532_v50, %v1710_v26  ;;  %1916 = vmatpush.msrb.mxu2 %v1882_v27  ;;  %v1652_v42 = vadd.f32 %v1651_v34, %v1649_v33  ;;  %v2030_v26 = vld [vmem:[#allocation19 + $0x140] sm:$0xff]  ;;  %v2029_v33 = vld [vmem:[#allocation19 + $0x138] sm:$0xff] }
 0x67b   :  { %v3302_v46 = vmul.f32 -1.442695, %v1733_v39  ;;  %v1790_v39 = vld [vmem:[#allocation17] sm:$0xff]  ;;  %v4568_v34 = vld [vmem:[#allocation20 + $0x38] sm:$0xff] }
 0x67c   :  { %1825 = vmatpush.msra.mxu0 %v1790_v39  ;;  %1917 = vmatpush.msrb.mxu2 %v1881_v45  ;;  %v1981_v39 = vld [vmem:[#allocation17 + $0x130] sm:$0xff]  ;;  %v1980_v45 = vld [vmem:[#allocation17 + $0x128] sm:$0xff]  ;;  %v4582_v50 = vld [vmem:[#allocation20 + $0xb8] sm:$0xff] }
 0x67d   :  { %v3442_v36 = vpop.eup %3441  ;;  %3443 = vpow2.f32 %v3302_v46  ;;  %v1930_v46 = vld [vmem:[#allocation19 + $0x90] sm:$0xff] }
 0x67e   :  { %v4482_v48 = vadd.f32 1.0, %v3442_v36  ;;  %v1990_v36 = vld [vmem:[#allocation17 + $0x178] sm:$0xff]  ;;  %1962 = vmatpush.msrb.mxu3 %v1930_v46  ;;  %v2027_v46 = vld [vmem:[#allocation19 + $0x128] sm:$0xff] }
 0x67f   :  { %1996 = vmatpush.msrb.mxu0 %v1990_v36  ;;  %v2026_v36 = vld [vmem:[#allocation19 + $0x120] sm:$0xff] }
 0x680   :  { %3445 = vrcp.f32 %v4482_v48  ;;  %v1729_v12 = vand.u32 2147483648, %v4482_v48  ;;  %v1727_v60 = vand.u32 2147483647, %v4482_v48  ;;  %vm1723_vm7 = vweird.f32 %v4482_v48  ;;  %1963 = vmatpush.msrb.mxu3 %v1929_v49  ;;  %v1978_v49 = vld [vmem:[#allocation17 + $0x118] sm:$0xff] }
 0x681   :  { %1997 = vmatpush.msrb.mxu0 %v1989_v8 }
 0x682   :  { %v1730_v44 = vor.u32 1.1754944e-38, %v1729_v12  ;;  %vm1728_vm9 = vcmp.eq.f32.partialorder %v1727_v60, 8.507059e+37  ;;  %1964 = vmatpush.msrb.mxu3 %v1928_v1  ;;  %v4598_v1 = vld [vmem:[#allocation20 + $0xa8] sm:$0xff] }
 0x683   :  { %v3444_v19 = vpop.eup %3443  ;;  %1998 = vmatpush.msrb.mxu0 %v1988_v14  ;;  %v4602_v14 = vld [vmem:[#allocation20 + $0x10] sm:$0xff] }
 0x684   :  { %v4485_v18 = vadd.f32 1.0, %v3444_v19  ;;  %2151 = vmatpush.msra.mxu3 %v4531_v24  ;;  %5116 = vst [vmem:[#allocation40_spill] sm:$0xff] %v4602_v14  ;;  %v1976_v19 = vld [vmem:[#allocation17 + $0x108] sm:$0xff] }
 0x685   :  { %1999 = vmatpush.msrb.mxu0 %v1987_v6  ;;  %v4610_v6 = vld [vmem:[#allocation20 + $0x98] sm:$0xff] }
 0x686   :  { %v4487_v51 = vpop.eup %3445  ;;  %3447 = vrcp.f32 %v4485_v18  ;;  %v1749_v56 = vand.u32 2147483648, %v4485_v18  ;;  %v1747_v57 = vand.u32 2147483647, %v4485_v18  ;;  %vm1743_vm12 = vweird.f32 %v4485_v18 }
 0x687   :  { %v1719_v35 = vmul.f32 %v4487_v51, %v4482_v48  ;;  %vm1724_vm6 = vweird.f32 %v4487_v51  ;;  %v4512_v48 = vld [vmem:[#allocation20 + $0x78] sm:$0xff]  ;;  %2000 = vmatpush.msrb.mxu0 %v1986_v59 }
 0x688   :  { %vm4504_vm8 = vmor %vm1723_vm7, %vm1724_vm6  ;;  %2131 = vmatpush.msra.mxu2 %v4512_v48  ;;  %v1750_v17 = vor.u32 1.1754944e-38, %v1749_v56  ;;  %vm1748_vm14 = vcmp.eq.f32.partialorder %v1747_v57, 8.507059e+37  ;;  %v4596_v57 = vld [vmem:[#allocation20 + $0x18] sm:$0xff] }
 0x689   :  { %v1720_v20 = vsub.f32 1.0, %v1719_v35  ;;  %v2033_v35 = vld [vmem:[#allocation19 + $0x158] sm:$0xff]  ;;  %2001 = vmatpush.msrb.mxu0 %v1985_v3  ;;  %v4618_v3 = vld [vmem:[#allocation20 + $0x90] sm:$0xff] }
 0x68a   :  { %2132 = vmatpush.msra.mxu2 %v4518_v62  ;;  %2047 = vmatpush.msra.mxu1 %v2033_v35  ;;  %v4616_v35 = vld [vmem:[#allocation20] sm:$0xff]  ;;  %5119 = vst [vmem:[#allocation41_spill] sm:$0xff] %v4618_v3 }
 0x68b   :  { %v1721_v21 = vmul.f32 %v4487_v51, %v1720_v20  ;;  %2002 = vmatpush.msrb.mxu0 %v1984_v15  ;;  %5118 = vst [vmem:[#allocation38_spill] sm:$0xff] %v4616_v35  ;;  %v4628_v15 = vld [vmem:[#allocation20 + $0x80] sm:$0xff] }
 0x68c   :  { %v4496_v25 = vpop.eup %3447  ;;  %2133 = vmatpush.msra.mxu2 %v4529_v9  ;;  %2048 = vmatpush.msra.mxu1 %v2032_v55  ;;  %v4620_v55 = vld [vmem:[#allocation20 + $0x178] sm:$0xff]  ;;  %5121 = vst [vmem:[#allocation39_spill] sm:$0xff] %v4628_v15 }
 0x68d   :  { %v1739_v31 = vmul.f32 %v4496_v25, %v4485_v18  ;;  %v1722_v38 = vadd.f32 %v4487_v51, %v1721_v21  ;;  %vm1744_vm10 = vweird.f32 %v4496_v25 }
 0x68e   :  { %vm4525_vm13 = vmor %vm1743_vm12, %vm1744_vm10  ;;  %2134 = vmatpush.msra.mxu2 %v4537_v58  ;;  %2049 = vmatpush.msra.mxu1 %v2031_v16  ;;  %v4633_v16 = vld [vmem:[#allocation20 + $0x168] sm:$0xff] }
 0x68f   :  { %v1740_v61 = vsub.f32 1.0, %v1739_v31  ;;  %v1726_v32 = vsel %vm4504_vm8, %v4487_v51, %v1722_v38  ;;  %v4539_v51 = vld [vmem:[#allocation20 + $0xf0] sm:$0xff]  ;;  %v4570_v38 = vld [vmem:[#allocation20 + $0xc8] sm:$0xff] }
 0x690   :  { %v1731_v43 = vsel %vm1728_vm9, %v1730_v44, %v1726_v32  ;;  %2152 = vmatpush.msra.mxu3 %v4539_v51  ;;  %2135 = vmatpush.msra.mxu2 %v4543_v47  ;;  %v4564_v31 = vld [vmem:[#allocation20 + $0xd0] sm:$0xff]  ;;  %v4576_v44 = vld [vmem:[#allocation20 + $0xc0] sm:$0xff] }
 0x691   :  { %v1741_v54 = vmul.f32 %v4496_v25, %v1740_v61  ;;  %v1753_v63 = vmul.f32 %v1731_v43, %v1711_v2  ;;  %2050 = vmatpush.msra.mxu1 %v2030_v26  ;;  %v4580_v61 = vld [vmem:[#allocation20 + $0x28] sm:$0xff]  ;;  %v1979_v32 = vld [vmem:[#allocation17 + $0x120] sm:$0xff]  ;;  %v4588_v43 = vld [vmem:[#allocation20 + $0xb0] sm:$0xff] }
 0x692   :  { %2153 = vmatpush.msra.mxu3 %v4545_v11  ;;  %2136 = vmatpush.msra.mxu2 %v4549_v28  ;;  %v1764_v2 = vld [vmem:[#allocation7] sm:$0x3]  ;;  %v4648_v26 = vld [vmem:[#allocation20 + $0x150] sm:$0xff] }
 0x693   :  { %v1742_v5 = vadd.f32 %v4496_v25, %v1741_v54  ;;  %v1754_v7 = vadd.f32 %v1753_v63, %v1652_v42  ;;  %2051 = vmatpush.msra.mxu1 %v2029_v33  ;;  %v4586_v42 = vld [vmem:[#allocation20 + $0x20] sm:$0xff]  ;;  %v2025_v63 = vld [vmem:[#allocation19 + $0x118] sm:$0xff] }
 0x694   :  { %2154 = vmatpush.msra.mxu3 %v4551_v10  ;;  %2137 = vmatpush.msra.mxu2 %v4556_v23  ;;  %v4664_v33 = vld [vmem:[#allocation20 + $0x140] sm:$0xff] }
 0x695   :  { %v1746_v18 = vsel %vm4525_vm13, %v4496_v25, %v1742_v5  ;;  %3449 = vtanh.f32 %v1754_v7  ;;  %v1983_v25 = vld [vmem:[#allocation17 + $0x140] sm:$0xff]  ;;  %2052 = vmatpush.msra.mxu1 %v2028_v40  ;;  %v1977_v5 = vld [vmem:[#allocation17 + $0x110] sm:$0xff] }
 0x696   :  { %v1751_v52 = vsel %vm1748_vm14, %v1750_v17, %v1746_v18  ;;  %2155 = vmatpush.msra.mxu3 %v4558_v30  ;;  %2003 = vmatpush.msrb.mxu0 %v1983_v25  ;;  %v2024_v7 = vld [vmem:[#allocation19 + $0x110] sm:$0xff]  ;;  %v2023_v17 = vld [vmem:[#allocation19 + $0x108] sm:$0xff]  ;;  %v4644_v25 = vld [vmem:[#allocation20 + $0x158] sm:$0xff] }
 0x697   :  { %v1756_v20 = vsub.f32 1.0, %v1751_v52  ;;  %v1758_v60 = vmul.f32 %v1751_v52, %v4472_v4  ;;  %v1982_v4 = vld [vmem:[#allocation17 + $0x138] sm:$0xff]  ;;  %2138 = vmatpush.msra.mxu2 %v4562_v29  ;;  %2053 = vmatpush.msra.mxu1 %v2027_v46  ;;  %v4608_v18 = vld [vmem:[#allocation20 + $0x8] sm:$0xff]  ;;  %v2022_v52 = vld [vmem:[#allocation19 + $0x100] sm:$0xff] }
 0x698   :  { %2156 = vmatpush.msra.mxu3 %v4564_v31  ;;  %2004 = vmatpush.msrb.mxu0 %v1982_v4  ;;  %5117 = vst [vmem:[#allocation43_spill] sm:$0xff] %v4608_v18  ;;  %v5122_v4 = vmov 0.0   ;;  %v4677_v40 = vld [vmem:[#allocation20 + $0x130] sm:$0xff]  ;;  %v4686_v46 = vld [vmem:[#allocation20 + $0x120] sm:$0xff] }
 0x699   :  { %2139 = vmatpush.msra.mxu2 %v4568_v34  ;;  %2054 = vmatpush.msra.mxu1 %v2026_v36  ;;  %v4704_v36 = vld [vmem:[#allocation20 + $0x108] sm:$0xff] }
 0x69a   :  { %2157 = vmatpush.msra.mxu3 %v4570_v38  ;;  %2005 = vmatpush.msrb.mxu0 %v1981_v39  ;;  %v4668_v39 = vld [vmem:[#allocation20 + $0x138] sm:$0xff]  ;;  %5123 = vst [vmem:[#allocation42_spill] sm:$0xff] %v4704_v36 }
 0x69b   :  { %v3450_v12 = vpop.eup %3449  ;;  %2140 = vmatpush.msra.mxu2 %v4574_v41  ;;  %2055 = vmatpush.msra.mxu1 %v2025_v63 }
 0x69c   :  { %v1757_v21 = vmul.f32 %v3450_v12, %v1756_v20  ;;  %2158 = vmatpush.msra.mxu3 %v4576_v44  ;;  %2006 = vmatpush.msrb.mxu0 %v1980_v45  ;;  %v4622_v20 = vld [vmem:[#allocation20 + $0x88] sm:$0xff]  ;;  %v4626_v12 = vld [vmem:[#allocation20 + $0x170] sm:$0xff] }
 0x69d   :  { %2141 = vmatpush.msra.mxu2 %v4580_v61  ;;  %2056 = vmatpush.msra.mxu1 %v2024_v7  ;;  %5120 = vst [vmem:[#allocation44_spill] sm:$0xff] %v4622_v20  ;;  %v4682_v45 = vld [vmem:[#allocation20 + $0x128] sm:$0xff] }
 0x69e   :  { %v1759_v27 = vadd.f32 %v1758_v60, %v1757_v21  ;;  %2159 = vmatpush.msra.mxu3 %v4582_v50  ;;  %2007 = vmatpush.msrb.mxu0 %v1979_v32  ;;  %v4641_v60 = vld [vmem:[#allocation20 + $0x160] sm:$0xff]  ;;  %v4698_v32 = vld [vmem:[#allocation20 + $0x110] sm:$0xff]  ;;  %v3383_v7 = vld [vmem:[%s5126_s25 + $0x1] ss:$0 sm:$0xff] }
 0x69f   :  { %2142 = vmatpush.msra.mxu2 %v4586_v42  ;;  %2057 = vmatpush.msra.mxu1 %v2023_v17 }
 0x6a0   :  { %1760 = vst [vmem:[#allocation7 + $0xa] sm:$0x3] %v1759_v27  ;;  %2160 = vmatpush.msra.mxu3 %v4588_v43  ;;  %2008 = vmatpush.msrb.mxu0 %v1978_v49  ;;  %v4658_v27 = vld [vmem:[#allocation20 + $0x148] sm:$0xff] }
 0x6a1   :  { %2143 = vmatpush.msra.mxu2 %v4596_v57  ;;  %2058 = vmatpush.msra.mxu1 %v2022_v52  ;;  %v3380_v49 = vld [vmem:[%s5125_s17] ss:$0 sm:$0xff] }
 0x6a2   :  { %2161 = vmatpush.msra.mxu3 %v4598_v1  ;;  %2009 = vmatpush.msrb.mxu0 %v1977_v5  ;;  %v3382_v5 = vld [vmem:[%s5125_s17 + $0x1] ss:$0 sm:$0xff] }
 0x6a3   :  { %2144 = vmatpush.msra.mxu2 %v4602_v14 }
 0x6a4   :  { %2162 = vmatpush.msra.mxu3 %v4604_v0  ;;  %2010 = vmatpush.msrb.mxu0 %v1976_v19 }
 0x6a5   :  { %2145 = vmatpush.msra.mxu2 %v4608_v18 }
 0x6a6   :  { %2163 = vmatpush.msra.mxu3 %v4610_v6  ;;  %2011 = vmatpush.msrb.mxu0 %v1975_v13 }
 0x6a7   :  { %v1765_v54 = vld [vmem:[#allocation7 + $0xa] sm:$0x3]  ;;  %2146 = vmatpush.msra.mxu2 %v4616_v35 }
 0x6a8   :  { %v1784_v56 = vld [vmem:[#allocation7 + $0xa] sm:$0x3]  ;;  %v1766_v8 = vsel %vm1763_vm11, %v1764_v2, %v1765_v54  ;;  %2164 = vmatpush.msra.mxu3 %v4618_v3  ;;  %v3381_v54 = vld [vmem:[%s5126_s25] ss:$0 sm:$0xff] }
 0x6a9   :  { %v1786_v53 = vsel %vm1763_vm11, %v1784_v56, %v1785_v37  ;;  %1767 = vst [vmem:[#allocation8] sm:$0x3] %v1766_v8  ;;  %v4692_v2 = vld [vmem:[#allocation20 + $0x118] sm:$0xff]  ;;  %v4710_v37 = vld [vmem:[#allocation20 + $0x100] sm:$0xff] }
 0x6aa   :  { %1787 = vst [vmem:[#allocation8 + $0xa] sm:$0x3] %v1786_v53  ;;  %2165 = vmatpush.msra.mxu3 %v4622_v20 }
 0x6ab   :  { %5124 = vst [vmem:[#allocation45_spill] sm:$0xff] %v4710_v37 }
 0x6ac   :  { %2166 = vmatpush.msra.mxu3 %v4628_v15 }
 0x6b0   :  { %v1788_v59 = vld [vmem:[#allocation8] sm:$0xff] }
 0x6b1   :  { %1826 = vmatmul.f32.vlgmr.msra.gmra.mxu0 %v1788_v59  ;;  %1871 = vmatmul.f32.vlgmr.msrb.gmra.mxu1 %v1788_v59  ;;  %v1789_v21 = vld [vmem:[#allocation8 + $0x8] sm:$0xf] }
 0x6b2   :  { %1918 = vmatmul.f32.vlgmr.msrb.gmra.mxu2 %v1788_v59  ;;  %1965 = vmatmul.f32.vlgmr.msrb.gmra.mxu3 %v1788_v59 }
 0x6b3   :  { %2171 = vmatpush.msra.mxu0 %v4620_v55  ;;  %2248 = vmatpush.msrb.mxu1 %v4512_v48 }
 0x6b4   :  { %2268 = vmatpush.msrb.mxu2 %v4531_v24  ;;  %2288 = vmatpush.msrb.mxu3 %v4620_v55 }
 0x6b5   :  { %2172 = vmatpush.msra.mxu0 %v4626_v12  ;;  %2249 = vmatpush.msrb.mxu1 %v4518_v62 }
 0x6b6   :  { %2269 = vmatpush.msrb.mxu2 %v4539_v51  ;;  %2289 = vmatpush.msrb.mxu3 %v4626_v12 }
 0x6b7   :  { %2173 = vmatpush.msra.mxu0 %v4633_v16  ;;  %2250 = vmatpush.msrb.mxu1 %v4529_v9 }
 0x6b8   :  { %2270 = vmatpush.msrb.mxu2 %v4545_v11  ;;  %2290 = vmatpush.msrb.mxu3 %v4633_v16 }
 0x6b9   :  { %1829 = vmatmul.f32.gmra.mxu0 %v1789_v21  ;;  %1874 = vmatmul.f32.gmra.mxu1 %v1789_v21 }
 0x6ba   :  { %1921 = vmatmul.f32.gmra.mxu2 %v1789_v21  ;;  %1968 = vmatmul.f32.gmra.mxu3 %v1789_v21 }
 0x6bb   :  { %2174 = vmatpush.msra.mxu0 %v4641_v60  ;;  %2251 = vmatpush.msrb.mxu1 %v4537_v58 }
 0x6bc   :  { %2271 = vmatpush.msrb.mxu2 %v4551_v10  ;;  %2291 = vmatpush.msrb.mxu3 %v4641_v60 }
 0x6bd   :  { %2175 = vmatpush.msra.mxu0 %v4644_v25  ;;  %2252 = vmatpush.msrb.mxu1 %v4543_v47 }
 0x6be   :  { %2272 = vmatpush.msrb.mxu2 %v4558_v30  ;;  %2292 = vmatpush.msrb.mxu3 %v4644_v25 }
 0x6bf   :  { %2176 = vmatpush.msra.mxu0 %v4648_v26  ;;  %2253 = vmatpush.msrb.mxu1 %v4549_v28 }
 0x6c0   :  { %2273 = vmatpush.msrb.mxu2 %v4564_v31  ;;  %2293 = vmatpush.msrb.mxu3 %v4648_v26 }
 0x6c1   :  { %2012 = vmatmul.f32.vlgmr.msrb.gmra.mxu0 %v1788_v59  ;;  %2059 = vmatmul.f32.vlgmr.msra.gmra.mxu1 %v1788_v59 }
 0x6c2   :  { %2147 = vmatmul.f32.vlgmr.msra.gmra.mxu2 %v5122_v4  ;;  %2167 = vmatmul.f32.vlgmr.msra.gmra.mxu3 %v5122_v4 }
 0x6c3   :  { %2177 = vmatpush.msra.mxu0 %v4658_v27  ;;  %2254 = vmatpush.msrb.mxu1 %v4556_v23 }
 0x6c4   :  { %2274 = vmatpush.msrb.mxu2 %v4570_v38  ;;  %2294 = vmatpush.msrb.mxu3 %v4658_v27 }
 0x6c5   :  { %2178 = vmatpush.msra.mxu0 %v4664_v33  ;;  %2255 = vmatpush.msrb.mxu1 %v4562_v29 }
 0x6c6   :  { %2275 = vmatpush.msrb.mxu2 %v4576_v44  ;;  %2295 = vmatpush.msrb.mxu3 %v4664_v33 }
 0x6c7   :  { %2179 = vmatpush.msra.mxu0 %v4668_v39  ;;  %2256 = vmatpush.msrb.mxu1 %v4568_v34 }
 0x6c8   :  { %2276 = vmatpush.msrb.mxu2 %v4582_v50  ;;  %2296 = vmatpush.msrb.mxu3 %v4668_v39 }
 0x6c9   :  { %2015 = vmatmul.f32.gmra.mxu0 %v1789_v21  ;;  %2062 = vmatmul.f32.gmra.mxu1 %v1789_v21 }
 0x6ca   :  { %2180 = vmatpush.msra.mxu0 %v4677_v40  ;;  %2257 = vmatpush.msrb.mxu1 %v4574_v41 }
 0x6cb   :  { %2277 = vmatpush.msrb.mxu2 %v4588_v43  ;;  %2297 = vmatpush.msrb.mxu3 %v4677_v40 }
 0x6cc   :  { %2181 = vmatpush.msra.mxu0 %v4682_v45  ;;  %2258 = vmatpush.msrb.mxu1 %v4580_v61 }
 0x6cd   :  { %2278 = vmatpush.msrb.mxu2 %v4598_v1  ;;  %2298 = vmatpush.msrb.mxu3 %v4682_v45 }
 0x6ce   :  { %2182 = vmatpush.msra.mxu0 %v4686_v46  ;;  %2259 = vmatpush.msrb.mxu1 %v4586_v42 }
 0x6cf   :  { %2279 = vmatpush.msrb.mxu2 %v4604_v0  ;;  %2299 = vmatpush.msrb.mxu3 %v4686_v46 }
 0x6d0   :  { %2183 = vmatpush.msra.mxu0 %v4692_v2  ;;  %2260 = vmatpush.msrb.mxu1 %v4596_v57 }
 0x6d1   :  { %2280 = vmatpush.msrb.mxu2 %v4610_v6  ;;  %2300 = vmatpush.msrb.mxu3 %v4692_v2 }
 0x6d2   :  { %2184 = vmatpush.msra.mxu0 %v4698_v32  ;;  %2261 = vmatpush.msrb.mxu1 %v4602_v14 }
 0x6d3   :  { %2281 = vmatpush.msrb.mxu2 %v4618_v3  ;;  %2301 = vmatpush.msrb.mxu3 %v4698_v32 }
 0x6d4   :  { %2185 = vmatpush.msra.mxu0 %v4704_v36  ;;  %2262 = vmatpush.msrb.mxu1 %v4608_v18 }
 0x6d5   :  { %2282 = vmatpush.msrb.mxu2 %v4622_v20  ;;  %2302 = vmatpush.msrb.mxu3 %v4704_v36 }
 0x6d6   :  { %2186 = vmatpush.msra.mxu0 %v4710_v37  ;;  %2263 = vmatpush.msrb.mxu1 %v4616_v35 }
 0x6d7   :  { %2187 = vmatmul.f32.vlgmr.msra.gmra.mxu0 %v5122_v4  ;;  %2283 = vmatpush.msrb.mxu2 %v4628_v15 }
 0x6d8   :  { %2365 = vmatpush.msrb.mxu0 %v4512_v48  ;;  %2303 = vmatpush.msrb.mxu3 %v4710_v37 }
 0x6d9   :  { %2385 = vmatpush.msra.mxu1 %v4531_v24  ;;  %2405 = vmatpush.msra.mxu2 %v4620_v55 }
 0x6da   :  { %2366 = vmatpush.msrb.mxu0 %v4518_v62  ;;  %2482 = vmatpush.msra.mxu3 %v4512_v48 }
 0x6db   :  { %2386 = vmatpush.msra.mxu1 %v4539_v51  ;;  %2406 = vmatpush.msra.mxu2 %v4626_v12 }
 0x6dc   :  { %2367 = vmatpush.msrb.mxu0 %v4529_v9  ;;  %2483 = vmatpush.msra.mxu3 %v4518_v62 }
 0x6dd   :  { %2387 = vmatpush.msra.mxu1 %v4545_v11  ;;  %2407 = vmatpush.msra.mxu2 %v4633_v16 }
 0x6de   :  { %2368 = vmatpush.msrb.mxu0 %v4537_v58  ;;  %2484 = vmatpush.msra.mxu3 %v4529_v9 }
 0x6df   :  { %2388 = vmatpush.msra.mxu1 %v4551_v10  ;;  %2408 = vmatpush.msra.mxu2 %v4641_v60 }
 0x6e0   :  { %2369 = vmatpush.msrb.mxu0 %v4543_v47  ;;  %2485 = vmatpush.msra.mxu3 %v4537_v58 }
 0x6e1   :  { %2389 = vmatpush.msra.mxu1 %v4558_v30  ;;  %2409 = vmatpush.msra.mxu2 %v4644_v25 }
 0x6e2   :  { %2370 = vmatpush.msrb.mxu0 %v4549_v28  ;;  %2486 = vmatpush.msra.mxu3 %v4543_v47 }
 0x6e3   :  { %2390 = vmatpush.msra.mxu1 %v4564_v31  ;;  %2410 = vmatpush.msra.mxu2 %v4648_v26 }
 0x6e4   :  { %2371 = vmatpush.msrb.mxu0 %v4556_v23  ;;  %2487 = vmatpush.msra.mxu3 %v4549_v28 }
 0x6e5   :  { %2391 = vmatpush.msra.mxu1 %v4570_v38  ;;  %2411 = vmatpush.msra.mxu2 %v4658_v27 }
 0x6e6   :  { %2372 = vmatpush.msrb.mxu0 %v4562_v29  ;;  %2488 = vmatpush.msra.mxu3 %v4556_v23 }
 0x6e7   :  { %2392 = vmatpush.msra.mxu1 %v4576_v44  ;;  %2412 = vmatpush.msra.mxu2 %v4664_v33 }
 0x6e8   :  { %2373 = vmatpush.msrb.mxu0 %v4568_v34  ;;  %2489 = vmatpush.msra.mxu3 %v4562_v29 }
 0x6e9   :  { %2393 = vmatpush.msra.mxu1 %v4582_v50  ;;  %2413 = vmatpush.msra.mxu2 %v4668_v39 }
 0x6ea   :  { %2374 = vmatpush.msrb.mxu0 %v4574_v41  ;;  %2490 = vmatpush.msra.mxu3 %v4568_v34 }
 0x6eb   :  { %2394 = vmatpush.msra.mxu1 %v4588_v43  ;;  %2414 = vmatpush.msra.mxu2 %v4677_v40 }
 0x6ec   :  { %2375 = vmatpush.msrb.mxu0 %v4580_v61  ;;  %2491 = vmatpush.msra.mxu3 %v4574_v41 }
 0x6ed   :  { %2395 = vmatpush.msra.mxu1 %v4598_v1  ;;  %2415 = vmatpush.msra.mxu2 %v4682_v45 }
 0x6ee   :  { %2376 = vmatpush.msrb.mxu0 %v4586_v42  ;;  %2492 = vmatpush.msra.mxu3 %v4580_v61 }
 0x6ef   :  { %2396 = vmatpush.msra.mxu1 %v4604_v0  ;;  %2416 = vmatpush.msra.mxu2 %v4686_v46 }
 0x6f0   :  { %2377 = vmatpush.msrb.mxu0 %v4596_v57  ;;  %2493 = vmatpush.msra.mxu3 %v4586_v42 }
 0x6f1   :  { %2397 = vmatpush.msra.mxu1 %v4610_v6  ;;  %2417 = vmatpush.msra.mxu2 %v4692_v2 }
 0x6f2   :  { %2378 = vmatpush.msrb.mxu0 %v4602_v14  ;;  %2494 = vmatpush.msra.mxu3 %v4596_v57 }
 0x6f3   :  { %2398 = vmatpush.msra.mxu1 %v4618_v3  ;;  %2418 = vmatpush.msra.mxu2 %v4698_v32 }
 0x6f4   :  { %2379 = vmatpush.msrb.mxu0 %v4608_v18  ;;  %2495 = vmatpush.msra.mxu3 %v4602_v14 }
 0x6f5   :  { %2399 = vmatpush.msra.mxu1 %v4622_v20  ;;  %2419 = vmatpush.msra.mxu2 %v4704_v36 }
 0x6f6   :  { %2380 = vmatpush.msrb.mxu0 %v4616_v35  ;;  %2496 = vmatpush.msra.mxu3 %v4608_v18 }
 0x6f7   :  { %2400 = vmatpush.msra.mxu1 %v4628_v15  ;;  %2420 = vmatpush.msra.mxu2 %v4710_v37 }
 0x6f8   :  { %2502 = vmatpush.msra.mxu0 %v4531_v24  ;;  %2497 = vmatpush.msra.mxu3 %v4616_v35 }
 0x6fa   :  { %2503 = vmatpush.msra.mxu0 %v4539_v51 }
 0x6fc   :  { %2504 = vmatpush.msra.mxu0 %v4545_v11 }
 0x6fe   :  { %2505 = vmatpush.msra.mxu0 %v4551_v10 }
 0x700   :  { %2506 = vmatpush.msra.mxu0 %v4558_v30 }
 0x702   :  { %2507 = vmatpush.msra.mxu0 %v4564_v31 }
 0x704   :  { %2508 = vmatpush.msra.mxu0 %v4570_v38 }
 0x706   :  { %2509 = vmatpush.msra.mxu0 %v4576_v44 }
 0x708   :  { %2510 = vmatpush.msra.mxu0 %v4582_v50 }
 0x70a   :  { %2511 = vmatpush.msra.mxu0 %v4588_v43 }
 0x70c   :  { %2512 = vmatpush.msra.mxu0 %v4598_v1 }
 0x70e   :  { %2513 = vmatpush.msra.mxu0 %v4604_v0 }
 0x710   :  { %2514 = vmatpush.msra.mxu0 %v4610_v6 }
 0x712   :  { %2515 = vmatpush.msra.mxu0 %v4618_v3 }
 0x714   :  { %2516 = vmatpush.msra.mxu0 %v4622_v20 }
 0x716   :  { %2517 = vmatpush.msra.mxu0 %v4628_v15 }
 0x72e   :  { %v1827_v56 = vpop.f32.mrf.mxu0  ;;  %v1872_v63 = vpop.f32.mrf.mxu1 }
 0x72f   :  { %v1828_v8 = vadd.f32 %v3380_v49, %v1827_v56  ;;  %v1873_v53 = vadd.f32 %v3381_v54, %v1872_v63  ;;  %v3384_v56 = vld [vmem:[%s5125_s17 + $0x2] ss:$0 sm:$0xff] }
 0x730   :  { %v3385_v63 = vld [vmem:[%s5126_s25 + $0x2] ss:$0 sm:$0xff] }
 0x731   :  { %1833 = vst [vmem:[#allocation5] sm:$0xff] %v1828_v8 }
 0x732   :  { %1878 = vst [vmem:[#allocation6] sm:$0xff] %v1873_v53 }
 0x735   :  { %v1919_v19 = vpop.f32.mrf.mxu2  ;;  %v1966_v17 = vpop.f32.mrf.mxu3 }
 0x736   :  { %v1920_v13 = vadd.f32 %v3382_v5, %v1919_v19  ;;  %v1967_v52 = vadd.f32 %v3383_v7, %v1966_v17  ;;  %v1830_v59 = vpop.f32.mrf.mxu0  ;;  %v1875_v21 = vpop.f32.mrf.mxu1 }
 0x737   :  { %v1831_v4 = vadd.f32 %v3380_v49, %v1830_v59  ;;  %v1876_v22 = vadd.f32 %v3381_v54, %v1875_v21 }
 0x738   :  { %1925 = vst [vmem:[#allocation5 + $0xc] sm:$0xff] %v1920_v13  ;;  %v2122_v49 = vld [vmem:[#allocation5] sm:$0x3] }
 0x739   :  { %1972 = vst [vmem:[#allocation6 + $0xc] sm:$0xff] %v1967_v52 }
 0x73a   :  { %1834 = vst [vmem:[#allocation5 + $0x8] sm:$0xf] %v1831_v4 }
 0x73b   :  { %1879 = vst [vmem:[#allocation6 + $0x8] sm:$0xf] %v1876_v22 }
 0x73d   :  { %v1922_v8 = vpop.f32.mrf.mxu2  ;;  %v1969_v15 = vpop.f32.mrf.mxu3 }
 0x73e   :  { %v1923_v53 = vadd.f32 %v3382_v5, %v1922_v8  ;;  %v1970_v35 = vadd.f32 %v3383_v7, %v1969_v15  ;;  %v2013_v37 = vpop.f32.mrf.mxu0  ;;  %v2060_v20 = vpop.f32.mrf.mxu1 }
 0x73f   :  { %v2014_v18 = vadd.f32 %v3384_v56, %v2013_v37  ;;  %v2061_v36 = vadd.f32 %v3385_v63, %v2060_v20  ;;  %v2125_v5 = vld [vmem:[#allocation5 + $0xc] sm:$0x3] }
 0x740   :  { %1926 = vst [vmem:[#allocation5 + $0x14] sm:$0xf] %v1923_v53 }
 0x741   :  { %1973 = vst [vmem:[#allocation6 + $0x14] sm:$0xf] %v1970_v35 }
 0x742   :  { %2019 = vst [vmem:[#allocation5 + $0x18] sm:$0xff] %v2014_v18  ;;  %v2123_v19 = vld [vmem:[#allocation6 + $0xa] sm:$0x3] }
 0x743   :  { %2066 = vst [vmem:[#allocation6 + $0x18] sm:$0xff] %v2061_v36  ;;  %v2124_v54 = vadd.f32 %v2123_v19, %v2122_v49  ;;  %v4814_v19 = vld [vmem:[%s5127_s29] ss:$0 sm:$0xff] }
 0x745   :  { %v2148_v17 = vpop.f32.mrf.mxu2  ;;  %v2168_v7 = vpop.f32.mrf.mxu3 }
 0x746   :  { %v2191_v13 = vadd.f32 %v2148_v17, %v2124_v54  ;;  %v2016_v22 = vpop.f32.mrf.mxu0  ;;  %v2063_v52 = vpop.f32.mrf.mxu1 }
 0x747   :  { %v2017_v59 = vadd.f32 %v3384_v56, %v2016_v22  ;;  %v2064_v21 = vadd.f32 %v3385_v63, %v2063_v52 }
 0x748   :  { %v3307_v4 = vmul.f32 -1.442695, %v2191_v13  ;;  %v2126_v15 = vld [vmem:[#allocation6 + $0x16] sm:$0x3] }
 0x749   :  { %2020 = vst [vmem:[#allocation5 + $0x20] sm:$0xf] %v2017_v59  ;;  %v2127_v20 = vadd.f32 %v2126_v15, %v2125_v5 }
 0x74a   :  { %3451 = vpow2.f32 %v3307_v4  ;;  %2067 = vst [vmem:[#allocation6 + $0x20] sm:$0xf] %v2064_v21 }
 0x74b   :  { %v2211_v18 = vadd.f32 %v2168_v7, %v2127_v20 }
 0x74d   :  { %v3308_v35 = vmul.f32 -1.442695, %v2211_v18 }
 0x74f   :  { %3453 = vpow2.f32 %v3308_v35  ;;  %v2128_v35 = vld [vmem:[#allocation5 + $0x18] sm:$0x3] }
 0x750   :  { %v3452_v36 = vpop.eup %3451 }
 0x751   :  { %v2195_v37 = vadd.f32 1.0, %v3452_v36  ;;  %v2129_v15 = vld [vmem:[#allocation6 + $0x22] sm:$0x3] }
 0x753   :  { %3455 = vrcp.f32 %v2195_v37  ;;  %v2207_v17 = vand.u32 2147483648, %v2195_v37  ;;  %v2205_v52 = vand.u32 2147483647, %v2195_v37  ;;  %vm2201_vm0 = vweird.f32 %v2195_v37 }
 0x754   :  { %v2188_v54 = vpop.f32.mrf.mxu0 }
 0x755   :  { %v3454_v8 = vpop.eup %3453  ;;  %v2189_v21 = vadd.f32 %v4814_v19, %v2188_v54  ;;  %v2208_v7 = vor.u32 1.1754944e-38, %v2207_v17  ;;  %vm2206_vm2 = vcmp.eq.f32.partialorder %v2205_v52, 8.507059e+37 }
 0x756   :  { %v2215_v53 = vadd.f32 1.0, %v3454_v8 }
 0x758   :  { %3457 = vrcp.f32 %v2215_v53  ;;  %v2227_v8 = vand.u32 2147483648, %v2215_v53  ;;  %vm2221_vm6 = vweird.f32 %v2215_v53  ;;  %v2225_v14 = vand.u32 2147483647, %v2215_v53 }
 0x759   :  { %v3456_v56 = vpop.eup %3455 }
 0x75a   :  { %v2197_v63 = vmul.f32 %v3456_v56, %v2195_v37  ;;  %vm2202_vm15 = vweird.f32 %v3456_v56  ;;  %v2228_v37 = vor.u32 1.1754944e-38, %v2227_v8  ;;  %vm2226_vm8 = vcmp.eq.f32.partialorder %v2225_v14, 8.507059e+37 }
 0x75b   :  { %vm2203_vm1 = vmor %vm2201_vm0, %vm2202_vm15 }
 0x75c   :  { %v2198_v49 = vsub.f32 1.0, %v2197_v63  ;;  %v2130_v63 = vadd.f32 %v2129_v15, %v2128_v35  ;;  %v2242_v15 = vld [vmem:[#allocation5 + $0xe] sm:$0x3] }
 0x75e   :  { %v3458_v13 = vpop.eup %3457  ;;  %v2199_v22 = vmul.f32 %v3456_v56, %v2198_v49 }
 0x75f   :  { %v2217_v59 = vmul.f32 %v3458_v13, %v2215_v53  ;;  %vm2222_vm5 = vweird.f32 %v3458_v13 }
 0x760   :  { %v2200_v4 = vadd.f32 %v3456_v56, %v2199_v22  ;;  %vm2223_vm7 = vmor %vm2221_vm6, %vm2222_vm5 }
 0x761   :  { %v2218_v5 = vsub.f32 1.0, %v2217_v59 }
 0x762   :  { %v2204_v20 = vsel %vm2203_vm1, %v3456_v56, %v2200_v4 }
 0x763   :  { %v2219_v18 = vmul.f32 %v3458_v13, %v2218_v5  ;;  %v2209_v36 = vsel %vm2206_vm2, %v2208_v7, %v2204_v20 }
 0x764   :  { %v2231_v49 = vmul.f32 %v2209_v36, %v2189_v21 }
 0x765   :  { %v2220_v3 = vadd.f32 %v3458_v13, %v2219_v18 }
 0x766   :  { %v2232_v54 = vadd.f32 %v2231_v49, %v2130_v63 }
 0x767   :  { %v2224_v22 = vsel %vm2223_vm7, %v3458_v13, %v2220_v3  ;;  %v2243_v13 = vld [vmem:[#allocation6 + $0x14] sm:$0x3] }
 0x768   :  { %3459 = vtanh.f32 %v2232_v54  ;;  %v2229_v59 = vsel %vm2226_vm8, %v2228_v37, %v2224_v22  ;;  %v2244_v7 = vadd.f32 %v2243_v13, %v2242_v15  ;;  %v2245_v13 = vld [vmem:[#allocation5 + $0x1a] sm:$0x3] }
 0x769   :  { %v2234_v17 = vsub.f32 1.0, %v2229_v59  ;;  %v2236_v4 = vmul.f32 0.0, %v2229_v59 }
 0x76e   :  { %v3460_v56 = vpop.eup %3459 }
 0x76f   :  { %v2235_v52 = vmul.f32 %v3460_v56, %v2234_v17 }
 0x771   :  { %v4817_v5 = vadd.f32 %v2236_v4, %v2235_v52 }
 0x773   :  { %2238 = vst [vmem:[#allocation7] sm:$0x3] %v4817_v5  ;;  %2264 = vmatmul.f32.vlgmr.msrb.gmra.mxu1 %v4817_v5  ;;  %2284 = vmatmul.f32.vlgmr.msrb.gmra.mxu2 %v4817_v5 }
 0x774   :  { %2304 = vmatmul.f32.vlgmr.msrb.gmra.mxu3 %v4817_v5  ;;  %2522 = vmatpush.msrb.mxu1 %v4620_v55 }
 0x775   :  { %2599 = vmatpush.msrb.mxu2 %v4512_v48  ;;  %2619 = vmatpush.msrb.mxu3 %v4531_v24  ;;  %v5128_v48 = vld [vmem:[#allocation40_spill] sm:$0xff]  ;;  %v5131_v24 = vld [vmem:[#allocation43_spill] sm:$0xff] }
 0x776   :  { %2523 = vmatpush.msrb.mxu1 %v4626_v12 }
 0x777   :  { %2600 = vmatpush.msrb.mxu2 %v4518_v62  ;;  %2620 = vmatpush.msrb.mxu3 %v4539_v51  ;;  %v5129_v62 = vld [vmem:[#allocation41_spill] sm:$0xff] }
 0x778   :  { %2524 = vmatpush.msrb.mxu1 %v4633_v16  ;;  %v5133_v51 = vld [vmem:[#allocation45_spill] sm:$0xff] }
 0x779   :  { %2601 = vmatpush.msrb.mxu2 %v4529_v9  ;;  %2621 = vmatpush.msrb.mxu3 %v4545_v11  ;;  %v5130_v9 = vld [vmem:[#allocation42_spill] sm:$0xff]  ;;  %v5135_v11 = vld [vmem:[#allocation39_spill] sm:$0xff] }
 0x77a   :  { %2525 = vmatpush.msrb.mxu1 %v4641_v60 }
 0x77b   :  { %2602 = vmatpush.msrb.mxu2 %v4537_v58  ;;  %2622 = vmatpush.msrb.mxu3 %v4551_v10  ;;  %v5132_v58 = vld [vmem:[#allocation44_spill] sm:$0xff]  ;;  %v2239_v10 = vld [vmem:[#allocation5 + $0x2] sm:$0x3] }
 0x77c   :  { %2526 = vmatpush.msrb.mxu1 %v4644_v25 }
 0x77d   :  { %2603 = vmatpush.msrb.mxu2 %v4543_v47  ;;  %2623 = vmatpush.msrb.mxu3 %v4558_v30  ;;  %v5134_v47 = vld [vmem:[#allocation38_spill] sm:$0xff] }
 0x77e   :  { %2527 = vmatpush.msrb.mxu1 %v4648_v26 }
 0x77f   :  { %2604 = vmatpush.msrb.mxu2 %v4549_v28  ;;  %2624 = vmatpush.msrb.mxu3 %v4564_v31  ;;  %v2240_v28 = vld [vmem:[#allocation6 + $0x8] sm:$0x3] }
 0x780   :  { %2528 = vmatpush.msrb.mxu1 %v4658_v27  ;;  %v2241_v14 = vadd.f32 %v2240_v28, %v2239_v10  ;;  %v2246_v10 = vld [vmem:[#allocation6 + $0x20] sm:$0x3] }
 0x781   :  { %2605 = vmatpush.msrb.mxu2 %v4556_v23  ;;  %2625 = vmatpush.msrb.mxu3 %v4570_v38 }
 0x782   :  { %2529 = vmatpush.msrb.mxu1 %v4664_v33 }
 0x783   :  { %2606 = vmatpush.msrb.mxu2 %v4562_v29  ;;  %2626 = vmatpush.msrb.mxu3 %v4576_v44 }
 0x784   :  { %2530 = vmatpush.msrb.mxu1 %v4668_v39 }
 0x785   :  { %2607 = vmatpush.msrb.mxu2 %v4568_v34  ;;  %2627 = vmatpush.msrb.mxu3 %v4582_v50 }
 0x786   :  { %2531 = vmatpush.msrb.mxu1 %v4677_v40 }
 0x787   :  { %2608 = vmatpush.msrb.mxu2 %v4574_v41  ;;  %2628 = vmatpush.msrb.mxu3 %v4588_v43 }
 0x788   :  { %2532 = vmatpush.msrb.mxu1 %v4682_v45 }
 0x789   :  { %2609 = vmatpush.msrb.mxu2 %v4580_v61  ;;  %2629 = vmatpush.msrb.mxu3 %v4598_v1 }
 0x78a   :  { %2533 = vmatpush.msrb.mxu1 %v4686_v46 }
 0x78b   :  { %2610 = vmatpush.msrb.mxu2 %v4586_v42  ;;  %2630 = vmatpush.msrb.mxu3 %v4604_v0 }
 0x78c   :  { %2534 = vmatpush.msrb.mxu1 %v4692_v2 }
 0x78d   :  { %2611 = vmatpush.msrb.mxu2 %v4596_v57  ;;  %2631 = vmatpush.msrb.mxu3 %v4610_v6 }
 0x78e   :  { %2535 = vmatpush.msrb.mxu1 %v4698_v32 }
 0x78f   :  { %2612 = vmatpush.msrb.mxu2 %v5128_v48  ;;  %2632 = vmatpush.msrb.mxu3 %v5129_v62 }
 0x790   :  { %2536 = vmatpush.msrb.mxu1 %v5130_v9 }
 0x791   :  { %2613 = vmatpush.msrb.mxu2 %v5131_v24  ;;  %2633 = vmatpush.msrb.mxu3 %v5132_v58 }
 0x792   :  { %2537 = vmatpush.msrb.mxu1 %v5133_v51 }
 0x793   :  { %2614 = vmatpush.msrb.mxu2 %v5134_v47  ;;  %2634 = vmatpush.msrb.mxu3 %v5135_v11 }
 0x7f0   :  { %v2265_v3 = vpop.f32.mrf.mxu1 }
 0x7f1   :  { %v2308_v53 = vadd.f32 %v2265_v3, %v2241_v14 }
 0x7f3   :  { %v3309_v21 = vmul.f32 -1.442695, %v2308_v53 }
 0x7f5   :  { %3461 = vpow2.f32 %v3309_v21 }
 0x7f6   :  { %v2285_v20 = vpop.f32.mrf.mxu2 }
 0x7f7   :  { %v2328_v18 = vadd.f32 %v2285_v20, %v2244_v7  ;;  %v2305_v4 = vpop.f32.mrf.mxu3  ;;  %v2247_v7 = vadd.f32 %v2246_v10, %v2245_v13  ;;  %v3539_v13 = vld [vmem:[#allocation20 + $0x60] sm:$0xff] }
 0x7f8   :  { %v2306_v21 = vadd.f32 %v4814_v19, %v2305_v4 }
 0x7f9   :  { %v3310_v35 = vmul.f32 -1.442695, %v2328_v18 }
 0x7fb   :  { %v3462_v36 = vpop.eup %3461  ;;  %3463 = vpow2.f32 %v3310_v35 }
 0x7fc   :  { %v2312_v8 = vadd.f32 1.0, %v3462_v36 }
 0x7fe   :  { %3465 = vrcp.f32 %v2312_v8  ;;  %v2324_v59 = vand.u32 2147483648, %v2312_v8  ;;  %v2322_v56 = vand.u32 2147483647, %v2312_v8  ;;  %vm2318_vm10 = vweird.f32 %v2312_v8 }
 0x800   :  { %v2325_v3 = vor.u32 1.1754944e-38, %v2324_v59  ;;  %vm2323_vm13 = vcmp.eq.f32.partialorder %v2322_v56, 8.507059e+37 }
 0x801   :  { %v3464_v63 = vpop.eup %3463 }
 0x802   :  { %v2332_v49 = vadd.f32 1.0, %v3464_v63 }
 0x804   :  { %v3466_v54 = vpop.eup %3465  ;;  %3467 = vrcp.f32 %v2332_v49  ;;  %v2344_v35 = vand.u32 2147483648, %v2332_v49  ;;  %v2342_v63 = vand.u32 2147483647, %v2332_v49  ;;  %vm2338_vm15 = vweird.f32 %v2332_v49 }
 0x805   :  { %v2314_v22 = vmul.f32 %v3466_v54, %v2312_v8  ;;  %vm2319_vm9 = vweird.f32 %v3466_v54 }
 0x806   :  { %vm2320_vm12 = vmor %vm2318_vm10, %vm2319_vm9  ;;  %v2345_v8 = vor.u32 1.1754944e-38, %v2344_v35  ;;  %vm2343_vm1 = vcmp.eq.f32.partialorder %v2342_v63, 8.507059e+37 }
 0x807   :  { %v2315_v37 = vsub.f32 1.0, %v2314_v22 }
 0x809   :  { %v2316_v17 = vmul.f32 %v3466_v54, %v2315_v37 }
 0x80a   :  { %v3468_v52 = vpop.eup %3467 }
 0x80b   :  { %v2334_v28 = vmul.f32 %v3468_v52, %v2332_v49  ;;  %v2317_v14 = vadd.f32 %v3466_v54, %v2316_v17  ;;  %vm2339_vm14 = vweird.f32 %v3468_v52  ;;  %v3533_v49 = vld [vmem:[#allocation20 + $0x78] sm:$0xff] }
 0x80c   :  { %vm2340_vm0 = vmor %vm2338_vm15, %vm2339_vm14 }
 0x80d   :  { %v2335_v53 = vsub.f32 1.0, %v2334_v28  ;;  %v2321_v15 = vsel %vm2320_vm12, %v3466_v54, %v2317_v14  ;;  %v3535_v14 = vld [vmem:[#allocation20 + $0x70] sm:$0xff] }
 0x80e   :  { %v2326_v20 = vsel %vm2323_vm13, %v2325_v3, %v2321_v15  ;;  %v3537_v3 = vld [vmem:[#allocation20 + $0x68] sm:$0xff]  ;;  %v3542_v15 = vld [vmem:[#allocation20 + $0x50] sm:$0xff] }
 0x80f   :  { %v2336_v18 = vmul.f32 %v3468_v52, %v2335_v53  ;;  %v2348_v36 = vmul.f32 %v2326_v20, %v2306_v21  ;;  %v3538_v53 = vld [vmem:[#allocation20 + $0xe8] sm:$0xff]  ;;  %v3541_v21 = vld [vmem:[#allocation20 + $0x58] sm:$0xff] }
 0x811   :  { %v2337_v22 = vadd.f32 %v3468_v52, %v2336_v18  ;;  %v2349_v37 = vadd.f32 %v2348_v36, %v2247_v7 }
 0x813   :  { %v2341_v17 = vsel %vm2340_vm0, %v3468_v52, %v2337_v22  ;;  %3469 = vtanh.f32 %v2349_v37  ;;  %v3534_v52 = vld [vmem:[#allocation20 + $0xf8] sm:$0xff]  ;;  %v2363_v37 = vld [vmem:[#allocation6 + $0x1e] sm:$0x3] }
 0x814   :  { %v2346_v59 = vsel %vm2343_vm1, %v2345_v8, %v2341_v17  ;;  %v2362_v22 = vld [vmem:[#allocation5 + $0x1c] sm:$0x3] }
 0x815   :  { %v2351_v28 = vsub.f32 1.0, %v2346_v59  ;;  %v2353_v56 = vmul.f32 %v2346_v59, %v4817_v5  ;;  %v3536_v5 = vld [vmem:[#allocation20 + $0xf0] sm:$0xff] }
 0x819   :  { %v3470_v4 = vpop.eup %3469 }
 0x81a   :  { %v2352_v54 = vmul.f32 %v3470_v4, %v2351_v28 }
 0x81c   :  { %v4873_v10 = vadd.f32 %v2353_v56, %v2352_v54  ;;  %v2364_v56 = vadd.f32 %v2363_v37, %v2362_v22 }
 0x81e   :  { %2355 = vst [vmem:[#allocation7 + $0x2] sm:$0x3] %v4873_v10  ;;  %2381 = vmatmul.f32.vlgmr.msrb.gmra.mxu0 %v4873_v10  ;;  %2401 = vmatmul.f32.vlgmr.msra.gmra.mxu1 %v4873_v10 }
 0x81f   :  { %2421 = vmatmul.f32.vlgmr.msra.gmra.mxu2 %v4873_v10  ;;  %2639 = vmatpush.msrb.mxu0 %v4620_v55  ;;  %v3540_v55 = vld [vmem:[#allocation20 + $0xe0] sm:$0xff] }
 0x820   :  { %2716 = vmatpush.msra.mxu1 %v3533_v49  ;;  %2736 = vmatpush.msra.mxu2 %v3534_v52 }
 0x821   :  { %2640 = vmatpush.msrb.mxu0 %v4626_v12 }
 0x822   :  { %2717 = vmatpush.msra.mxu1 %v3535_v14  ;;  %2737 = vmatpush.msra.mxu2 %v3536_v5 }
 0x823   :  { %2641 = vmatpush.msrb.mxu0 %v4633_v16 }
 0x824   :  { %2718 = vmatpush.msra.mxu1 %v3537_v3  ;;  %2738 = vmatpush.msra.mxu2 %v3538_v53 }
 0x825   :  { %2642 = vmatpush.msrb.mxu0 %v4641_v60 }
 0x826   :  { %2719 = vmatpush.msra.mxu1 %v3539_v13  ;;  %2739 = vmatpush.msra.mxu2 %v3540_v55 }
 0x827   :  { %2643 = vmatpush.msrb.mxu0 %v4644_v25 }
 0x828   :  { %2720 = vmatpush.msra.mxu1 %v3541_v21  ;;  %2740 = vmatpush.msra.mxu2 %v4558_v30  ;;  %v2357_v30 = vld [vmem:[#allocation6 + $0x6] sm:$0x3] }
 0x829   :  { %2644 = vmatpush.msrb.mxu0 %v4648_v26 }
 0x82a   :  { %2721 = vmatpush.msra.mxu1 %v3542_v15  ;;  %2741 = vmatpush.msra.mxu2 %v4564_v31  ;;  %v2360_v31 = vld [vmem:[#allocation6 + $0x12] sm:$0x3] }
 0x82b   :  { %2645 = vmatpush.msrb.mxu0 %v4658_v27 }
 0x82c   :  { %2722 = vmatpush.msra.mxu1 %v4556_v23  ;;  %2742 = vmatpush.msra.mxu2 %v4570_v38  ;;  %v2356_v23 = vld [vmem:[#allocation5 + $0x4] sm:$0x3] }
 0x82d   :  { %2646 = vmatpush.msrb.mxu0 %v4664_v33 }
 0x82e   :  { %2723 = vmatpush.msra.mxu1 %v4562_v29  ;;  %2743 = vmatpush.msra.mxu2 %v4576_v44  ;;  %v2359_v29 = vld [vmem:[#allocation5 + $0x10] sm:$0x3] }
 0x82f   :  { %2647 = vmatpush.msrb.mxu0 %v4668_v39  ;;  %v2361_v38 = vadd.f32 %v2360_v31, %v2359_v29 }
 0x830   :  { %2724 = vmatpush.msra.mxu1 %v4568_v34  ;;  %2744 = vmatpush.msra.mxu2 %v4582_v50  ;;  %v2358_v34 = vadd.f32 %v2357_v30, %v2356_v23  ;;  %v3543_v30 = vld [vmem:[#allocation20 + $0x178] sm:$0xff] }
 0x831   :  { %2648 = vmatpush.msrb.mxu0 %v4677_v40 }
 0x832   :  { %2725 = vmatpush.msra.mxu1 %v4574_v41  ;;  %2745 = vmatpush.msra.mxu2 %v4588_v43 }
 0x833   :  { %2649 = vmatpush.msrb.mxu0 %v4682_v45 }
 0x834   :  { %2726 = vmatpush.msra.mxu1 %v4580_v61  ;;  %2746 = vmatpush.msra.mxu2 %v4598_v1 }
 0x835   :  { %2650 = vmatpush.msrb.mxu0 %v4686_v46 }
 0x836   :  { %2727 = vmatpush.msra.mxu1 %v4586_v42  ;;  %2747 = vmatpush.msra.mxu2 %v4604_v0 }
 0x837   :  { %2651 = vmatpush.msrb.mxu0 %v4692_v2 }
 0x838   :  { %2728 = vmatpush.msra.mxu1 %v4596_v57  ;;  %2748 = vmatpush.msra.mxu2 %v4610_v6 }
 0x839   :  { %2652 = vmatpush.msrb.mxu0 %v4698_v32 }
 0x83a   :  { %2729 = vmatpush.msra.mxu1 %v5128_v48  ;;  %2749 = vmatpush.msra.mxu2 %v5129_v62 }
 0x83b   :  { %2653 = vmatpush.msrb.mxu0 %v5130_v9 }
 0x83c   :  { %2730 = vmatpush.msra.mxu1 %v5131_v24  ;;  %2750 = vmatpush.msra.mxu2 %v5132_v58 }
 0x83d   :  { %2654 = vmatpush.msrb.mxu0 %v5133_v51 }
 0x83e   :  { %2731 = vmatpush.msra.mxu1 %v5134_v47  ;;  %2751 = vmatpush.msra.mxu2 %v5135_v11 }
 0x89b   :  { %v2382_v41 = vpop.f32.mrf.mxu0  ;;  %v2402_v44 = vpop.f32.mrf.mxu1 }
 0x89c   :  { %v2425_v61 = vadd.f32 %v2382_v41, %v2358_v34  ;;  %v2445_v50 = vadd.f32 %v2402_v44, %v2361_v38 }
 0x89e   :  { %v3311_v42 = vmul.f32 -1.442695, %v2425_v61  ;;  %v3312_v43 = vmul.f32 -1.442695, %v2445_v50 }
 0x8a0   :  { %3471 = vpow2.f32 %v3311_v42 }
 0x8a1   :  { %3473 = vpow2.f32 %v3312_v43 }
 0x8a2   :  { %v2422_v36 = vpop.f32.mrf.mxu2 }
 0x8a3   :  { %v2423_v17 = vadd.f32 %v4814_v19, %v2422_v36 }
 0x8a6   :  { %v3472_v57 = vpop.eup %3471 }
 0x8a7   :  { %v3474_v1 = vpop.eup %3473  ;;  %v2429_v0 = vadd.f32 1.0, %v3472_v57 }
 0x8a8   :  { %v2449_v6 = vadd.f32 1.0, %v3474_v1 }
 0x8a9   :  { %3475 = vrcp.f32 %v2429_v0  ;;  %v2441_v7 = vand.u32 2147483648, %v2429_v0  ;;  %v2439_v18 = vand.u32 2147483647, %v2429_v0  ;;  %vm2435_vm5 = vweird.f32 %v2429_v0 }
 0x8aa   :  { %3477 = vrcp.f32 %v2449_v6  ;;  %v2461_v54 = vand.u32 2147483648, %v2449_v6  ;;  %vm2455_vm9 = vweird.f32 %v2449_v6  ;;  %v2459_v52 = vand.u32 2147483647, %v2449_v6 }
 0x8ab   :  { %v2442_v8 = vor.u32 1.1754944e-38, %v2441_v7  ;;  %vm2440_vm7 = vcmp.eq.f32.partialorder %v2439_v18, 8.507059e+37 }
 0x8ac   :  { %v2462_v3 = vor.u32 1.1754944e-38, %v2461_v54  ;;  %vm2460_vm12 = vcmp.eq.f32.partialorder %v2459_v52, 8.507059e+37  ;;  %v3389_v52 = vld [vmem:[#allocation10] ss:$0 sm:$0xff] }
 0x8af   :  { %v3476_v48 = vpop.eup %3475 }
 0x8b0   :  { %v3478_v62 = vpop.eup %3477  ;;  %v2431_v24 = vmul.f32 %v3476_v48, %v2429_v0  ;;  %vm2436_vm2 = vweird.f32 %v3476_v48 }
 0x8b1   :  { %v2451_v58 = vmul.f32 %v3478_v62, %v2449_v6  ;;  %vm2437_vm6 = vmor %vm2435_vm5, %vm2436_vm2  ;;  %vm2456_vm8 = vweird.f32 %v3478_v62  ;;  %v2479_v6 = vld [vmem:[#allocation5 + $0x1e] sm:$0x3] }
 0x8b2   :  { %v2432_v47 = vsub.f32 1.0, %v2431_v24  ;;  %vm2457_vm10 = vmor %vm2455_vm9, %vm2456_vm8 }
 0x8b3   :  { %v2452_v11 = vsub.f32 1.0, %v2451_v58 }
 0x8b4   :  { %v2433_v20 = vmul.f32 %v3476_v48, %v2432_v47 }
 0x8b5   :  { %v2453_v35 = vmul.f32 %v3478_v62, %v2452_v11 }
 0x8b6   :  { %v2434_v63 = vadd.f32 %v3476_v48, %v2433_v20 }
 0x8b7   :  { %v2454_v28 = vadd.f32 %v3478_v62, %v2453_v35 }
 0x8b8   :  { %v2438_v59 = vsel %vm2437_vm6, %v3476_v48, %v2434_v63  ;;  %v2480_v48 = vld [vmem:[#allocation6 + $0x1c] sm:$0x3] }
 0x8b9   :  { %v2443_v4 = vsel %vm2440_vm7, %v2442_v8, %v2438_v59  ;;  %v2458_v5 = vsel %vm2457_vm10, %v3478_v62, %v2454_v28  ;;  %v2481_v20 = vadd.f32 %v2480_v48, %v2479_v6 }
 0x8ba   :  { %v2465_v49 = vmul.f32 %v2443_v4, %v2423_v17  ;;  %v2463_v53 = vsel %vm2460_vm12, %v2462_v3, %v2458_v5  ;;  %v2590_v3 = vld [vmem:[#allocation5 + $0x8] sm:$0x3] }
 0x8bb   :  { %v2468_v13 = vsub.f32 1.0, %v2463_v53  ;;  %v2470_v15 = vmul.f32 %v2463_v53, %v4873_v10  ;;  %v2593_v53 = vld [vmem:[#allocation5 + $0x14] sm:$0x3] }
 0x8bc   :  { %v2466_v14 = vadd.f32 %v2465_v49, %v2364_v56 }
 0x8be   :  { %3479 = vtanh.f32 %v2466_v14 }
 0x8c4   :  { %v3480_v55 = vpop.eup %3479 }
 0x8c5   :  { %v2469_v21 = vmul.f32 %v3480_v55, %v2468_v13  ;;  %v2591_v13 = vld [vmem:[#allocation6 + $0x2] sm:$0x3]  ;;  %v2594_v55 = vld [vmem:[#allocation6 + $0xe] sm:$0x3] }
 0x8c7   :  { %v4919_v23 = vadd.f32 %v2470_v15, %v2469_v21  ;;  %v2592_v21 = vadd.f32 %v2591_v13, %v2590_v3  ;;  %v2595_v15 = vadd.f32 %v2594_v55, %v2593_v53 }
 0x8c9   :  { %2472 = vst [vmem:[#allocation7 + $0x4] sm:$0x3] %v4919_v23  ;;  %2498 = vmatmul.f32.vlgmr.msra.gmra.mxu3 %v4919_v23  ;;  %2518 = vmatmul.f32.vlgmr.msra.gmra.mxu0 %v4919_v23 }
 0x8ca   :  { %2538 = vmatmul.f32.vlgmr.msrb.gmra.mxu1 %v4919_v23  ;;  %2756 = vmatpush.msra.mxu3 %v3543_v30 }
 0x8cc   :  { %2757 = vmatpush.msra.mxu3 %v4626_v12  ;;  %v2476_v12 = vld [vmem:[#allocation5 + $0x12] sm:$0x3] }
 0x8ce   :  { %2758 = vmatpush.msra.mxu3 %v4633_v16  ;;  %v2477_v16 = vld [vmem:[#allocation6 + $0x10] sm:$0x3] }
 0x8d0   :  { %2759 = vmatpush.msra.mxu3 %v4641_v60  ;;  %v2478_v60 = vadd.f32 %v2477_v16, %v2476_v12  ;;  %v2832_v4 = vld [vmem:[#allocation7 + $0x4] sm:$0x3] }
 0x8d1   :  { %v2837_v49 = vld [vmem:[#allocation7 + $0x4] sm:$0x3] }
 0x8d2   :  { %2760 = vmatpush.msra.mxu3 %v4644_v25 }
 0x8d4   :  { %2761 = vmatpush.msra.mxu3 %v4648_v26 }
 0x8d6   :  { %2762 = vmatpush.msra.mxu3 %v4658_v27  ;;  %v2473_v27 = vld [vmem:[#allocation5 + $0x6] sm:$0x3] }
 0x8d8   :  { %2763 = vmatpush.msra.mxu3 %v4664_v33  ;;  %v2474_v33 = vld [vmem:[#allocation6 + $0x4] sm:$0x3] }
 0x8da   :  { %2764 = vmatpush.msra.mxu3 %v4668_v39 }
 0x8dc   :  { %2765 = vmatpush.msra.mxu3 %v4677_v40  ;;  %v2475_v40 = vadd.f32 %v2474_v33, %v2473_v27 }
 0x8de   :  { %2766 = vmatpush.msra.mxu3 %v4682_v45 }
 0x8e0   :  { %2767 = vmatpush.msra.mxu3 %v4686_v46 }
 0x8e2   :  { %2768 = vmatpush.msra.mxu3 %v4692_v2 }
 0x8e4   :  { %2769 = vmatpush.msra.mxu3 %v4698_v32 }
 0x8e6   :  { %2770 = vmatpush.msra.mxu3 %v5130_v9 }
 0x8e8   :  { %2771 = vmatpush.msra.mxu3 %v5133_v51 }
 0x946   :  { %v2519_v25 = vpop.f32.mrf.mxu0 }
 0x947   :  { %v2562_v26 = vadd.f32 %v2519_v25, %v2478_v60  ;;  %v2539_v57 = vpop.f32.mrf.mxu1 }
 0x948   :  { %v2540_v62 = vadd.f32 %v4814_v19, %v2539_v57  ;;  %v2597_v57 = vld [vmem:[#allocation6 + $0x1a] sm:$0x3] }
 0x949   :  { %v3314_v39 = vmul.f32 -1.442695, %v2562_v26 }
 0x94b   :  { %3481 = vpow2.f32 %v3314_v39 }
 0x94c   :  { %v2499_v45 = vpop.f32.mrf.mxu3 }
 0x94d   :  { %v2542_v46 = vadd.f32 %v2499_v45, %v2475_v40 }
 0x94f   :  { %v3313_v10 = vmul.f32 -1.442695, %v2542_v46 }
 0x951   :  { %v3482_v2 = vpop.eup %3481  ;;  %3483 = vpow2.f32 %v3313_v10 }
 0x952   :  { %v2566_v32 = vadd.f32 1.0, %v3482_v2 }
 0x954   :  { %3485 = vrcp.f32 %v2566_v32  ;;  %v2578_v11 = vand.u32 2147483648, %v2566_v32  ;;  %vm2572_vm2 = vweird.f32 %v2566_v32  ;;  %v2576_v18 = vand.u32 2147483647, %v2566_v32 }
 0x956   :  { %v2579_v63 = vor.u32 1.1754944e-38, %v2578_v11  ;;  %vm2577_vm6 = vcmp.eq.f32.partialorder %v2576_v18, 8.507059e+37 }
 0x957   :  { %v3484_v9 = vpop.eup %3483 }
 0x958   :  { %v2546_v29 = vadd.f32 1.0, %v3484_v9 }
 0x95a   :  { %3487 = vrcp.f32 %v2546_v29  ;;  %v3486_v51 = vpop.eup %3485  ;;  %v2558_v61 = vand.u32 2147483648, %v2546_v29  ;;  %v2556_v42 = vand.u32 2147483647, %v2546_v29  ;;  %vm2552_vm14 = vweird.f32 %v2546_v29 }
 0x95b   :  { %v2568_v31 = vmul.f32 %v3486_v51, %v2566_v32  ;;  %vm2573_vm1 = vweird.f32 %v3486_v51 }
 0x95c   :  { %v2559_v0 = vor.u32 1.1754944e-38, %v2558_v61  ;;  %vm2557_vm0 = vcmp.eq.f32.partialorder %v2556_v42, 8.507059e+37  ;;  %vm2574_vm5 = vmor %vm2572_vm2, %vm2573_vm1 }
 0x95d   :  { %v2569_v41 = vsub.f32 1.0, %v2568_v31 }
 0x95f   :  { %v2570_v43 = vmul.f32 %v3486_v51, %v2569_v41 }
 0x960   :  { %v3488_v34 = vpop.eup %3487 }
 0x961   :  { %v2548_v38 = vmul.f32 %v3488_v34, %v2546_v29  ;;  %vm2553_vm13 = vweird.f32 %v3488_v34  ;;  %v2571_v58 = vadd.f32 %v3486_v51, %v2570_v43 }
 0x962   :  { %vm2554_vm15 = vmor %vm2552_vm14, %vm2553_vm13 }
 0x963   :  { %v2549_v44 = vsub.f32 1.0, %v2548_v38  ;;  %v2575_v36 = vsel %vm2574_vm5, %v3486_v51, %v2571_v58 }
 0x964   :  { %v2580_v22 = vsel %vm2577_vm6, %v2579_v63, %v2575_v36  ;;  %v2828_v36 = vld [vmem:[#allocation7 + $0x2] sm:$0x3] }
 0x965   :  { %v2550_v50 = vmul.f32 %v3488_v34, %v2549_v44  ;;  %v2585_v37 = vsub.f32 1.0, %v2580_v22  ;;  %v2587_v59 = vmul.f32 %v2580_v22, %v4919_v23  ;;  %v2596_v44 = vld [vmem:[#allocation5 + $0x20] sm:$0x3] }
 0x966   :  { %v2598_v6 = vadd.f32 %v2597_v57, %v2596_v44 }
 0x967   :  { %v2551_v1 = vadd.f32 %v3488_v34, %v2550_v50 }
 0x969   :  { %v2555_v24 = vsel %vm2554_vm15, %v3488_v34, %v2551_v1 }
 0x96a   :  { %v2560_v47 = vsel %vm2557_vm0, %v2559_v0, %v2555_v24 }
 0x96b   :  { %v2582_v7 = vmul.f32 %v2560_v47, %v2540_v62 }
 0x96d   :  { %v2583_v35 = vadd.f32 %v2582_v7, %v2481_v20 }
 0x96f   :  { %3489 = vtanh.f32 %v2583_v35 }
 0x975   :  { %v3490_v8 = vpop.eup %3489 }
 0x976   :  { %v2586_v17 = vmul.f32 %v3490_v8, %v2585_v37  ;;  %v2841_v37 = vld [vmem:[#allocation7 + $0x2] sm:$0x3] }
 0x978   :  { %v4942_v28 = vadd.f32 %v2587_v59, %v2586_v17  ;;  %v2707_v59 = vld [vmem:[#allocation5 + $0xa] sm:$0x3] }
 0x97a   :  { %2589 = vst [vmem:[#allocation7 + $0x6] sm:$0x3] %v4942_v28  ;;  %2615 = vmatmul.f32.vlgmr.msrb.gmra.mxu2 %v4942_v28  ;;  %2635 = vmatmul.f32.vlgmr.msrb.gmra.mxu3 %v4942_v28 }
 0x97b   :  { %2655 = vmatmul.f32.vlgmr.msrb.gmra.mxu0 %v4942_v28 }
 0x981   :  { %v2833_v54 = vld [vmem:[#allocation7 + $0x6] sm:$0x3] }
 0x982   :  { %v2836_v56 = vld [vmem:[#allocation7 + $0x6] sm:$0x3]  ;;  %v2834_v14 = vsel %vm1763_vm11, %v2832_v4, %v2833_v54 }
 0x983   :  { %v2838_v5 = vsel %vm1763_vm11, %v2836_v56, %v2837_v49  ;;  %2835 = vst [vmem:[#allocation9 + $0x4] sm:$0x3] %v2834_v14  ;;  %v2710_v49 = vld [vmem:[#allocation5 + $0x16] sm:$0x3] }
 0x984   :  { %2839 = vst [vmem:[#allocation9 + $0x6] sm:$0x3] %v2838_v5  ;;  %v2711_v5 = vld [vmem:[#allocation6 + $0xc] sm:$0x3] }
 0x985   :  { %v2712_v3 = vadd.f32 %v2711_v5, %v2710_v49 }
 0x9f8   :  { %v2656_v31 = vpop.f32.mrf.mxu0 }
 0x9f9   :  { %v2657_v61 = vadd.f32 %v4814_v19, %v2656_v31 }
 0x9fd   :  { %v2616_v23 = vpop.f32.mrf.mxu2  ;;  %v2636_v30 = vpop.f32.mrf.mxu3 }
 0x9fe   :  { %v2659_v12 = vadd.f32 %v2616_v23, %v2592_v21  ;;  %v2679_v16 = vadd.f32 %v2636_v30, %v2595_v15 }
 0xa00   :  { %v3315_v60 = vmul.f32 -1.442695, %v2659_v12  ;;  %v3316_v25 = vmul.f32 -1.442695, %v2679_v16 }
 0xa02   :  { %3491 = vpow2.f32 %v3315_v60 }
 0xa03   :  { %3493 = vpow2.f32 %v3316_v25 }
 0xa08   :  { %v3492_v26 = vpop.eup %3491 }
 0xa09   :  { %v3494_v27 = vpop.eup %3493  ;;  %v2663_v33 = vadd.f32 1.0, %v3492_v26 }
 0xa0a   :  { %v2683_v39 = vadd.f32 1.0, %v3494_v27 }
 0xa0b   :  { %3495 = vrcp.f32 %v2663_v33  ;;  %v2675_v32 = vand.u32 2147483648, %v2663_v33  ;;  %v2673_v51 = vand.u32 2147483647, %v2663_v33  ;;  %vm2669_vm8 = vweird.f32 %v2663_v33 }
 0xa0c   :  { %3497 = vrcp.f32 %v2683_v39  ;;  %v2695_v0 = vand.u32 2147483648, %v2683_v39  ;;  %vm2689_vm13 = vweird.f32 %v2683_v39  ;;  %v2693_v48 = vand.u32 2147483647, %v2683_v39 }
 0xa0d   :  { %v2676_v41 = vor.u32 1.1754944e-38, %v2675_v32  ;;  %vm2674_vm10 = vcmp.eq.f32.partialorder %v2673_v51, 8.507059e+37  ;;  %v2714_v32 = vld [vmem:[#allocation6 + $0x18] sm:$0x3] }
 0xa0e   :  { %v2696_v58 = vor.u32 1.1754944e-38, %v2695_v0  ;;  %vm2694_vm15 = vcmp.eq.f32.partialorder %v2693_v48, 8.507059e+37 }
 0xa11   :  { %v3496_v40 = vpop.eup %3495 }
 0xa12   :  { %v3498_v45 = vpop.eup %3497  ;;  %v2665_v46 = vmul.f32 %v3496_v40, %v2663_v33  ;;  %vm2670_vm7 = vweird.f32 %v3496_v40 }
 0xa13   :  { %v2685_v10 = vmul.f32 %v3498_v45, %v2683_v39  ;;  %vm2671_vm9 = vmor %vm2669_vm8, %vm2670_vm7  ;;  %vm2690_vm12 = vweird.f32 %v3498_v45 }
 0xa14   :  { %v2666_v2 = vsub.f32 1.0, %v2665_v46  ;;  %vm2691_vm14 = vmor %vm2689_vm13, %vm2690_vm12 }
 0xa15   :  { %v2686_v9 = vsub.f32 1.0, %v2685_v10 }
 0xa16   :  { %v2667_v29 = vmul.f32 %v3496_v40, %v2666_v2 }
 0xa17   :  { %v2687_v34 = vmul.f32 %v3498_v45, %v2686_v9 }
 0xa18   :  { %v2668_v38 = vadd.f32 %v3496_v40, %v2667_v29 }
 0xa19   :  { %v2688_v43 = vadd.f32 %v3498_v45, %v2687_v34 }
 0xa1a   :  { %v2672_v50 = vsel %vm2671_vm9, %v3496_v40, %v2668_v38 }
 0xa1b   :  { %v2677_v42 = vsel %vm2674_vm10, %v2676_v41, %v2672_v50  ;;  %v2692_v24 = vsel %vm2691_vm14, %v3498_v45, %v2688_v43  ;;  %v2713_v45 = vld [vmem:[#allocation5 + $0x22] sm:$0x3]  ;;  %vm2854_vm10 = vcmask 1045504  }
 0xa1c   :  { %v2699_v1 = vmul.f32 %v2677_v42, %v2657_v61  ;;  %v2697_v47 = vsel %vm2694_vm15, %v2696_v58, %v2692_v24  ;;  %v2715_v51 = vadd.f32 %v2714_v32, %v2713_v45 }
 0xa1d   :  { %v2702_v11 = vsub.f32 1.0, %v2697_v47  ;;  %v2704_v18 = vmul.f32 %v2697_v47, %v4942_v28  ;;  %v2708_v28 = vld [vmem:[#allocation6] sm:$0x3]  ;;  %v2845_v47 = vld [vmem:[#allocation7] sm:$0x3] }
 0xa1e   :  { %v2700_v62 = vadd.f32 %v2699_v1, %v2598_v6  ;;  %v2709_v4 = vadd.f32 %v2708_v28, %v2707_v59 }
 0xa20   :  { %3499 = vtanh.f32 %v2700_v62  ;;  %v2824_v62 = vld [vmem:[#allocation7] sm:$0x3] }
 0xa26   :  { %v3500_v7 = vpop.eup %3499 }
 0xa27   :  { %v2703_v20 = vmul.f32 %v3500_v7, %v2702_v11 }
 0xa29   :  { %v4954_v35 = vadd.f32 %v2704_v18, %v2703_v20  ;;  %v3387_v20 = vld [vmem:[%s5137_s3] ss:$0 sm:$0xff] }
 0xa2b   :  { %2706 = vst [vmem:[#allocation7 + $0x8] sm:$0x3] %v4954_v35  ;;  %2732 = vmatmul.f32.vlgmr.msra.gmra.mxu1 %v4954_v35  ;;  %2752 = vmatmul.f32.vlgmr.msra.gmra.mxu2 %v4954_v35 }
 0xa2c   :  { %2772 = vmatmul.f32.vlgmr.msra.gmra.mxu3 %v4954_v35 }
 0xa32   :  { %v2829_v63 = vld [vmem:[#allocation7 + $0x8] sm:$0x3] }
 0xa33   :  { %v2840_v22 = vld [vmem:[#allocation7 + $0x8] sm:$0x3]  ;;  %v2830_v8 = vsel %vm1763_vm11, %v2828_v36, %v2829_v63  ;;  %v3388_v63 = vld [vmem:[%s5137_s3] ss:$0 sm:$0xff] }
 0xa34   :  { %v2842_v17 = vsel %vm1763_vm11, %v2840_v22, %v2841_v37  ;;  %2831 = vst [vmem:[#allocation9 + $0x2] sm:$0x3] %v2830_v8 }
 0xa35   :  { %2843 = vst [vmem:[#allocation9 + $0x8] sm:$0x3] %v2842_v17 }
 0xaa8   :  { %v2733_v54 = vpop.f32.mrf.mxu1 }
 0xaa9   :  { %v2776_v56 = vadd.f32 %v2733_v54, %v2709_v4  ;;  %v3390_v54 = vld [vmem:[#allocation10] ss:$0 sm:$0xff] }
 0xaab   :  { %v3317_v14 = vmul.f32 -1.442695, %v2776_v56 }
 0xaad   :  { %3501 = vpow2.f32 %v3317_v14 }
 0xaae   :  { %v2753_v53 = vpop.f32.mrf.mxu2 }
 0xaaf   :  { %v2796_v13 = vadd.f32 %v2753_v53, %v2712_v3  ;;  %v2773_v39 = vpop.f32.mrf.mxu3 }
 0xab0   :  { %v2774_v9 = vadd.f32 %v4814_v19, %v2773_v39 }
 0xab1   :  { %v3318_v55 = vmul.f32 -1.442695, %v2796_v13 }
 0xab3   :  { %v3502_v21 = vpop.eup %3501  ;;  %3503 = vpow2.f32 %v3318_v55 }
 0xab4   :  { %v2780_v15 = vadd.f32 1.0, %v3502_v21 }
 0xab6   :  { %3505 = vrcp.f32 %v2780_v15  ;;  %v2792_v25 = vand.u32 2147483648, %v2780_v15  ;;  %v2790_v27 = vand.u32 2147483647, %v2780_v15  ;;  %vm2786_vm1 = vweird.f32 %v2780_v15 }
 0xab8   :  { %v2793_v10 = vor.u32 1.1754944e-38, %v2792_v25  ;;  %vm2791_vm5 = vcmp.eq.f32.partialorder %v2790_v27, 8.507059e+37 }
 0xab9   :  { %v3504_v23 = vpop.eup %3503 }
 0xaba   :  { %v2800_v30 = vadd.f32 1.0, %v3504_v23 }
 0xabc   :  { %v3506_v12 = vpop.eup %3505  ;;  %3507 = vrcp.f32 %v2800_v30  ;;  %v2812_v38 = vand.u32 2147483648, %v2800_v30  ;;  %v2810_v44 = vand.u32 2147483647, %v2800_v30  ;;  %vm2806_vm7 = vweird.f32 %v2800_v30 }
 0xabd   :  { %v2782_v16 = vmul.f32 %v3506_v12, %v2780_v15  ;;  %vm2787_vm0 = vweird.f32 %v3506_v12 }
 0xabe   :  { %vm2788_vm2 = vmor %vm2786_vm1, %vm2787_vm0  ;;  %v2813_v42 = vor.u32 1.1754944e-38, %v2812_v38  ;;  %vm2811_vm9 = vcmp.eq.f32.partialorder %v2810_v44, 8.507059e+37  ;;  %v3089_v38 = vld [vmem:[%s5138_s4 + $0x68] sm:$0xff] }
 0xabf   :  { %v2783_v60 = vsub.f32 1.0, %v2782_v16 }
 0xac1   :  { %v2784_v26 = vmul.f32 %v3506_v12, %v2783_v60 }
 0xac2   :  { %v3508_v33 = vpop.eup %3507 }
 0xac3   :  { %v2802_v40 = vmul.f32 %v3508_v33, %v2800_v30  ;;  %v2785_v46 = vadd.f32 %v3506_v12, %v2784_v26  ;;  %vm2807_vm6 = vweird.f32 %v3508_v33 }
 0xac4   :  { %vm2808_vm8 = vmor %vm2806_vm7, %vm2807_vm6 }
 0xac5   :  { %v2803_v2 = vsub.f32 1.0, %v2802_v40  ;;  %v2789_v29 = vsel %vm2788_vm2, %v3506_v12, %v2785_v46  ;;  %v3734_v12 = vmov 0  }
 0xac6   :  { %v2794_v31 = vsel %vm2791_vm5, %v2793_v10, %v2789_v29  ;;  %3363 = vset.pattern.permute.xlu1 %v3734_v12  ;;  %3364 = vset.pattern.permute.xlu0 %v3734_v12  ;;  %v3091_v29 = vld [vmem:[%s5138_s4 + $0x78] sm:$0xff]  ;;  %v3123_v12 = vld [vmem:[%s3861_s8 + $0x30] sm:$0xff] }
 0xac7   :  { %v2804_v34 = vmul.f32 %v3508_v33, %v2803_v2  ;;  %v2816_v41 = vmul.f32 %v2794_v31, %v2774_v9  ;;  %3092 = vmatpush.msrb.mxu2 %v3091_v29  ;;  %2925 = vmatpush.msra.mxu0 %v3091_v29 }
 0xac9   :  { %v2805_v61 = vadd.f32 %v3508_v33, %v2804_v34  ;;  %v2817_v50 = vadd.f32 %v2816_v41, %v2715_v51  ;;  %v3090_v51 = vld [vmem:[%s5138_s4 + $0x70] sm:$0xff] }
 0xaca   :  { %3093 = vmatpush.msrb.mxu2 %v3090_v51  ;;  %2926 = vmatpush.msra.mxu0 %v3090_v51 }
 0xacb   :  { %v2809_v43 = vsel %vm2808_vm8, %v3508_v33, %v2805_v61  ;;  %3509 = vtanh.f32 %v2817_v50  ;;  %v3088_v61 = vld [vmem:[%s5138_s4 + $0x60] sm:$0xff] }
 0xacc   :  { %v2814_v57 = vsel %vm2811_vm9, %v2813_v42, %v2809_v43  ;;  %3094 = vmatpush.msrb.mxu2 %v3089_v38  ;;  %2927 = vmatpush.msra.mxu0 %v3089_v38  ;;  %v3087_v42 = vld [vmem:[%s5138_s4 + $0x58] sm:$0xff] }
 0xacd   :  { %v2819_v19 = vsub.f32 1.0, %v2814_v57  ;;  %v2821_v6 = vmul.f32 %v2814_v57, %v4954_v35  ;;  %v3086_v57 = vld [vmem:[%s5138_s4 + $0x50] sm:$0xff] }
 0xace   :  { %3095 = vmatpush.msrb.mxu2 %v3088_v61  ;;  %2928 = vmatpush.msra.mxu0 %v3088_v61  ;;  %v3117_v61 = vld [vmem:[%s3861_s8] sm:$0xff] }
 0xad0   :  { %3096 = vmatpush.msrb.mxu2 %v3087_v42  ;;  %2929 = vmatpush.msra.mxu0 %v3087_v42  ;;  %v3112_v42 = vld [vmem:[%s5139_s15] sm:$0x1] }
 0xad1   :  { %v3510_v1 = vpop.eup %3509 }
 0xad2   :  { %v2820_v0 = vmul.f32 %v3510_v1, %v2819_v19  ;;  %v3085_v1 = vld [vmem:[%s5138_s4 + $0x48] sm:$0xff]  ;;  %3097 = vmatpush.msrb.mxu2 %v3086_v57  ;;  %2930 = vmatpush.msra.mxu0 %v3086_v57  ;;  %v3114_v57 = vld [vmem:[%s5140_s18] sm:$0x1] }
 0xad4   :  { %v2822_v48 = vadd.f32 %v2821_v6, %v2820_v0  ;;  %3098 = vmatpush.msrb.mxu2 %v3085_v1  ;;  %2931 = vmatpush.msra.mxu0 %v3085_v1 }
 0xad6   :  { %2823 = vst [vmem:[#allocation7 + $0xa] sm:$0x3] %v2822_v48 }
 0xadd   :  { %v2825_v24 = vld [vmem:[#allocation7 + $0xa] sm:$0x3] }
 0xade   :  { %v2844_v58 = vld [vmem:[#allocation7 + $0xa] sm:$0x3]  ;;  %v2826_v11 = vsel %vm1763_vm11, %v2824_v62, %v2825_v24  ;;  %v3084_v62 = vld [vmem:[%s5138_s4 + $0x40] sm:$0xff] }
 0xadf   :  { %v2846_v7 = vsel %vm1763_vm11, %v2844_v58, %v2845_v47  ;;  %2827 = vst [vmem:[#allocation9] sm:$0x3] %v2826_v11  ;;  %vm2863_vm11 = vcmask 5120   ;;  %3099 = vmatpush.msrb.mxu2 %v3084_v62  ;;  %2932 = vmatpush.msra.mxu0 %v3084_v62 }
 0xae0   :  { %2847 = vst [vmem:[#allocation9 + $0xa] sm:$0x3] %v2846_v7 }
 0xae7   :  { %v4971_v18 = vld [vmem:[#allocation9 + $0x1] ss:$2 sm:$0x3f]  ;;  %v4976_v22 = vld [vmem:[#allocation9] ss:$2 sm:$0x3f] }
 0xae8   :  { %v3022_v35 = vmul.f32 %v3387_v20, %v4971_v18  ;;  %v2853_v37 = vmul.f32 %v3388_v63, %v4976_v22 }
 0xaea   :  { %v3023_v36 = vsel %vm2854_vm10, %v3022_v35, 0.0  ;;  %v2855_v8 = vsel %vm2854_vm10, %v2853_v37, 0.0 }
 0xaeb   :  { %3024 = vadd.xlane.f32.xlu0 %v3023_v36 }
 0xaf3   :  { %2856 = vadd.xlane.f32.xlu0 %v2855_v8 }
 0xb5e   :  { %v3025_v17 = vpop.xlane.xlu0 %3024 }
 0xb5f   :  { %v3030_v59 = vadd.f32 %v3389_v52, %v3025_v17 }
 0xb61   :  { %v3031_v28 = vsel %vm2863_vm11, %v3030_v59, -inf }
 0xb62   :  { %v3032_v4 = vrot.slane %v3031_v28, 4 }
 0xb64   :  { %v3033_v56 = vmax.f32 %v3031_v28, %v3032_v4 }
 0xb66   :  { %v3034_v49 = vrot.slane %v3033_v56, 2  ;;  %v2857_v14 = vpop.xlane.xlu0 %2856 }
 0xb67   :  { %v2862_v5 = vadd.f32 %v3390_v54, %v2857_v14 }
 0xb68   :  { %v3035_v3 = vmax.f32 %v3033_v56, %v3034_v49 }
 0xb69   :  { %v2864_v53 = vsel %vm2863_vm11, %v2862_v5, -inf }
 0xb6a   :  { %v3036_v13 = vrot.slane %v3035_v3, 1  ;;  %v2865_v55 = vrot.slane %v2864_v53, 4 }
 0xb6c   :  { %v3037_v21 = vmax.f32 %v3035_v3, %v3036_v13  ;;  %v2866_v15 = vmax.f32 %v2864_v53, %v2865_v55  ;;  %v3082_v3 = vld [vmem:[%s5138_s4 + $0x30] sm:$0xff]  ;;  %v3081_v53 = vld [vmem:[%s5138_s4 + $0x28] sm:$0xff]  ;;  %v3080_v13 = vld [vmem:[%s5138_s4 + $0x20] sm:$0xff] }
 0xb6d   :  { %v3079_v55 = vld [vmem:[%s5138_s4 + $0x18] sm:$0xff] }
 0xb6e   :  { %v3038_v23 = vsub.f32 %v3030_v59, %v3037_v21  ;;  %v2867_v30 = vrot.slane %v2866_v15, 2  ;;  %v3078_v21 = vld [vmem:[%s5138_s4 + $0x10] sm:$0xff] }
 0xb70   :  { %v3039_v16 = vmul.f32 1.442695, %v3038_v23  ;;  %v2868_v60 = vmax.f32 %v2866_v15, %v2867_v30  ;;  %v3077_v15 = vld [vmem:[%s5138_s4 + $0x8] sm:$0xff]  ;;  %v3076_v23 = vld [vmem:[%s5138_s4] sm:$0xff]  ;;  %v3124_v30 = vld [vmem:[%s3861_s8 + $0x38] sm:$0xff] }
 0xb71   :  { %3136 = vmatpush.msrb.mxu3 %v3124_v30  ;;  %2969 = vmatpush.msrb.mxu1 %v3124_v30 }
 0xb72   :  { %3511 = vpow2.f32 %v3039_v16  ;;  %v2869_v25 = vrot.slane %v2868_v60, 1  ;;  %v3122_v16 = vld [vmem:[%s3861_s8 + $0x28] sm:$0xff] }
 0xb73   :  { %3137 = vmatpush.msrb.mxu3 %v3123_v12  ;;  %2970 = vmatpush.msrb.mxu1 %v3123_v12 }
 0xb74   :  { %v2870_v26 = vmax.f32 %v2868_v60, %v2869_v25  ;;  %v3121_v60 = vld [vmem:[%s3861_s8 + $0x20] sm:$0xff] }
 0xb75   :  { %3138 = vmatpush.msrb.mxu3 %v3122_v16  ;;  %2971 = vmatpush.msrb.mxu1 %v3122_v16 }
 0xb76   :  { %v2871_v27 = vsub.f32 %v2862_v5, %v2870_v26  ;;  %v3083_v5 = vld [vmem:[%s5138_s4 + $0x38] sm:$0xff] }
 0xb77   :  { %3100 = vmatpush.msrb.mxu2 %v3083_v5  ;;  %2933 = vmatpush.msra.mxu0 %v3083_v5 }
 0xb78   :  { %v3512_v33 = vpop.eup %3511  ;;  %v2872_v39 = vmul.f32 1.442695, %v2871_v27  ;;  %3139 = vmatpush.msrb.mxu3 %v3121_v60  ;;  %2972 = vmatpush.msrb.mxu1 %v3121_v60 }
 0xb79   :  { %v3041_v40 = vsel %vm2863_vm11, %v3512_v33, 0.0  ;;  %3101 = vmatpush.msrb.mxu2 %v3082_v3  ;;  %2934 = vmatpush.msra.mxu0 %v3082_v3  ;;  %v3157_v3 = vld [vmem:[#allocation11] sm:$0x1] }
 0xb7a   :  { %v3042_v45 = vrot.slane %v3041_v40, 4  ;;  %3513 = vpow2.f32 %v2872_v39 }
 0xb7b   :  { %3102 = vmatpush.msrb.mxu2 %v3081_v53  ;;  %2935 = vmatpush.msra.mxu0 %v3081_v53 }
 0xb7c   :  { %v3043_v46 = vadd.f32 %v3042_v45, %v3041_v40 }
 0xb7d   :  { %3103 = vmatpush.msrb.mxu2 %v3080_v13  ;;  %2936 = vmatpush.msra.mxu0 %v3080_v13 }
 0xb7e   :  { %v3044_v10 = vrot.slane %v3043_v46, 2 }
 0xb7f   :  { %3104 = vmatpush.msrb.mxu2 %v3079_v55  ;;  %2937 = vmatpush.msra.mxu0 %v3079_v55 }
 0xb80   :  { %v4983_v2 = vpop.eup %3513  ;;  %v3045_v32 = vadd.f32 %v3044_v10, %v3043_v46 }
 0xb81   :  { %v2874_v9 = vsel %vm2863_vm11, %v4983_v2, 0.0  ;;  %3105 = vmatpush.msrb.mxu2 %v3078_v21  ;;  %2938 = vmatpush.msra.mxu0 %v3078_v21 }
 0xb82   :  { %v3046_v31 = vrot.slane %v3045_v32, 1  ;;  %v2875_v34 = vrot.slane %v2874_v9, 4 }
 0xb83   :  { %3106 = vmatpush.msrb.mxu2 %v3077_v15  ;;  %2939 = vmatpush.msra.mxu0 %v3077_v15 }
 0xb84   :  { %v3047_v41 = vadd.f32 %v3046_v31, %v3045_v32  ;;  %v2876_v44 = vadd.f32 %v2875_v34, %v2874_v9 }
 0xb85   :  { %3107 = vmatpush.msrb.mxu2 %v3076_v23  ;;  %2940 = vmatpush.msra.mxu0 %v3076_v23 }
 0xb86   :  { %3515 = vrcp.f32 %v3047_v41  ;;  %v2877_v50 = vrot.slane %v2876_v44, 2  ;;  %v3059_v58 = vand.u32 2147483648, %v3047_v41  ;;  %v3057_v11 = vand.u32 2147483647, %v3047_v41 }
 0xb87   :  { %vm3053_vm13 = vweird.f32 %v3047_v41 }
 0xb88   :  { %v2878_v43 = vadd.f32 %v2877_v50, %v2876_v44  ;;  %v3060_v35 = vor.u32 1.1754944e-38, %v3059_v58  ;;  %vm3058_vm15 = vcmp.eq.f32.partialorder %v3057_v11, 8.507059e+37  ;;  %v3118_v44 = vld [vmem:[%s3861_s8 + $0x8] sm:$0xff]  ;;  %v2989_v50 = vld [vmem:[%s3876_s22 + $0x18] sm:$0xff]  ;;  %v2988_v11 = vld [vmem:[%s3876_s22 + $0x10] sm:$0xff] }
 0xb8a   :  { %v2879_v19 = vrot.slane %v2878_v43, 1 }
 0xb8c   :  { %v3516_v0 = vpop.eup %3515  ;;  %v2880_v6 = vadd.f32 %v2879_v19, %v2878_v43  ;;  %v2945_v19 = vld [vmem:[%s5139_s15] sm:$0x1] }
 0xb8d   :  { %v3049_v48 = vmul.f32 %v3516_v0, %v3047_v41  ;;  %vm3054_vm12 = vweird.f32 %v3516_v0  ;;  %v3120_v41 = vld [vmem:[%s3861_s8 + $0x18] sm:$0xff] }
 0xb8e   :  { %3517 = vrcp.f32 %v2880_v6  ;;  %vm3055_vm14 = vmor %vm3053_vm13, %vm3054_vm12  ;;  %v2892_v17 = vand.u32 2147483648, %v2880_v6  ;;  %v2890_v28 = vand.u32 2147483647, %v2880_v6  ;;  %vm2886_vm1 = vweird.f32 %v2880_v6  ;;  %3140 = vmatpush.msrb.mxu3 %v3120_v41  ;;  %2973 = vmatpush.msrb.mxu1 %v3120_v41 }
 0xb8f   :  { %v3050_v24 = vsub.f32 1.0, %v3049_v48 }
 0xb90   :  { %v2893_v54 = vor.u32 1.1754944e-38, %v2892_v17  ;;  %vm2891_vm5 = vcmp.eq.f32.partialorder %v2890_v28, 8.507059e+37 }
 0xb91   :  { %v3051_v47 = vmul.f32 %v3516_v0, %v3050_v24 }
 0xb93   :  { %v3052_v7 = vadd.f32 %v3516_v0, %v3051_v47 }
 0xb94   :  { %v3518_v20 = vpop.eup %3517 }
 0xb95   :  { %v3056_v36 = vsel %vm3055_vm14, %v3516_v0, %v3052_v7  ;;  %v2882_v63 = vmul.f32 %v3518_v20, %v2880_v6  ;;  %vm2887_vm0 = vweird.f32 %v3518_v20  ;;  %v2947_v6 = vld [vmem:[%s5140_s18] sm:$0x1]  ;;  %v2987_v7 = vld [vmem:[%s3876_s22 + $0x8] sm:$0xff] }
 0xb96   :  { %v3061_v37 = vsel %vm3058_vm15, %v3060_v35, %v3056_v36  ;;  %vm2888_vm2 = vmor %vm2886_vm1, %vm2887_vm0  ;;  %v2981_v35 = vld [vmem:[%s5141_s11] sm:$0x1] }
 0xb97   :  { %v3062_v8 = vmul.f32 %v3512_v33, %v3061_v37  ;;  %v2883_v52 = vsub.f32 1.0, %v2882_v63  ;;  %v2983_v63 = vld [vmem:[%s3871_s12] sm:$0x1] }
 0xb99   :  { %3065 = vperm.xlu1 %3363, %v3062_v8   ;;  %v2884_v59 = vmul.f32 %v3518_v20, %v2883_v52  ;;  %v3148_v8 = vld [vmem:[%s5141_s11] sm:$0x1] }
 0xb9b   :  { %v2885_v4 = vadd.f32 %v3518_v20, %v2884_v59 }
 0xb9d   :  { %v2889_v56 = vsel %vm2888_vm2, %v3518_v20, %v2885_v4  ;;  %v2986_v20 = vld [vmem:[%s3876_s22] sm:$0xff] }
 0xb9e   :  { %v2894_v49 = vsel %vm2891_vm5, %v2893_v54, %v2889_v56  ;;  %v3150_v4 = vld [vmem:[%s3871_s12] sm:$0x1] }
 0xb9f   :  { %v2895_v14 = vmul.f32 %v4983_v2, %v2894_v49  ;;  %v2990_v49 = vld [vmem:[#allocation11] sm:$0x1] }
 0xba1   :  { %2898 = vperm.xlu1 %3363, %v2895_v14  }
 0xc0b   :  { %v3066_v25 = vpop.permute.xlu1 %3065 }
 0xc0c   :  { %v3068_v26 = vmul.f32 %v3066_v25, %v4971_v18 }
 0xc0e   :  { %v3069_v27 = vsel %vm2854_vm10, %v3068_v26, 0.0 }
 0xc0f   :  { %v3070_v33 = vrot.slane %v3069_v27, 4 }
 0xc11   :  { %v3071_v39 = vadd.f32 %v3070_v33, %v3069_v27 }
 0xc13   :  { %v3072_v40 = vrot.slane %v3071_v39, 2  ;;  %v2899_v45 = vpop.permute.xlu1 %2898 }
 0xc14   :  { %v2901_v46 = vmul.f32 %v2899_v45, %v4976_v22  ;;  %v3119_v22 = vld [vmem:[%s3861_s8 + $0x10] sm:$0xff] }
 0xc15   :  { %v3073_v10 = vadd.f32 %v3072_v40, %v3071_v39  ;;  %3141 = vmatpush.msrb.mxu3 %v3119_v22  ;;  %2974 = vmatpush.msrb.mxu1 %v3119_v22 }
 0xc16   :  { %v2902_v2 = vsel %vm2854_vm10, %v2901_v46, 0.0 }
 0xc17   :  { %v3074_v32 = vrot.slane %v3073_v10, 1  ;;  %v2903_v9 = vrot.slane %v2902_v2, 4  ;;  %3142 = vmatpush.msrb.mxu3 %v3118_v44  ;;  %2975 = vmatpush.msrb.mxu1 %v3118_v44 }
 0xc19   :  { %v2904_v29 = vadd.f32 %v2903_v9, %v2902_v2  ;;  %v3075_v51 = vadd.f32 %v3074_v32, %v3073_v10  ;;  %3143 = vmatpush.msrb.mxu3 %v3117_v61  ;;  %2976 = vmatpush.msrb.mxu1 %v3117_v61 }
 0xc1b   :  { %v2905_v18 = vrot.slane %v2904_v29, 2  ;;  %3108 = vmatmul.f32.vlgmr.msrb.gmra.mxu2 %v3075_v51  ;;  %3006 = vmatpush.msra.mxu1 %v2989_v50 }
 0xc1d   :  { %v2906_v31 = vadd.f32 %v2905_v18, %v2904_v29  ;;  %3007 = vmatpush.msra.mxu1 %v2988_v11 }
 0xc1f   :  { %v2907_v34 = vrot.slane %v2906_v31, 1  ;;  %3008 = vmatpush.msra.mxu1 %v2987_v7 }
 0xc21   :  { %v2908_v38 = vadd.f32 %v2907_v34, %v2906_v31  ;;  %3009 = vmatpush.msra.mxu1 %v2986_v20 }
 0xc23   :  { %2941 = vmatmul.f32.vlgmr.msra.gmra.mxu0 %v2908_v38 }
 0xc9e   :  { %v3109_v43 = vpop.f32.mrf.mxu2 }
 0xc9f   :  { %v3113_v1 = vmul.f32 %v3112_v42, %v3109_v43 }
 0xca0   :  { %v2942_v0 = vpop.f32.mrf.mxu0 }
 0xca1   :  { %v3115_v48 = vadd.f32 %v3114_v57, %v3113_v1  ;;  %v2946_v62 = vmul.f32 %v2945_v19, %v2942_v0 }
 0xca3   :  { %v3116_v24 = vmax.f32 %v3115_v48, 0.0  ;;  %v2948_v58 = vadd.f32 %v2947_v6, %v2946_v62 }
 0xca5   :  { %v2949_v47 = vmax.f32 %v2948_v58, 0.0  ;;  %3321 = vmatmul.msk.f32.vlgmr.msrb.gmra.mxu3 %vm472_vm4, %v3116_v24 }
 0xca7   :  { %3319 = vmatmul.msk.f32.vlgmr.msrb.gmra.mxu1 %vm472_vm4, %v2949_v47  ;;  %vm3014_vm4 = vcmask 0  }
 0xca8   :  { %3173 = vmatpush.msrb.mxu1 %v2989_v50 }
 0xcaa   :  { %3174 = vmatpush.msrb.mxu1 %v2988_v11 }
 0xcac   :  { %3175 = vmatpush.msrb.mxu1 %v2987_v7 }
 0xcae   :  { %3176 = vmatpush.msrb.mxu1 %v2986_v20 }
 0xd24   :  { %v2978_v36 = vpop.f32.mrf.mxu1 }
 0xd25   :  { %v2982_v37 = vmul.f32 %v2981_v35, %v2978_v36 }
 0xd27   :  { %v2984_v52 = vadd.f32 %v2983_v63, %v2982_v37 }
 0xd28   :  { %v3145_v17 = vpop.f32.mrf.mxu3 }
 0xd29   :  { %v2985_v59 = vmax.f32 %v2984_v52, 0.0  ;;  %v3149_v28 = vmul.f32 %v3148_v8, %v3145_v17 }
 0xd2b   :  { %3320 = vmatmul.msk.f32.vlgmr.msra.gmra.mxu1 %vm345_vm3, %v2985_v59  ;;  %v3151_v54 = vadd.f32 %v3150_v4, %v3149_v28 }
 0xd2d   :  { %v3152_v56 = vmax.f32 %v3151_v54, 0.0 }
 0xd33   :  { %3322 = vmatmul.msk.f32.vlgmr.msrb.gmra.mxu1 %vm345_vm3, %v3152_v56 }
 0xda8   :  { %v3011_v14 = vpop.f32.mrf.mxu1 }
 0xda9   :  { %v3012_v5 = vadd.f32 %v3011_v14, %v2990_v49 }
 0xdab   :  { %3015 = vst.msk [vmem:[%s3881_s1] sm:$0x1] %vm3014_vm4, %v3012_v5 }
 0xdb0   :  { %v3178_v53 = vpop.f32.mrf.mxu1 }
 0xdb1   :  { %v3179_v13 = vadd.f32 %v3178_v53, %v3157_v3 }
 0xdb3   :  { %3181 = vst.msk [vmem:[%s3881_s1 + $0x1] sm:$0x1] %vm3014_vm4, %v3179_v13 }
 0xdb4   :  { %3186 = vsyncpa [#allocation13], 1 }
 0xdb5   :  { %3187 = vsyncpa [#allocation15], 1 }
 0xdb6   :  { %3188 = vsyncpa [#allocation18], 1 }
 0xdb7   :  { %3189 = vsyncpa [#allocation21], 1 }

</bundles_post_ra>
